<compile_context>
chip_gen: v5e
topology: v5e:2x2
jax: 0.10.0
libtpu: 0.0.40
codegen_flags: <defaults>
</compile_context>

<pallas_src>
import functools

import numpy as np
import jax
import jax.numpy as jnp
from jax import lax
from jax.experimental import pallas as pl
from jax.experimental.pallas import tpu as pltpu

STATE_DIM = 24
ACTION_DIM = 4
HIDDEN = 72          # NormalizedLSTM hidden size used inside Critic
FC2 = 128

# Lane-padded sizes (TPU vreg lane width = 128).
HPAD = 128           # hidden padded to a full lane tile
NGATES = 4
GPAD = NGATES * HPAD   # fused i|f|g|o gate width (forward); each gate lane-aligned
GPAD_R = 3 * HPAD      # fused i|g|o gate width (reverse; f gate never read)


def _critic_kernel(state_ref, act_ref,
                   emb_w_ref, emb_b_ref, ln_g_ref, ln_b_ref,
                   wih_f_ref, whh_f_ref, b_f_ref,
                   wih_r_ref, b_r_ref,
                   fc2_w_ref, fc2_b_ref, fcout_ref,
                   out_ref, xg_ref, *, T, NP):
    """state_ref: (T*NP, STATE_DIM) time-major.  act_ref: (NP, 128) with the
    action pre-placed at lanes HIDDEN..HIDDEN+ACTION_DIM-1."""
    HP = HPAD
    inv_h = 1.0 / HIDDEN

    lane = lax.broadcasted_iota(jnp.int32, (1, HP), 1)
    feat_mask = (lane < HIDDEN).astype(jnp.float32)        # real (non-padded) lanes

    # ---- batched embedding (Linear + LayerNorm(eps=1e-5) + tanh), all T*NP rows.
    # Hoisted off the recurrence: one (T*NP, 24) @ (24, 128) matmul.
    x = state_ref[...]
    z = (jnp.dot(x, emb_w_ref[...], preferred_element_type=jnp.float32)
         + emb_b_ref[...]) * feat_mask                     # explicit mask: padded lanes == 0
    mu = jnp.sum(z, axis=-1, keepdims=True) * inv_h        # LN stats over the 72 real lanes
    d = (z - mu) * feat_mask
    var = jnp.sum(d * d, axis=-1, keepdims=True) * inv_h
    zn = (z - mu) * lax.rsqrt(var + 1e-5)
    e = jnp.tanh(zn * ln_g_ref[...] + ln_b_ref[...]) * feat_mask   # (T*NP, HP)

    # ---- input-side gate pre-activations for the forward LSTM, all timesteps:
    # one (T*NP, 128) @ (128, 512) matmul, off the serial chain.
    xg_ref[...] = (jnp.dot(e, wih_f_ref[...], preferred_element_type=jnp.float32)
                   + b_f_ref[...])

    # ---- reverse direction FIRST (ends e's live range before the recurrence).
    # LastStatePooler keeps output[:, T-1]; for the reverse scan that is exactly
    # one LSTM step from the zero state, so h@Whh_r and f*c vanish and only the
    # i|g|o gates (384 fused lanes) are needed.
    e_last = e[(T - 1) * NP:T * NP, :]
    pre_r = (jnp.dot(e_last, wih_r_ref[...], preferred_element_type=jnp.float32)
             + b_r_ref[...])
    i_r = jax.nn.sigmoid(pre_r[:, 0 * HP:1 * HP])
    g_r = jnp.tanh(pre_r[:, 1 * HP:2 * HP])
    o_r = jax.nn.sigmoid(pre_r[:, 2 * HP:3 * HP])
    h_bwd = o_r * jnp.tanh(i_r * g_r)

    # ---- forward recurrence, fully unrolled (T is static) --------------------
    # NOTE: further micro-opt candidate: hold Whh_f resident in the MXU across
    # the unrolled steps (pltpu.matmul_push_rhs / matmul_acc_lhs / matmul_pop)
    # so only the (NP,128) LHS streams per step; kept on jnp.dot here for
    # compile robustness across v5e (4x128 MXU) / v6e / v7x (2x256 MXU).
    h = jnp.zeros((NP, HP), jnp.float32)
    c = jnp.zeros((NP, HP), jnp.float32)
    for t in range(T):
        pre = (xg_ref[pl.ds(t * NP, NP), :]
               + jnp.dot(h, whh_f_ref[...], preferred_element_type=jnp.float32))
        i = jax.nn.sigmoid(pre[:, 0 * HP:1 * HP])
        f = jax.nn.sigmoid(pre[:, 1 * HP:2 * HP])
        g = jnp.tanh(pre[:, 2 * HP:3 * HP])
        o = jax.nn.sigmoid(pre[:, 3 * HP:4 * HP])
        c = f * c + i * g
        h = o * jnp.tanh(c)

    # ---- head: action folded into the dead lanes 72..75 of s (one VPU add);
    # fc2's action rows are row-fused into fc2_w -> a single (NP,128)@(128,128)
    # MXU pass instead of two.
    sa = 0.5 * (h + h_bwd) + act_ref[...]
    z2 = (jnp.dot(sa, fc2_w_ref[...], preferred_element_type=jnp.float32)
          + fc2_b_ref[...])
    g2 = 0.5 * z2 * (1.0 + lax.erf(z2 * 0.7071067811865476))   # exact GELU
    # fc_out (128 -> 1, *10 folded into the weights) as VPU multiply + lane sum,
    # broadcast into a lane-dense (NP, 128) output slab (wrapper keeps column 0).
    q = jnp.sum(g2 * fcout_ref[...], axis=-1, keepdims=True)
    out_ref[...] = jnp.broadcast_to(q, out_ref.shape)


def _pad2(w, rows, cols):
    return jnp.pad(w, ((0, rows - w.shape[0]), (0, cols - w.shape[1])))


def _pack_params(p):
    """Pad/fuse logical params into the MXU-friendly layout the kernel expects."""
    def fuse(wih, whh, b, gates):
        wih_p = jnp.concatenate([_pad2(wih[k], HPAD, HPAD) for k in gates], axis=1)
        b_p = jnp.concatenate([_pad2(b[k], 1, HPAD) for k in gates], axis=1)
        whh_p = None
        if whh is not None:
            whh_p = jnp.concatenate([_pad2(whh[k], HPAD, HPAD) for k in gates], axis=1)
        return wih_p, whh_p, b_p

    # Forward direction: all 4 gates, each on its own 128-lane boundary.
    wih_f, whh_f, b_f = fuse(p["wih_f"], p["whh_f"], p["b_f"], (0, 1, 2, 3))
    # Reverse direction: single step from the zero state -> f gate never read,
    # Whh_r never needed.  Pack only i|g|o (384 lanes).
    wih_r, _, b_r = fuse(p["wih_r"], None, p["b_r"], (0, 2, 3))
    # fc2 over concat([s, action]): row-fuse the action rows (72..75) into one
    # (128, 128) weight so the head is a single MXU pass.
    fc2_w = _pad2(jnp.concatenate([p["fc2_ws"], p["fc2_wa"]], axis=0), HPAD, FC2)
    return (
        _pad2(p["emb_w"], STATE_DIM, HPAD),                # compact 24-row K, 128 lanes out
        _pad2(p["emb_b"], 1, HPAD),
        _pad2(p["ln_g"], 1, HPAD), _pad2(p["ln_b"], 1, HPAD),
        wih_f, whh_f, b_f,
        wih_r, b_r,
        fc2_w, p["fc2_b"],
        jnp.transpose(p["fcout_w"] * 10.0),                # (1, FC2); *10 folded in
    )


def critic_forward(state, action, params):
    """state: (N, T, state_dim) batch-first; action: (N, action_dim) -> (N, 1)."""
    N, T, S = state.shape
    A = action.shape[1]
    NP = ((N + 7) // 8) * 8                  # pad batch rows to full sublane tiles

    # Time-major, batch-padded, COMPACT last dim (no 24->128 lane padding: ~5x
    # less state DMA; the MXU pass count for K<=128 is unchanged).
    st = jnp.transpose(state.astype(jnp.float32), (1, 0, 2))   # (T, N, S)
    st = jnp.pad(st, ((0, 0), (0, NP - N), (0, 0))).reshape(T * NP, S)
    # Action pre-placed at lanes HIDDEN..HIDDEN+A-1 of a (NP, 128) slab so the
    # head matmul can consume [s | action] with one weight.
    act = jnp.pad(action.astype(jnp.float32),
                  ((0, NP - N), (HIDDEN, HPAD - HIDDEN - A)))

    args = (st, act) + _pack_params(params)
    vmem = pl.BlockSpec(memory_space=pltpu.MemorySpace.VMEM)
    # NOTE: at large batch, add a 1-D "parallel" grid over NP-row blocks
    # (constant index_maps for all weights so they DMA once):
    #   * v7x: needed early -- 2 TensorCores per chip, 64 MiB VMEM (32 MiB scoped
    #     default); the ~24 KB/padded-row footprint caps a grid-less kernel near
    #     NP ~ 1.3k (scoped) / ~2.7k (physical).
    #   * v5e: 16 MiB scoped default (caps near NP ~ 650) -- either raise
    #     vmem_limit_bytes via pltpu.CompilerParams or add the grid with large
    #     (512-1024 row) blocks since each grid step costs ~0.35 us.
    # Unnecessary at this size (NP = 8).
    out = pl.pallas_call(
        functools.partial(_critic_kernel, T=T, NP=NP),
        out_shape=jax.ShapeDtypeStruct((NP, FC2), jnp.float32),
        in_specs=[vmem] * len(args),
        out_specs=vmem,
        scratch_shapes=[pltpu.VMEM((T * NP, GPAD), jnp.float32)],
    )(*args)
    return out[:N, :1]


def init_params(key):
    """Deterministic synthetic parameters with the shapes implied by __init__."""
    ks = jax.random.split(key, 11)
    u = lambda k, shape, s: jax.random.uniform(k, shape, jnp.float32, -s, s)
    H, S, A = HIDDEN, STATE_DIM, ACTION_DIM
    b_emb = np.sqrt(6.0 / (S + H)) * (5.0 / 3.0)          # xavier_uniform, tanh gain
    b_lstm = 1.0 / np.sqrt(H)                              # PyTorch LSTM default
    b_fc2 = np.sqrt(6.0 / (H + A + FC2)) * np.sqrt(2.0)    # xavier_uniform, relu gain
    return {
        "emb_w": u(ks[0], (S, H), b_emb),
        "emb_b": jnp.zeros((1, H), jnp.float32),           # nn.init.zeros_
        "ln_g": jnp.ones((1, H), jnp.float32),
        "ln_b": jnp.zeros((1, H), jnp.float32),
        "wih_f": u(ks[1], (4, H, H), b_lstm),
        "whh_f": u(ks[2], (4, H, H), b_lstm),
        "b_f": u(ks[3], (4, 1, H), b_lstm) - 0.1,          # b_ih + b_hh (= -0.1)
        "wih_r": u(ks[4], (4, H, H), b_lstm),
        "whh_r": u(ks[5], (4, H, H), b_lstm),
        "b_r": u(ks[6], (4, 1, H), b_lstm) - 0.1,
        "fc2_ws": u(ks[7], (H, FC2), b_fc2),
        "fc2_wa": u(ks[8], (A, FC2), b_fc2),
        "fc2_b": u(ks[9], (1, FC2), 1.0 / np.sqrt(H + A)),
        "fcout_w": u(ks[10], (FC2, 1), 0.003),             # uniform(-0.003, 0.003)
    }


def critic_reference(state, action, p):
    """Pure-JAX reference matching the PyTorch forward (full bidirectional scan)."""
    x = state.astype(jnp.float32)
    z = jnp.einsum("nts,sh->nth", x, p["emb_w"]) + p["emb_b"]
    mu = z.mean(-1, keepdims=True)
    var = ((z - mu) ** 2).mean(-1, keepdims=True)
    e = jnp.tanh((z - mu) * lax.rsqrt(var + 1e-5) * p["ln_g"] + p["ln_b"])
    N, T, _ = x.shape
    H = HIDDEN

    def step(h, c, x_t, wih, whh, b):
        gates = [x_t @ wih[k] + h @ whh[k] + b[k] for k in range(4)]
        i = jax.nn.sigmoid(gates[0]); f = jax.nn.sigmoid(gates[1])
        g = jnp.tanh(gates[2]); o = jax.nn.sigmoid(gates[3])
        c = f * c + i * g
        h = o * jnp.tanh(c)
        return h, c

    h = c = jnp.zeros((N, H), jnp.float32)
    for t in range(T):
        h, c = step(h, c, e[:, t], p["wih_f"], p["whh_f"], p["b_f"])
    h_fwd_last = h

    h = c = jnp.zeros((N, H), jnp.float32)
    outs_bwd = [None] * T
    for t in range(T - 1, -1, -1):
        h, c = step(h, c, e[:, t], p["wih_r"], p["whh_r"], p["b_r"])
        outs_bwd[t] = h
    h_bwd_last = outs_bwd[T - 1]          # reverse-direction output at t = T-1

    s = 0.5 * (h_fwd_last + h_bwd_last)
    zz = s @ p["fc2_ws"] + action.astype(jnp.float32) @ p["fc2_wa"] + p["fc2_b"]
    g = 0.5 * zz * (1.0 + lax.erf(zz * 0.7071067811865476))
    return (g @ p["fcout_w"]) * 10.0


if __name__ == "__main__":
    key = jax.random.PRNGKey(0)
    kp, ks, ka = jax.random.split(key, 3)
    params = init_params(kp)

    N, T = 2, 8
    state = jax.random.normal(ks, (N, T, STATE_DIM), jnp.float32)
    action = jax.random.normal(ka, (N, ACTION_DIM), jnp.float32)

    out = jax.jit(critic_forward)(state, action, params)
    out = jax.block_until_ready(out)

    ref = critic_reference(state, action, params)
    np.testing.assert_allclose(np.asarray(out), np.asarray(ref), atol=1e-4, rtol=1e-4)
    assert out.shape == (N, 1)
    print("KERNEL_OK")
</pallas_src>

<mosaic_0001>
module attributes {stable_mosaic.version = 11 : i64} {
  func.func @_critic_kernel(%arg0: memref<64x24xf32, #tpu.memory_space<vmem>>, %arg1: memref<8x128xf32, #tpu.memory_space<vmem>>, %arg2: memref<24x128xf32, #tpu.memory_space<vmem>>, %arg3: memref<1x128xf32, #tpu.memory_space<vmem>>, %arg4: memref<1x128xf32, #tpu.memory_space<vmem>>, %arg5: memref<1x128xf32, #tpu.memory_space<vmem>>, %arg6: memref<128x512xf32, #tpu.memory_space<vmem>>, %arg7: memref<128x512xf32, #tpu.memory_space<vmem>>, %arg8: memref<1x512xf32, #tpu.memory_space<vmem>>, %arg9: memref<128x384xf32, #tpu.memory_space<vmem>>, %arg10: memref<1x384xf32, #tpu.memory_space<vmem>>, %arg11: memref<128x128xf32, #tpu.memory_space<vmem>>, %arg12: memref<1x128xf32, #tpu.memory_space<vmem>>, %arg13: memref<1x128xf32, #tpu.memory_space<vmem>>, %arg14: memref<8x128xf32, #tpu.memory_space<vmem>>, %arg15: memref<64x512xf32, #tpu.memory_space<vmem>>) attributes {dimension_semantics = [], scalar_prefetch = 0 : i64, scratch_operands = 1 : i64, tpu.core_type = #tpu.core_type<tc>} {
    %0 = tpu.iota {dimensions = array<i32: 1>} : vector<1x128xi32>
    %c72_i32 = arith.constant 72 : i32
    %1 = vector.broadcast %c72_i32 : i32 to vector<1x128xi32>
    %2 = arith.cmpi slt, %0, %1 : vector<1x128xi32>
    %3 = arith.extui %2 : vector<1x128xi1> to vector<1x128xi32>
    %4 = arith.sitofp %3 : vector<1x128xi32> to vector<1x128xf32>
    %c0 = arith.constant 0 : index
    %c0_0 = arith.constant 0 : index
    %5 = vector.load %arg0[%c0, %c0_0] : memref<64x24xf32, #tpu.memory_space<vmem>>, vector<64x24xf32>
    %c0_1 = arith.constant 0 : index
    %c0_2 = arith.constant 0 : index
    %6 = vector.load %arg2[%c0_1, %c0_2] : memref<24x128xf32, #tpu.memory_space<vmem>>, vector<24x128xf32>
    %cst = arith.constant dense<0.000000e+00> : vector<64x128xf32>
    %7 = tpu.matmul %5, %6, %cst {dimension_numbers = #tpu.dot_dimension_numbers<[1], [0], [0], [1], [0, 0, 1, 1], [], []>} : vector<64x24xf32>, vector<24x128xf32>, vector<64x128xf32> -> vector<64x128xf32>
    %c0_3 = arith.constant 0 : index
    %c0_4 = arith.constant 0 : index
    %8 = vector.load %arg3[%c0_3, %c0_4] : memref<1x128xf32, #tpu.memory_space<vmem>>, vector<1x128xf32>
    %9 = vector.broadcast %8 : vector<1x128xf32> to vector<64x128xf32>
    %10 = arith.addf %7, %9 : vector<64x128xf32>
    %11 = vector.broadcast %4 : vector<1x128xf32> to vector<64x128xf32>
    %12 = arith.mulf %10, %11 : vector<64x128xf32>
    %cst_5 = arith.constant dense<0.000000e+00> : vector<64xf32>
    %13 = vector.multi_reduction <add>, %12, %cst_5 [1] : vector<64x128xf32> to vector<64xf32>
    %14 = vector.shape_cast %13 : vector<64xf32> to vector<64x1xf32>
    %cst_6 = arith.constant 0.013888889 : f32
    %15 = vector.broadcast %cst_6 : f32 to vector<64x1xf32>
    %16 = arith.mulf %14, %15 : vector<64x1xf32>
    %17 = vector.broadcast %16 : vector<64x1xf32> to vector<64x128xf32>
    %18 = arith.subf %12, %17 : vector<64x128xf32>
    %19 = vector.broadcast %4 : vector<1x128xf32> to vector<64x128xf32>
    %20 = arith.mulf %18, %19 : vector<64x128xf32>
    %21 = arith.mulf %20, %20 : vector<64x128xf32>
    %cst_7 = arith.constant dense<0.000000e+00> : vector<64xf32>
    %22 = vector.multi_reduction <add>, %21, %cst_7 [1] : vector<64x128xf32> to vector<64xf32>
    %23 = vector.shape_cast %22 : vector<64xf32> to vector<64x1xf32>
    %cst_8 = arith.constant 0.013888889 : f32
    %24 = vector.broadcast %cst_8 : f32 to vector<64x1xf32>
    %25 = arith.mulf %23, %24 : vector<64x1xf32>
    %26 = vector.broadcast %16 : vector<64x1xf32> to vector<64x128xf32>
    %27 = arith.subf %12, %26 : vector<64x128xf32>
    %cst_9 = arith.constant 9.99999974E-6 : f32
    %28 = vector.broadcast %cst_9 : f32 to vector<64x1xf32>
    %29 = arith.addf %25, %28 : vector<64x1xf32>
    %30 = math.rsqrt %29 : vector<64x1xf32>
    %31 = vector.broadcast %30 : vector<64x1xf32> to vector<64x128xf32>
    %32 = arith.mulf %27, %31 : vector<64x128xf32>
    %c0_10 = arith.constant 0 : index
    %c0_11 = arith.constant 0 : index
    %33 = vector.load %arg4[%c0_10, %c0_11] : memref<1x128xf32, #tpu.memory_space<vmem>>, vector<1x128xf32>
    %34 = vector.broadcast %33 : vector<1x128xf32> to vector<64x128xf32>
    %35 = arith.mulf %32, %34 : vector<64x128xf32>
    %c0_12 = arith.constant 0 : index
    %c0_13 = arith.constant 0 : index
    %36 = vector.load %arg5[%c0_12, %c0_13] : memref<1x128xf32, #tpu.memory_space<vmem>>, vector<1x128xf32>
    %37 = vector.broadcast %36 : vector<1x128xf32> to vector<64x128xf32>
    %38 = arith.addf %35, %37 : vector<64x128xf32>
    %39 = math.tanh %38 : vector<64x128xf32>
    %40 = vector.broadcast %4 : vector<1x128xf32> to vector<64x128xf32>
    %41 = arith.mulf %39, %40 : vector<64x128xf32>
    %c0_14 = arith.constant 0 : index
    %c0_15 = arith.constant 0 : index
    %42 = vector.load %arg6[%c0_14, %c0_15] : memref<128x512xf32, #tpu.memory_space<vmem>>, vector<128x512xf32>
    %cst_16 = arith.constant dense<0.000000e+00> : vector<64x512xf32>
    %43 = tpu.matmul %41, %42, %cst_16 {dimension_numbers = #tpu.dot_dimension_numbers<[1], [0], [0], [1], [0, 0, 1, 1], [], []>} : vector<64x128xf32>, vector<128x512xf32>, vector<64x512xf32> -> vector<64x512xf32>
    %c0_17 = arith.constant 0 : index
    %c0_18 = arith.constant 0 : index
    %44 = vector.load %arg8[%c0_17, %c0_18] : memref<1x512xf32, #tpu.memory_space<vmem>>, vector<1x512xf32>
    %45 = vector.broadcast %44 : vector<1x512xf32> to vector<64x512xf32>
    %46 = arith.addf %43, %45 : vector<64x512xf32>
    %c0_19 = arith.constant 0 : index
    %c0_20 = arith.constant 0 : index
    %47 = vector.load %arg15[%c0_19, %c0_20] : memref<64x512xf32, #tpu.memory_space<vmem>>, vector<64x512xf32>
    tpu.vector_store %arg15[%c0_19, %c0_20], %46 {strides = array<i32>} : memref<64x512xf32, #tpu.memory_space<vmem>>, vector<64x512xf32>,
    %48 = vector.extract_strided_slice %41 {offsets = [56, 0], sizes = [8, 128], strides = [1, 1]} : vector<64x128xf32> to vector<8x128xf32>
    %c0_21 = arith.constant 0 : index
    %c0_22 = arith.constant 0 : index
    %49 = vector.load %arg9[%c0_21, %c0_22] : memref<128x384xf32, #tpu.memory_space<vmem>>, vector<128x384xf32>
    %cst_23 = arith.constant dense<0.000000e+00> : vector<8x384xf32>
    %50 = tpu.matmul %48, %49, %cst_23 {dimension_numbers = #tpu.dot_dimension_numbers<[1], [0], [0], [1], [0, 0, 1, 1], [], []>} : vector<8x128xf32>, vector<128x384xf32>, vector<8x384xf32> -> vector<8x384xf32>
    %c0_24 = arith.constant 0 : index
    %c0_25 = arith.constant 0 : index
    %51 = vector.load %arg10[%c0_24, %c0_25] : memref<1x384xf32, #tpu.memory_space<vmem>>, vector<1x384xf32>
    %52 = vector.broadcast %51 : vector<1x384xf32> to vector<8x384xf32>
    %53 = arith.addf %50, %52 : vector<8x384xf32>
    %54 = vector.extract_strided_slice %53 {offsets = [0, 0], sizes = [8, 128], strides = [1, 1]} : vector<8x384xf32> to vector<8x128xf32>
    %55 = arith.negf %54 : vector<8x128xf32>
    %56 = math.exp %55 : vector<8x128xf32>
    %cst_26 = arith.constant 1.000000e+00 : f32
    %57 = vector.broadcast %cst_26 : f32 to vector<8x128xf32>
    %58 = arith.addf %57, %56 : vector<8x128xf32>
    %59 = arith.divf %57, %58 : vector<8x128xf32>
    %60 = vector.extract_strided_slice %53 {offsets = [0, 128], sizes = [8, 128], strides = [1, 1]} : vector<8x384xf32> to vector<8x128xf32>
    %61 = math.tanh %60 : vector<8x128xf32>
    %62 = vector.extract_strided_slice %53 {offsets = [0, 256], sizes = [8, 128], strides = [1, 1]} : vector<8x384xf32> to vector<8x128xf32>
    %63 = arith.negf %62 : vector<8x128xf32>
    %64 = math.exp %63 : vector<8x128xf32>
    %cst_27 = arith.constant 1.000000e+00 : f32
    %65 = vector.broadcast %cst_27 : f32 to vector<8x128xf32>
    %66 = arith.addf %65, %64 : vector<8x128xf32>
    %67 = arith.divf %65, %66 : vector<8x128xf32>
    %68 = arith.mulf %59, %61 : vector<8x128xf32>
    %69 = math.tanh %68 : vector<8x128xf32>
    %70 = arith.mulf %67, %69 : vector<8x128xf32>
    %cst_28 = arith.constant 0.000000e+00 : f32
    %71 = vector.broadcast %cst_28 : f32 to vector<8x128xf32>
    %cst_29 = arith.constant 0.000000e+00 : f32
    %72 = vector.broadcast %cst_29 : f32 to vector<8x128xf32>
    %c0_30 = arith.constant 0 : index
    %c0_31 = arith.constant 0 : index
    %73 = vector.load %arg15[%c0_30, %c0_31] : memref<64x512xf32, #tpu.memory_space<vmem>>, vector<8x512xf32>
    %c0_32 = arith.constant 0 : index
    %c0_33 = arith.constant 0 : index
    %74 = vector.load %arg7[%c0_32, %c0_33] : memref<128x512xf32, #tpu.memory_space<vmem>>, vector<128x512xf32>
    %cst_34 = arith.constant dense<0.000000e+00> : vector<8x512xf32>
    %75 = tpu.matmul %71, %74, %cst_34 {dimension_numbers = #tpu.dot_dimension_numbers<[1], [0], [0], [1], [0, 0, 1, 1], [], []>} : vector<8x128xf32>, vector<128x512xf32>, vector<8x512xf32> -> vector<8x512xf32>
    %76 = arith.addf %73, %75 : vector<8x512xf32>
    %77 = vector.extract_strided_slice %76 {offsets = [0, 0], sizes = [8, 128], strides = [1, 1]} : vector<8x512xf32> to vector<8x128xf32>
    %78 = arith.negf %77 : vector<8x128xf32>
    %79 = math.exp %78 : vector<8x128xf32>
    %cst_35 = arith.constant 1.000000e+00 : f32
    %80 = vector.broadcast %cst_35 : f32 to vector<8x128xf32>
    %81 = arith.addf %80, %79 : vector<8x128xf32>
    %82 = arith.divf %80, %81 : vector<8x128xf32>
    %83 = vector.extract_strided_slice %76 {offsets = [0, 128], sizes = [8, 128], strides = [1, 1]} : vector<8x512xf32> to vector<8x128xf32>
    %84 = arith.negf %83 : vector<8x128xf32>
    %85 = math.exp %84 : vector<8x128xf32>
    %cst_36 = arith.constant 1.000000e+00 : f32
    %86 = vector.broadcast %cst_36 : f32 to vector<8x128xf32>
    %87 = arith.addf %86, %85 : vector<8x128xf32>
    %88 = arith.divf %86, %87 : vector<8x128xf32>
    %89 = vector.extract_strided_slice %76 {offsets = [0, 256], sizes = [8, 128], strides = [1, 1]} : vector<8x512xf32> to vector<8x128xf32>
    %90 = math.tanh %89 : vector<8x128xf32>
    %91 = vector.extract_strided_slice %76 {offsets = [0, 384], sizes = [8, 128], strides = [1, 1]} : vector<8x512xf32> to vector<8x128xf32>
    %92 = arith.negf %91 : vector<8x128xf32>
    %93 = math.exp %92 : vector<8x128xf32>
    %cst_37 = arith.constant 1.000000e+00 : f32
    %94 = vector.broadcast %cst_37 : f32 to vector<8x128xf32>
    %95 = arith.addf %94, %93 : vector<8x128xf32>
    %96 = arith.divf %94, %95 : vector<8x128xf32>
    %97 = arith.mulf %88, %72 : vector<8x128xf32>
    %98 = arith.mulf %82, %90 : vector<8x128xf32>
    %99 = arith.addf %97, %98 : vector<8x128xf32>
    %100 = math.tanh %99 : vector<8x128xf32>
    %101 = arith.mulf %96, %100 : vector<8x128xf32>
    %c8 = arith.constant 8 : index
    %c0_38 = arith.constant 0 : index
    %102 = vector.load %arg15[%c8, %c0_38] : memref<64x512xf32, #tpu.memory_space<vmem>>, vector<8x512xf32>
    %c0_39 = arith.constant 0 : index
    %c0_40 = arith.constant 0 : index
    %103 = vector.load %arg7[%c0_39, %c0_40] : memref<128x512xf32, #tpu.memory_space<vmem>>, vector<128x512xf32>
    %cst_41 = arith.constant dense<0.000000e+00> : vector<8x512xf32>
    %104 = tpu.matmul %101, %103, %cst_41 {dimension_numbers = #tpu.dot_dimension_numbers<[1], [0], [0], [1], [0, 0, 1, 1], [], []>} : vector<8x128xf32>, vector<128x512xf32>, vector<8x512xf32> -> vector<8x512xf32>
    %105 = arith.addf %102, %104 : vector<8x512xf32>
    %106 = vector.extract_strided_slice %105 {offsets = [0, 0], sizes = [8, 128], strides = [1, 1]} : vector<8x512xf32> to vector<8x128xf32>
    %107 = arith.negf %106 : vector<8x128xf32>
    %108 = math.exp %107 : vector<8x128xf32>
    %cst_42 = arith.constant 1.000000e+00 : f32
    %109 = vector.broadcast %cst_42 : f32 to vector<8x128xf32>
    %110 = arith.addf %109, %108 : vector<8x128xf32>
    %111 = arith.divf %109, %110 : vector<8x128xf32>
    %112 = vector.extract_strided_slice %105 {offsets = [0, 128], sizes = [8, 128], strides = [1, 1]} : vector<8x512xf32> to vector<8x128xf32>
    %113 = arith.negf %112 : vector<8x128xf32>
    %114 = math.exp %113 : vector<8x128xf32>
    %cst_43 = arith.constant 1.000000e+00 : f32
    %115 = vector.broadcast %cst_43 : f32 to vector<8x128xf32>
    %116 = arith.addf %115, %114 : vector<8x128xf32>
    %117 = arith.divf %115, %116 : vector<8x128xf32>
    %118 = vector.extract_strided_slice %105 {offsets = [0, 256], sizes = [8, 128], strides = [1, 1]} : vector<8x512xf32> to vector<8x128xf32>
    %119 = math.tanh %118 : vector<8x128xf32>
    %120 = vector.extract_strided_slice %105 {offsets = [0, 384], sizes = [8, 128], strides = [1, 1]} : vector<8x512xf32> to vector<8x128xf32>
    %121 = arith.negf %120 : vector<8x128xf32>
    %122 = math.exp %121 : vector<8x128xf32>
    %cst_44 = arith.constant 1.000000e+00 : f32
    %123 = vector.broadcast %cst_44 : f32 to vector<8x128xf32>
    %124 = arith.addf %123, %122 : vector<8x128xf32>
    %125 = arith.divf %123, %124 : vector<8x128xf32>
    %126 = arith.mulf %117, %99 : vector<8x128xf32>
    %127 = arith.mulf %111, %119 : vector<8x128xf32>
    %128 = arith.addf %126, %127 : vector<8x128xf32>
    %129 = math.tanh %128 : vector<8x128xf32>
    %130 = arith.mulf %125, %129 : vector<8x128xf32>
    %c16 = arith.constant 16 : index
    %c0_45 = arith.constant 0 : index
    %131 = vector.load %arg15[%c16, %c0_45] : memref<64x512xf32, #tpu.memory_space<vmem>>, vector<8x512xf32>
    %c0_46 = arith.constant 0 : index
    %c0_47 = arith.constant 0 : index
    %132 = vector.load %arg7[%c0_46, %c0_47] : memref<128x512xf32, #tpu.memory_space<vmem>>, vector<128x512xf32>
    %cst_48 = arith.constant dense<0.000000e+00> : vector<8x512xf32>
    %133 = tpu.matmul %130, %132, %cst_48 {dimension_numbers = #tpu.dot_dimension_numbers<[1], [0], [0], [1], [0, 0, 1, 1], [], []>} : vector<8x128xf32>, vector<128x512xf32>, vector<8x512xf32> -> vector<8x512xf32>
    %134 = arith.addf %131, %133 : vector<8x512xf32>
    %135 = vector.extract_strided_slice %134 {offsets = [0, 0], sizes = [8, 128], strides = [1, 1]} : vector<8x512xf32> to vector<8x128xf32>
    %136 = arith.negf %135 : vector<8x128xf32>
    %137 = math.exp %136 : vector<8x128xf32>
    %cst_49 = arith.constant 1.000000e+00 : f32
    %138 = vector.broadcast %cst_49 : f32 to vector<8x128xf32>
    %139 = arith.addf %138, %137 : vector<8x128xf32>
    %140 = arith.divf %138, %139 : vector<8x128xf32>
    %141 = vector.extract_strided_slice %134 {offsets = [0, 128], sizes = [8, 128], strides = [1, 1]} : vector<8x512xf32> to vector<8x128xf32>
    %142 = arith.negf %141 : vector<8x128xf32>
    %143 = math.exp %142 : vector<8x128xf32>
    %cst_50 = arith.constant 1.000000e+00 : f32
    %144 = vector.broadcast %cst_50 : f32 to vector<8x128xf32>
    %145 = arith.addf %144, %143 : vector<8x128xf32>
    %146 = arith.divf %144, %145 : vector<8x128xf32>
    %147 = vector.extract_strided_slice %134 {offsets = [0, 256], sizes = [8, 128], strides = [1, 1]} : vector<8x512xf32> to vector<8x128xf32>
    %148 = math.tanh %147 : vector<8x128xf32>
    %149 = vector.extract_strided_slice %134 {offsets = [0, 384], sizes = [8, 128], strides = [1, 1]} : vector<8x512xf32> to vector<8x128xf32>
    %150 = arith.negf %149 : vector<8x128xf32>
    %151 = math.exp %150 : vector<8x128xf32>
    %cst_51 = arith.constant 1.000000e+00 : f32
    %152 = vector.broadcast %cst_51 : f32 to vector<8x128xf32>
    %153 = arith.addf %152, %151 : vector<8x128xf32>
    %154 = arith.divf %152, %153 : vector<8x128xf32>
    %155 = arith.mulf %146, %128 : vector<8x128xf32>
    %156 = arith.mulf %140, %148 : vector<8x128xf32>
    %157 = arith.addf %155, %156 : vector<8x128xf32>
    %158 = math.tanh %157 : vector<8x128xf32>
    %159 = arith.mulf %154, %158 : vector<8x128xf32>
    %c24 = arith.constant 24 : index
    %c0_52 = arith.constant 0 : index
    %160 = vector.load %arg15[%c24, %c0_52] : memref<64x512xf32, #tpu.memory_space<vmem>>, vector<8x512xf32>
    %c0_53 = arith.constant 0 : index
    %c0_54 = arith.constant 0 : index
    %161 = vector.load %arg7[%c0_53, %c0_54] : memref<128x512xf32, #tpu.memory_space<vmem>>, vector<128x512xf32>
    %cst_55 = arith.constant dense<0.000000e+00> : vector<8x512xf32>
    %162 = tpu.matmul %159, %161, %cst_55 {dimension_numbers = #tpu.dot_dimension_numbers<[1], [0], [0], [1], [0, 0, 1, 1], [], []>} : vector<8x128xf32>, vector<128x512xf32>, vector<8x512xf32> -> vector<8x512xf32>
    %163 = arith.addf %160, %162 : vector<8x512xf32>
    %164 = vector.extract_strided_slice %163 {offsets = [0, 0], sizes = [8, 128], strides = [1, 1]} : vector<8x512xf32> to vector<8x128xf32>
    %165 = arith.negf %164 : vector<8x128xf32>
    %166 = math.exp %165 : vector<8x128xf32>
    %cst_56 = arith.constant 1.000000e+00 : f32
    %167 = vector.broadcast %cst_56 : f32 to vector<8x128xf32>
    %168 = arith.addf %167, %166 : vector<8x128xf32>
    %169 = arith.divf %167, %168 : vector<8x128xf32>
    %170 = vector.extract_strided_slice %163 {offsets = [0, 128], sizes = [8, 128], strides = [1, 1]} : vector<8x512xf32> to vector<8x128xf32>
    %171 = arith.negf %170 : vector<8x128xf32>
    %172 = math.exp %171 : vector<8x128xf32>
    %cst_57 = arith.constant 1.000000e+00 : f32
    %173 = vector.broadcast %cst_57 : f32 to vector<8x128xf32>
    %174 = arith.addf %173, %172 : vector<8x128xf32>
    %175 = arith.divf %173, %174 : vector<8x128xf32>
    %176 = vector.extract_strided_slice %163 {offsets = [0, 256], sizes = [8, 128], strides = [1, 1]} : vector<8x512xf32> to vector<8x128xf32>
    %177 = math.tanh %176 : vector<8x128xf32>
    %178 = vector.extract_strided_slice %163 {offsets = [0, 384], sizes = [8, 128], strides = [1, 1]} : vector<8x512xf32> to vector<8x128xf32>
    %179 = arith.negf %178 : vector<8x128xf32>
    %180 = math.exp %179 : vector<8x128xf32>
    %cst_58 = arith.constant 1.000000e+00 : f32
    %181 = vector.broadcast %cst_58 : f32 to vector<8x128xf32>
    %182 = arith.addf %181, %180 : vector<8x128xf32>
    %183 = arith.divf %181, %182 : vector<8x128xf32>
    %184 = arith.mulf %175, %157 : vector<8x128xf32>
    %185 = arith.mulf %169, %177 : vector<8x128xf32>
    %186 = arith.addf %184, %185 : vector<8x128xf32>
    %187 = math.tanh %186 : vector<8x128xf32>
    %188 = arith.mulf %183, %187 : vector<8x128xf32>
    %c32 = arith.constant 32 : index
    %c0_59 = arith.constant 0 : index
    %189 = vector.load %arg15[%c32, %c0_59] : memref<64x512xf32, #tpu.memory_space<vmem>>, vector<8x512xf32>
    %c0_60 = arith.constant 0 : index
    %c0_61 = arith.constant 0 : index
    %190 = vector.load %arg7[%c0_60, %c0_61] : memref<128x512xf32, #tpu.memory_space<vmem>>, vector<128x512xf32>
    %cst_62 = arith.constant dense<0.000000e+00> : vector<8x512xf32>
    %191 = tpu.matmul %188, %190, %cst_62 {dimension_numbers = #tpu.dot_dimension_numbers<[1], [0], [0], [1], [0, 0, 1, 1], [], []>} : vector<8x128xf32>, vector<128x512xf32>, vector<8x512xf32> -> vector<8x512xf32>
    %192 = arith.addf %189, %191 : vector<8x512xf32>
    %193 = vector.extract_strided_slice %192 {offsets = [0, 0], sizes = [8, 128], strides = [1, 1]} : vector<8x512xf32> to vector<8x128xf32>
    %194 = arith.negf %193 : vector<8x128xf32>
    %195 = math.exp %194 : vector<8x128xf32>
    %cst_63 = arith.constant 1.000000e+00 : f32
    %196 = vector.broadcast %cst_63 : f32 to vector<8x128xf32>
    %197 = arith.addf %196, %195 : vector<8x128xf32>
    %198 = arith.divf %196, %197 : vector<8x128xf32>
    %199 = vector.extract_strided_slice %192 {offsets = [0, 128], sizes = [8, 128], strides = [1, 1]} : vector<8x512xf32> to vector<8x128xf32>
    %200 = arith.negf %199 : vector<8x128xf32>
    %201 = math.exp %200 : vector<8x128xf32>
    %cst_64 = arith.constant 1.000000e+00 : f32
    %202 = vector.broadcast %cst_64 : f32 to vector<8x128xf32>
    %203 = arith.addf %202, %201 : vector<8x128xf32>
    %204 = arith.divf %202, %203 : vector<8x128xf32>
    %205 = vector.extract_strided_slice %192 {offsets = [0, 256], sizes = [8, 128], strides = [1, 1]} : vector<8x512xf32> to vector<8x128xf32>
    %206 = math.tanh %205 : vector<8x128xf32>
    %207 = vector.extract_strided_slice %192 {offsets = [0, 384], sizes = [8, 128], strides = [1, 1]} : vector<8x512xf32> to vector<8x128xf32>
    %208 = arith.negf %207 : vector<8x128xf32>
    %209 = math.exp %208 : vector<8x128xf32>
    %cst_65 = arith.constant 1.000000e+00 : f32
    %210 = vector.broadcast %cst_65 : f32 to vector<8x128xf32>
    %211 = arith.addf %210, %209 : vector<8x128xf32>
    %212 = arith.divf %210, %211 : vector<8x128xf32>
    %213 = arith.mulf %204, %186 : vector<8x128xf32>
    %214 = arith.mulf %198, %206 : vector<8x128xf32>
    %215 = arith.addf %213, %214 : vector<8x128xf32>
    %216 = math.tanh %215 : vector<8x128xf32>
    %217 = arith.mulf %212, %216 : vector<8x128xf32>
    %c40 = arith.constant 40 : index
    %c0_66 = arith.constant 0 : index
    %218 = vector.load %arg15[%c40, %c0_66] : memref<64x512xf32, #tpu.memory_space<vmem>>, vector<8x512xf32>
    %c0_67 = arith.constant 0 : index
    %c0_68 = arith.constant 0 : index
    %219 = vector.load %arg7[%c0_67, %c0_68] : memref<128x512xf32, #tpu.memory_space<vmem>>, vector<128x512xf32>
    %cst_69 = arith.constant dense<0.000000e+00> : vector<8x512xf32>
    %220 = tpu.matmul %217, %219, %cst_69 {dimension_numbers = #tpu.dot_dimension_numbers<[1], [0], [0], [1], [0, 0, 1, 1], [], []>} : vector<8x128xf32>, vector<128x512xf32>, vector<8x512xf32> -> vector<8x512xf32>
    %221 = arith.addf %218, %220 : vector<8x512xf32>
    %222 = vector.extract_strided_slice %221 {offsets = [0, 0], sizes = [8, 128], strides = [1, 1]} : vector<8x512xf32> to vector<8x128xf32>
    %223 = arith.negf %222 : vector<8x128xf32>
    %224 = math.exp %223 : vector<8x128xf32>
    %cst_70 = arith.constant 1.000000e+00 : f32
    %225 = vector.broadcast %cst_70 : f32 to vector<8x128xf32>
    %226 = arith.addf %225, %224 : vector<8x128xf32>
    %227 = arith.divf %225, %226 : vector<8x128xf32>
    %228 = vector.extract_strided_slice %221 {offsets = [0, 128], sizes = [8, 128], strides = [1, 1]} : vector<8x512xf32> to vector<8x128xf32>
    %229 = arith.negf %228 : vector<8x128xf32>
    %230 = math.exp %229 : vector<8x128xf32>
    %cst_71 = arith.constant 1.000000e+00 : f32
    %231 = vector.broadcast %cst_71 : f32 to vector<8x128xf32>
    %232 = arith.addf %231, %230 : vector<8x128xf32>
    %233 = arith.divf %231, %232 : vector<8x128xf32>
    %234 = vector.extract_strided_slice %221 {offsets = [0, 256], sizes = [8, 128], strides = [1, 1]} : vector<8x512xf32> to vector<8x128xf32>
    %235 = math.tanh %234 : vector<8x128xf32>
    %236 = vector.extract_strided_slice %221 {offsets = [0, 384], sizes = [8, 128], strides = [1, 1]} : vector<8x512xf32> to vector<8x128xf32>
    %237 = arith.negf %236 : vector<8x128xf32>
    %238 = math.exp %237 : vector<8x128xf32>
    %cst_72 = arith.constant 1.000000e+00 : f32
    %239 = vector.broadcast %cst_72 : f32 to vector<8x128xf32>
    %240 = arith.addf %239, %238 : vector<8x128xf32>
    %241 = arith.divf %239, %240 : vector<8x128xf32>
    %242 = arith.mulf %233, %215 : vector<8x128xf32>
    %243 = arith.mulf %227, %235 : vector<8x128xf32>
    %244 = arith.addf %242, %243 : vector<8x128xf32>
    %245 = math.tanh %244 : vector<8x128xf32>
    %246 = arith.mulf %241, %245 : vector<8x128xf32>
    %c48 = arith.constant 48 : index
    %c0_73 = arith.constant 0 : index
    %247 = vector.load %arg15[%c48, %c0_73] : memref<64x512xf32, #tpu.memory_space<vmem>>, vector<8x512xf32>
    %c0_74 = arith.constant 0 : index
    %c0_75 = arith.constant 0 : index
    %248 = vector.load %arg7[%c0_74, %c0_75] : memref<128x512xf32, #tpu.memory_space<vmem>>, vector<128x512xf32>
    %cst_76 = arith.constant dense<0.000000e+00> : vector<8x512xf32>
    %249 = tpu.matmul %246, %248, %cst_76 {dimension_numbers = #tpu.dot_dimension_numbers<[1], [0], [0], [1], [0, 0, 1, 1], [], []>} : vector<8x128xf32>, vector<128x512xf32>, vector<8x512xf32> -> vector<8x512xf32>
    %250 = arith.addf %247, %249 : vector<8x512xf32>
    %251 = vector.extract_strided_slice %250 {offsets = [0, 0], sizes = [8, 128], strides = [1, 1]} : vector<8x512xf32> to vector<8x128xf32>
    %252 = arith.negf %251 : vector<8x128xf32>
    %253 = math.exp %252 : vector<8x128xf32>
    %cst_77 = arith.constant 1.000000e+00 : f32
    %254 = vector.broadcast %cst_77 : f32 to vector<8x128xf32>
    %255 = arith.addf %254, %253 : vector<8x128xf32>
    %256 = arith.divf %254, %255 : vector<8x128xf32>
    %257 = vector.extract_strided_slice %250 {offsets = [0, 128], sizes = [8, 128], strides = [1, 1]} : vector<8x512xf32> to vector<8x128xf32>
    %258 = arith.negf %257 : vector<8x128xf32>
    %259 = math.exp %258 : vector<8x128xf32>
    %cst_78 = arith.constant 1.000000e+00 : f32
    %260 = vector.broadcast %cst_78 : f32 to vector<8x128xf32>
    %261 = arith.addf %260, %259 : vector<8x128xf32>
    %262 = arith.divf %260, %261 : vector<8x128xf32>
    %263 = vector.extract_strided_slice %250 {offsets = [0, 256], sizes = [8, 128], strides = [1, 1]} : vector<8x512xf32> to vector<8x128xf32>
    %264 = math.tanh %263 : vector<8x128xf32>
    %265 = vector.extract_strided_slice %250 {offsets = [0, 384], sizes = [8, 128], strides = [1, 1]} : vector<8x512xf32> to vector<8x128xf32>
    %266 = arith.negf %265 : vector<8x128xf32>
    %267 = math.exp %266 : vector<8x128xf32>
    %cst_79 = arith.constant 1.000000e+00 : f32
    %268 = vector.broadcast %cst_79 : f32 to vector<8x128xf32>
    %269 = arith.addf %268, %267 : vector<8x128xf32>
    %270 = arith.divf %268, %269 : vector<8x128xf32>
    %271 = arith.mulf %262, %244 : vector<8x128xf32>
    %272 = arith.mulf %256, %264 : vector<8x128xf32>
    %273 = arith.addf %271, %272 : vector<8x128xf32>
    %274 = math.tanh %273 : vector<8x128xf32>
    %275 = arith.mulf %270, %274 : vector<8x128xf32>
    %c56 = arith.constant 56 : index
    %c0_80 = arith.constant 0 : index
    %276 = vector.load %arg15[%c56, %c0_80] : memref<64x512xf32, #tpu.memory_space<vmem>>, vector<8x512xf32>
    %c0_81 = arith.constant 0 : index
    %c0_82 = arith.constant 0 : index
    %277 = vector.load %arg7[%c0_81, %c0_82] : memref<128x512xf32, #tpu.memory_space<vmem>>, vector<128x512xf32>
    %cst_83 = arith.constant dense<0.000000e+00> : vector<8x512xf32>
    %278 = tpu.matmul %275, %277, %cst_83 {dimension_numbers = #tpu.dot_dimension_numbers<[1], [0], [0], [1], [0, 0, 1, 1], [], []>} : vector<8x128xf32>, vector<128x512xf32>, vector<8x512xf32> -> vector<8x512xf32>
    %279 = arith.addf %276, %278 : vector<8x512xf32>
    %280 = vector.extract_strided_slice %279 {offsets = [0, 0], sizes = [8, 128], strides = [1, 1]} : vector<8x512xf32> to vector<8x128xf32>
    %281 = arith.negf %280 : vector<8x128xf32>
    %282 = math.exp %281 : vector<8x128xf32>
    %cst_84 = arith.constant 1.000000e+00 : f32
    %283 = vector.broadcast %cst_84 : f32 to vector<8x128xf32>
    %284 = arith.addf %283, %282 : vector<8x128xf32>
    %285 = arith.divf %283, %284 : vector<8x128xf32>
    %286 = vector.extract_strided_slice %279 {offsets = [0, 128], sizes = [8, 128], strides = [1, 1]} : vector<8x512xf32> to vector<8x128xf32>
    %287 = arith.negf %286 : vector<8x128xf32>
    %288 = math.exp %287 : vector<8x128xf32>
    %cst_85 = arith.constant 1.000000e+00 : f32
    %289 = vector.broadcast %cst_85 : f32 to vector<8x128xf32>
    %290 = arith.addf %289, %288 : vector<8x128xf32>
    %291 = arith.divf %289, %290 : vector<8x128xf32>
    %292 = vector.extract_strided_slice %279 {offsets = [0, 256], sizes = [8, 128], strides = [1, 1]} : vector<8x512xf32> to vector<8x128xf32>
    %293 = math.tanh %292 : vector<8x128xf32>
    %294 = vector.extract_strided_slice %279 {offsets = [0, 384], sizes = [8, 128], strides = [1, 1]} : vector<8x512xf32> to vector<8x128xf32>
    %295 = arith.negf %294 : vector<8x128xf32>
    %296 = math.exp %295 : vector<8x128xf32>
    %cst_86 = arith.constant 1.000000e+00 : f32
    %297 = vector.broadcast %cst_86 : f32 to vector<8x128xf32>
    %298 = arith.addf %297, %296 : vector<8x128xf32>
    %299 = arith.divf %297, %298 : vector<8x128xf32>
    %300 = arith.mulf %291, %273 : vector<8x128xf32>
    %301 = arith.mulf %285, %293 : vector<8x128xf32>
    %302 = arith.addf %300, %301 : vector<8x128xf32>
    %303 = math.tanh %302 : vector<8x128xf32>
    %304 = arith.mulf %299, %303 : vector<8x128xf32>
    %305 = arith.addf %304, %70 : vector<8x128xf32>
    %cst_87 = arith.constant 5.000000e-01 : f32
    %306 = vector.broadcast %cst_87 : f32 to vector<8x128xf32>
    %307 = arith.mulf %306, %305 : vector<8x128xf32>
    %c0_88 = arith.constant 0 : index
    %c0_89 = arith.constant 0 : index
    %308 = vector.load %arg1[%c0_88, %c0_89] : memref<8x128xf32, #tpu.memory_space<vmem>>, vector<8x128xf32>
    %309 = arith.addf %307, %308 : vector<8x128xf32>
    %c0_90 = arith.constant 0 : index
    %c0_91 = arith.constant 0 : index
    %310 = vector.load %arg11[%c0_90, %c0_91] : memref<128x128xf32, #tpu.memory_space<vmem>>, vector<128x128xf32>
    %cst_92 = arith.constant dense<0.000000e+00> : vector<8x128xf32>
    %311 = tpu.matmul %309, %310, %cst_92 {dimension_numbers = #tpu.dot_dimension_numbers<[1], [0], [0], [1], [0, 0, 1, 1], [], []>} : vector<8x128xf32>, vector<128x128xf32>, vector<8x128xf32> -> vector<8x128xf32>
    %c0_93 = arith.constant 0 : index
    %c0_94 = arith.constant 0 : index
    %312 = vector.load %arg12[%c0_93, %c0_94] : memref<1x128xf32, #tpu.memory_space<vmem>>, vector<1x128xf32>
    %313 = vector.broadcast %312 : vector<1x128xf32> to vector<8x128xf32>
    %314 = arith.addf %311, %313 : vector<8x128xf32>
    %cst_95 = arith.constant 5.000000e-01 : f32
    %315 = vector.broadcast %cst_95 : f32 to vector<8x128xf32>
    %316 = arith.mulf %315, %314 : vector<8x128xf32>
    %cst_96 = arith.constant 0.707106769 : f32
    %317 = vector.broadcast %cst_96 : f32 to vector<8x128xf32>
    %318 = arith.mulf %314, %317 : vector<8x128xf32>
    %319 = math.erf %318 : vector<8x128xf32>
    %cst_97 = arith.constant 1.000000e+00 : f32
    %320 = vector.broadcast %cst_97 : f32 to vector<8x128xf32>
    %321 = arith.addf %320, %319 : vector<8x128xf32>
    %322 = arith.mulf %316, %321 : vector<8x128xf32>
    %c0_98 = arith.constant 0 : index
    %c0_99 = arith.constant 0 : index
    %323 = vector.load %arg13[%c0_98, %c0_99] : memref<1x128xf32, #tpu.memory_space<vmem>>, vector<1x128xf32>
    %324 = vector.broadcast %323 : vector<1x128xf32> to vector<8x128xf32>
    %325 = arith.mulf %322, %324 : vector<8x128xf32>
    %cst_100 = arith.constant dense<0.000000e+00> : vector<8xf32>
    %326 = vector.multi_reduction <add>, %325, %cst_100 [1] : vector<8x128xf32> to vector<8xf32>
    %327 = vector.shape_cast %326 : vector<8xf32> to vector<8x1xf32>
    %328 = vector.shape_cast %327 : vector<8x1xf32> to vector<8x1xf32>
    %329 = vector.broadcast %328 : vector<8x1xf32> to vector<8x128xf32>
    %c0_101 = arith.constant 0 : index
    %c0_102 = arith.constant 0 : index
    %330 = vector.load %arg14[%c0_101, %c0_102] : memref<8x128xf32, #tpu.memory_space<vmem>>, vector<8x128xf32>
    tpu.vector_store %arg14[%c0_101, %c0_102], %329 {strides = array<i32>} : memref<8x128xf32, #tpu.memory_space<vmem>>, vector<8x128xf32>,
    return
  }
}

</mosaic_0001>

<bundles_post_ra>
// kernel: critic_forward.1
= control target key start
LH: loop header
LB: loop body
LE: loop exit
PB: predicated region body
PF: predicated region fallthrough
CT: control target
= control target key end

     0   :  { %vm67_vm0 = vcmask 195584   ;;  %v47_v11 = vlaneseq  ;;  %v4570_v15 = vmov 0.0   ;;  %s4555_s2 = inlined_call_operand.vmem [shape: f32[24,128], index: 2, kind: input, shape index: {}]   ;;  %s4556_s0 = inlined_call_operand.vmem [shape: f32[64,24], index: 0, kind: input, shape index: {}]   ;;  %s4557_s3 = inlined_call_operand.vmem [shape: f32[1,128], index: 3, kind: input, shape index: {}]   ;;  %s4558_s4 = inlined_call_operand.vmem [shape: f32[1,128], index: 4, kind: input, shape index: {}]   ;;  %s4559_s5 = inlined_call_operand.vmem [shape: f32[1,128], index: 5, kind: input, shape index: {}]   ;;  %s4560_s6 = inlined_call_operand.vmem [shape: f32[128,512], index: 6, kind: input, shape index: {}]   ;;  %s4561_s9 = inlined_call_operand.vmem [shape: f32[128,384], index: 9, kind: input, shape index: {}]   ;;  %s4562_s7 = inlined_call_operand.vmem [shape: f32[128,512], index: 7, kind: input, shape index: {}]   ;;  %s4563_s8 = inlined_call_operand.vmem [shape: f32[1,512], index: 8, kind: input, shape index: {}]   ;;  %s4564_s10 = inlined_call_operand.vmem [shape: f32[1,384], index: 10, kind: input, shape index: {}]   ;;  %s4565_s12 = inlined_call_operand.vmem [shape: f32[1,128], index: 12, kind: input, shape index: {}]   ;;  %s4566_s11 = inlined_call_operand.vmem [shape: f32[128,128], index: 11, kind: input, shape index: {}]   ;;  %s4567_s1 = inlined_call_operand.vmem [shape: f32[8,128], index: 1, kind: input, shape index: {}]   ;;  %s4568_s13 = inlined_call_operand.vmem [shape: f32[1,128], index: 13, kind: input, shape index: {}]   ;;  %s4569_s14 = inlined_call_operand.vmem [shape: f32[8,128], index: 14, kind: output, shape index: {}]  }
   0x1   :  { %v62_v0 = vld [vmem:[%s4555_s2 + $0x10] sm:$0xff]  ;;  %v61_v1 = vld [vmem:[%s4555_s2 + $0x8] sm:$0xff]  ;;  %v60_v2 = vld [vmem:[%s4555_s2] sm:$0xff] }
   0x2   :  { %105 = vmatpush.msra.mxu0 %v62_v0  ;;  %v52_v3 = vld [vmem:[%s4556_s0] sm:$0xff]  ;;  %v53_v4 = vld [vmem:[%s4556_s0 + $0x8] sm:$0xff]  ;;  %v54_v5 = vld [vmem:[%s4556_s0 + $0x10] sm:$0xff]  ;;  %v48_v12 = vand.u32 127, %v47_v11 }
   0x3   :  { %v55_v6 = vld [vmem:[%s4556_s0 + $0x18] sm:$0xff]  ;;  %v56_v7 = vld [vmem:[%s4556_s0 + $0x20] sm:$0xff]  ;;  %v57_v8 = vld [vmem:[%s4556_s0 + $0x28] sm:$0xff] }
   0x4   :  { %106 = vmatpush.msra.mxu0 %v61_v1  ;;  %v58_v9 = vld [vmem:[%s4556_s0 + $0x30] sm:$0xff]  ;;  %v59_v10 = vld [vmem:[%s4556_s0 + $0x38] sm:$0xff]  ;;  %v2186_v13 = vld [vmem:[%s4557_s3] ss:$0 sm:$0xff]  ;;  %vm49_vm1 = vcmp.lt.s32.totalorder %v48_v12, 72 }
   0x5   :  { %v2571_v16 = vsel %vm49_vm1, 1.0, %v4570_v15  ;;  %v412_v62 = vld [vmem:[%s4560_s6 + $0x1f8] sm:$0xff]  ;;  %v3461_v15 = vld [vmem:[%s4562_s7 + $0x8] sm:$0xff] }
   0x6   :  { %107 = vmatpush.msra.mxu0 %v60_v2  ;;  %4647 = vst [vmem:[#allocation12_spill] sm:$0xff] %v3461_v15 }
   0x7   :  { %2150 = vmatmul.msk.f32.vlgmr.msra.gmra.mxu0 %vm67_vm0, %v52_v3 }
   0x8   :  { %546 = vmatpush.msrb.mxu0 %v412_v62  ;;  %v369_v62 = vld [vmem:[%s4560_s6 + $0xa0] sm:$0xff] }
   0xf   :  { %2151 = vmatmul.msk.f32.gmra.mxu0 %vm67_vm0, %v53_v4 }
  0x17   :  { %2152 = vmatmul.msk.f32.gmra.mxu0 %vm67_vm0, %v54_v5 }
  0x1f   :  { %2153 = vmatmul.msk.f32.gmra.mxu0 %vm67_vm0, %v55_v6 }
  0x27   :  { %2154 = vmatmul.msk.f32.gmra.mxu0 %vm67_vm0, %v56_v7 }
  0x2f   :  { %2155 = vmatmul.msk.f32.gmra.mxu0 %vm67_vm0, %v57_v8 }
  0x37   :  { %2156 = vmatmul.msk.f32.gmra.mxu0 %vm67_vm0, %v58_v9 }
  0x3f   :  { %2157 = vmatmul.msk.f32.gmra.mxu0 %vm67_vm0, %v59_v10 }
  0x84   :  { %v109_v14 = vpop.f32.mrf.mxu0 }
  0x85   :  { %v110_v17 = vadd.f32 %v2186_v13, %v109_v14 }
  0x87   :  { %v133_v18 = vmul.f32 %v2571_v16, %v110_v17 }
  0x89   :  { %141 = vadd.xlane.f32.xlu0 %v133_v18 }
  0x8c   :  { %v112_v19 = vpop.f32.mrf.mxu0 }
  0x8d   :  { %v113_v20 = vadd.f32 %v2186_v13, %v112_v19  ;;  %v409_v19 = vld [vmem:[%s4560_s6 + $0x1e0] sm:$0xff] }
  0x8e   :  { %423 = vmatpush.msra.mxu1 %v409_v19  ;;  %v358_v19 = vld [vmem:[%s4560_s6 + $0x48] sm:$0xff] }
  0x8f   :  { %v134_v21 = vmul.f32 %v2571_v16, %v113_v20  ;;  %v410_v20 = vld [vmem:[%s4560_s6 + $0x1e8] sm:$0xff] }
  0x90   :  { %464 = vmatpush.msra.mxu2 %v410_v20  ;;  %v359_v20 = vld [vmem:[%s4560_s6 + $0x50] sm:$0xff] }
  0x91   :  { %143 = vadd.xlane.f32.xlu0 %v134_v21 }
  0x94   :  { %v115_v22 = vpop.f32.mrf.mxu0 }
  0x95   :  { %v116_v23 = vadd.f32 %v2186_v13, %v115_v22  ;;  %v408_v22 = vld [vmem:[%s4560_s6 + $0x1d8] sm:$0xff] }
  0x96   :  { %547 = vmatpush.msrb.mxu0 %v408_v22 }
  0x97   :  { %v135_v24 = vmul.f32 %v2571_v16, %v116_v23  ;;  %v405_v23 = vld [vmem:[%s4560_s6 + $0x1c0] sm:$0xff] }
  0x98   :  { %424 = vmatpush.msra.mxu1 %v405_v23  ;;  %v353_v23 = vld [vmem:[%s4560_s6 + $0x20] sm:$0xff] }
  0x99   :  { %145 = vadd.xlane.f32.xlu1 %v135_v24 }
  0x9c   :  { %v118_v25 = vpop.f32.mrf.mxu0 }
  0x9d   :  { %v119_v26 = vadd.f32 %v2186_v13, %v118_v25  ;;  %v407_v25 = vld [vmem:[%s4560_s6 + $0x1d0] sm:$0xff] }
  0x9f   :  { %v136_v27 = vmul.f32 %v2571_v16, %v119_v26  ;;  %v404_v26 = vld [vmem:[%s4560_s6 + $0x1b8] sm:$0xff] }
  0xa0   :  { %548 = vmatpush.msrb.mxu0 %v404_v26  ;;  %v356_v26 = vld [vmem:[%s4560_s6 + $0x38] sm:$0xff] }
  0xa1   :  { %147 = vadd.xlane.f32.xlu1 %v136_v27 }
  0xa4   :  { %v121_v28 = vpop.f32.mrf.mxu0 }
  0xa5   :  { %v122_v29 = vadd.f32 %v2186_v13, %v121_v28  ;;  %v402_v28 = vld [vmem:[%s4560_s6 + $0x1a8] sm:$0xff] }
  0xa7   :  { %v137_v30 = vmul.f32 %v2571_v16, %v122_v29  ;;  %v403_v29 = vld [vmem:[%s4560_s6 + $0x1b0] sm:$0xff] }
  0xa9   :  { %149 = vadd.xlane.f32.xlu2 %v137_v30 }
  0xac   :  { %v124_v31 = vpop.f32.mrf.mxu0 }
  0xad   :  { %v125_v32 = vadd.f32 %v2186_v13, %v124_v31  ;;  %v397_v31 = vld [vmem:[%s4560_s6 + $0x180] sm:$0xff] }
  0xaf   :  { %v138_v33 = vmul.f32 %v2571_v16, %v125_v32  ;;  %v398_v32 = vld [vmem:[%s4560_s6 + $0x188] sm:$0xff] }
  0xb1   :  { %151 = vadd.xlane.f32.xlu2 %v138_v33 }
  0xb4   :  { %v127_v34 = vpop.f32.mrf.mxu0 }
  0xb5   :  { %v128_v35 = vadd.f32 %v2186_v13, %v127_v34  ;;  %v393_v34 = vld [vmem:[%s4560_s6 + $0x160] sm:$0xff] }
  0xb7   :  { %v139_v36 = vmul.f32 %v2571_v16, %v128_v35  ;;  %v394_v35 = vld [vmem:[%s4560_s6 + $0x168] sm:$0xff] }
  0xb9   :  { %153 = vadd.xlane.f32.xlu0 %v139_v36 }
  0xbc   :  { %v130_v37 = vpop.f32.mrf.mxu0 }
  0xbd   :  { %v131_v38 = vadd.f32 %v2186_v13, %v130_v37  ;;  %v396_v37 = vld [vmem:[%s4560_s6 + $0x178] sm:$0xff] }
  0xbf   :  { %v140_v39 = vmul.f32 %v2571_v16, %v131_v38  ;;  %v389_v38 = vld [vmem:[%s4560_s6 + $0x140] sm:$0xff] }
  0xc1   :  { %155 = vadd.xlane.f32.xlu2 %v140_v39 }
  0xfc   :  { %v142_v40 = vpop.xlane.xlu0 %141 }
  0xfd   :  { %v157_v41 = vmul.f32 0.013888889, %v142_v40  ;;  %v391_v40 = vld [vmem:[%s4560_s6 + $0x150] sm:$0xff] }
  0xff   :  { %v2581_v42 = vsub.f32 %v133_v18, %v157_v41  ;;  %v392_v41 = vld [vmem:[%s4560_s6 + $0x158] sm:$0xff] }
 0x101   :  { %v173_v43 = vmul.f32 %v2571_v16, %v2581_v42 }
 0x103   :  { %v181_v44 = vmul.f32 %v173_v43, %v173_v43  ;;  %v385_v43 = vld [vmem:[%s4560_s6 + $0x120] sm:$0xff] }
 0x104   :  { %v144_v45 = vpop.xlane.xlu0 %143 }
 0x105   :  { %v158_v46 = vmul.f32 0.013888889, %v144_v45  ;;  %189 = vadd.xlane.f32.xlu1 %v181_v44  ;;  %v386_v44 = vld [vmem:[%s4560_s6 + $0x128] sm:$0xff]  ;;  %v387_v45 = vld [vmem:[%s4560_s6 + $0x130] sm:$0xff] }
 0x107   :  { %v2585_v47 = vsub.f32 %v134_v21, %v158_v46  ;;  %v411_v21 = vld [vmem:[%s4560_s6 + $0x1f0] sm:$0xff]  ;;  %v388_v46 = vld [vmem:[%s4560_s6 + $0x138] sm:$0xff] }
 0x108   :  { %505 = vmatpush.msra.mxu3 %v411_v21  ;;  %v360_v21 = vld [vmem:[%s4560_s6 + $0x58] sm:$0xff] }
 0x109   :  { %v174_v48 = vmul.f32 %v2571_v16, %v2585_v47 }
 0x10a   :  { %506 = vmatpush.msra.mxu3 %v407_v25  ;;  %v355_v25 = vld [vmem:[%s4560_s6 + $0x30] sm:$0xff] }
 0x10b   :  { %v182_v49 = vmul.f32 %v174_v48, %v174_v48  ;;  %v381_v48 = vld [vmem:[%s4560_s6 + $0x100] sm:$0xff] }
 0x10c   :  { %v146_v50 = vpop.xlane.xlu1 %145  ;;  %507 = vmatpush.msra.mxu3 %v403_v29  ;;  %v351_v29 = vld [vmem:[%s4560_s6 + $0x10] sm:$0xff] }
 0x10d   :  { %v159_v51 = vmul.f32 0.013888889, %v146_v50  ;;  %191 = vadd.xlane.f32.xlu0 %v182_v49  ;;  %v382_v49 = vld [vmem:[%s4560_s6 + $0x108] sm:$0xff]  ;;  %v383_v50 = vld [vmem:[%s4560_s6 + $0x110] sm:$0xff] }
 0x10f   :  { %v2589_v52 = vsub.f32 %v135_v24, %v159_v51  ;;  %v406_v24 = vld [vmem:[%s4560_s6 + $0x1c8] sm:$0xff]  ;;  %v384_v51 = vld [vmem:[%s4560_s6 + $0x118] sm:$0xff] }
 0x110   :  { %465 = vmatpush.msra.mxu2 %v406_v24  ;;  %v354_v24 = vld [vmem:[%s4560_s6 + $0x28] sm:$0xff] }
 0x111   :  { %v175_v53 = vmul.f32 %v2571_v16, %v2589_v52 }
 0x112   :  { %466 = vmatpush.msra.mxu2 %v402_v28  ;;  %v350_v28 = vld [vmem:[%s4560_s6 + $0x8] sm:$0xff] }
 0x113   :  { %v183_v54 = vmul.f32 %v175_v53, %v175_v53  ;;  %v377_v53 = vld [vmem:[%s4560_s6 + $0xe0] sm:$0xff] }
 0x114   :  { %v148_v55 = vpop.xlane.xlu1 %147  ;;  %467 = vmatpush.msra.mxu2 %v398_v32 }
 0x115   :  { %v160_v56 = vmul.f32 0.013888889, %v148_v55  ;;  %193 = vadd.xlane.f32.xlu1 %v183_v54  ;;  %v378_v54 = vld [vmem:[%s4560_s6 + $0xe8] sm:$0xff]  ;;  %v379_v55 = vld [vmem:[%s4560_s6 + $0xf0] sm:$0xff] }
 0x116   :  { %468 = vmatpush.msra.mxu2 %v394_v35 }
 0x117   :  { %v2593_v57 = vsub.f32 %v136_v27, %v160_v56  ;;  %v401_v27 = vld [vmem:[%s4560_s6 + $0x1a0] sm:$0xff]  ;;  %v380_v56 = vld [vmem:[%s4560_s6 + $0xf8] sm:$0xff] }
 0x118   :  { %425 = vmatpush.msra.mxu1 %v401_v27  ;;  %v349_v27 = vld [vmem:[%s4560_s6] sm:$0xff] }
 0x119   :  { %v176_v58 = vmul.f32 %v2571_v16, %v2593_v57 }
 0x11a   :  { %426 = vmatpush.msra.mxu1 %v397_v31 }
 0x11b   :  { %v184_v59 = vmul.f32 %v176_v58, %v176_v58  ;;  %v373_v58 = vld [vmem:[%s4560_s6 + $0xc0] sm:$0xff] }
 0x11c   :  { %v150_v60 = vpop.xlane.xlu2 %149  ;;  %427 = vmatpush.msra.mxu1 %v393_v34 }
 0x11d   :  { %v161_v61 = vmul.f32 0.013888889, %v150_v60  ;;  %195 = vadd.xlane.f32.xlu2 %v184_v59  ;;  %v374_v59 = vld [vmem:[%s4560_s6 + $0xc8] sm:$0xff]  ;;  %v375_v60 = vld [vmem:[%s4560_s6 + $0xd0] sm:$0xff] }
 0x11e   :  { %428 = vmatpush.msra.mxu1 %v389_v38 }
 0x11f   :  { %v2600_v63 = vsub.f32 %v137_v30, %v161_v61  ;;  %v400_v30 = vld [vmem:[%s4560_s6 + $0x198] sm:$0xff] }
 0x120   :  { %549 = vmatpush.msrb.mxu0 %v400_v30  ;;  %429 = vmatpush.msra.mxu1 %v385_v43  ;;  %v376_v61 = vld [vmem:[%s4560_s6 + $0xd8] sm:$0xff] }
 0x121   :  { %v177_v0 = vmul.f32 %v2571_v16, %v2600_v63  ;;  %v352_v30 = vld [vmem:[%s4560_s6 + $0x18] sm:$0xff] }
 0x122   :  { %550 = vmatpush.msrb.mxu0 %v396_v37  ;;  %430 = vmatpush.msra.mxu1 %v381_v48  ;;  %v663_v48 = vld [vmem:[%s4561_s9 + $0x160] sm:$0xff] }
 0x123   :  { %v185_v1 = vmul.f32 %v177_v0, %v177_v0  ;;  %v370_v0 = vld [vmem:[%s4560_s6 + $0xa8] sm:$0xff] }
 0x124   :  { %v152_v2 = vpop.xlane.xlu2 %151  ;;  %551 = vmatpush.msrb.mxu0 %v392_v41  ;;  %431 = vmatpush.msra.mxu1 %v377_v53  ;;  %v666_v41 = vld [vmem:[%s4561_s9 + $0x178] sm:$0xff] }
 0x125   :  { %v162_v3 = vmul.f32 0.013888889, %v152_v2  ;;  %197 = vadd.xlane.f32.xlu0 %v185_v1  ;;  %v371_v1 = vld [vmem:[%s4560_s6 + $0xb0] sm:$0xff]  ;;  %v372_v2 = vld [vmem:[%s4560_s6 + $0xb8] sm:$0xff] }
 0x126   :  { %552 = vmatpush.msrb.mxu0 %v388_v46  ;;  %432 = vmatpush.msra.mxu1 %v373_v58  ;;  %v661_v46 = vld [vmem:[%s4561_s9 + $0x150] sm:$0xff]  ;;  %v2844_v58 = vld [vmem:[%s4558_s4] ss:$0 sm:$0xff] }
 0x127   :  { %v2604_v4 = vsub.f32 %v138_v33, %v162_v3  ;;  %v399_v33 = vld [vmem:[%s4560_s6 + $0x190] sm:$0xff]  ;;  %v365_v3 = vld [vmem:[%s4560_s6 + $0x80] sm:$0xff] }
 0x128   :  { %508 = vmatpush.msra.mxu3 %v399_v33  ;;  %553 = vmatpush.msrb.mxu0 %v384_v51 }
 0x129   :  { %v178_v5 = vmul.f32 %v2571_v16, %v2604_v4  ;;  %433 = vmatpush.msra.mxu1 %v369_v62  ;;  %v655_v62 = vld [vmem:[%s4561_s9 + $0x120] sm:$0xff] }
 0x12a   :  { %554 = vmatpush.msrb.mxu0 %v380_v56  ;;  %v660_v56 = vld [vmem:[%s4561_s9 + $0x148] sm:$0xff] }
 0x12b   :  { %v186_v6 = vmul.f32 %v178_v5, %v178_v5  ;;  %v366_v5 = vld [vmem:[%s4560_s6 + $0x88] sm:$0xff]  ;;  %434 = vmatpush.msra.mxu1 %v365_v3 }
 0x12c   :  { %v154_v7 = vpop.xlane.xlu0 %153  ;;  %555 = vmatpush.msrb.mxu0 %v376_v61  ;;  %v656_v61 = vld [vmem:[%s4561_s9 + $0x128] sm:$0xff] }
 0x12d   :  { %v163_v8 = vmul.f32 0.013888889, %v154_v7  ;;  %199 = vadd.xlane.f32.xlu1 %v186_v6  ;;  %v367_v6 = vld [vmem:[%s4560_s6 + $0x90] sm:$0xff]  ;;  %v368_v7 = vld [vmem:[%s4560_s6 + $0x98] sm:$0xff] }
 0x12e   :  { %556 = vmatpush.msrb.mxu0 %v372_v2 }
 0x12f   :  { %v2608_v9 = vsub.f32 %v139_v36, %v163_v8  ;;  %v395_v36 = vld [vmem:[%s4560_s6 + $0x170] sm:$0xff]  ;;  %v361_v8 = vld [vmem:[%s4560_s6 + $0x60] sm:$0xff] }
 0x130   :  { %509 = vmatpush.msra.mxu3 %v395_v36  ;;  %557 = vmatpush.msrb.mxu0 %v368_v7  ;;  %v652_v7 = vld [vmem:[%s4561_s9 + $0x108] sm:$0xff] }
 0x131   :  { %v179_v10 = vmul.f32 %v2571_v16, %v2608_v9  ;;  %435 = vmatpush.msra.mxu1 %v361_v8  ;;  %v654_v8 = vld [vmem:[%s4561_s9 + $0x118] sm:$0xff] }
 0x132   :  { %510 = vmatpush.msra.mxu3 %v391_v40  ;;  %v664_v40 = vld [vmem:[%s4561_s9 + $0x168] sm:$0xff] }
 0x133   :  { %v187_v11 = vmul.f32 %v179_v10, %v179_v10  ;;  %v362_v10 = vld [vmem:[%s4560_s6 + $0x68] sm:$0xff] }
 0x134   :  { %v156_v12 = vpop.xlane.xlu2 %155  ;;  %511 = vmatpush.msra.mxu3 %v387_v45  ;;  %v662_v45 = vld [vmem:[%s4561_s9 + $0x158] sm:$0xff] }
 0x135   :  { %v164_v13 = vmul.f32 0.013888889, %v156_v12  ;;  %201 = vadd.xlane.f32.xlu2 %v187_v11  ;;  %v363_v11 = vld [vmem:[%s4560_s6 + $0x70] sm:$0xff] }
 0x136   :  { %512 = vmatpush.msra.mxu3 %v383_v50 }
 0x137   :  { %v2612_v14 = vsub.f32 %v140_v39, %v164_v13  ;;  %v390_v39 = vld [vmem:[%s4560_s6 + $0x148] sm:$0xff]  ;;  %v364_v13 = vld [vmem:[%s4560_s6 + $0x78] sm:$0xff] }
 0x138   :  { %469 = vmatpush.msra.mxu2 %v390_v39  ;;  %513 = vmatpush.msra.mxu3 %v379_v55  ;;  %v665_v39 = vld [vmem:[%s4561_s9 + $0x170] sm:$0xff]  ;;  %v658_v55 = vld [vmem:[%s4561_s9 + $0x138] sm:$0xff] }
 0x139   :  { %v180_v17 = vmul.f32 %v2571_v16, %v2612_v14  ;;  %558 = vmatpush.msrb.mxu0 %v364_v13  ;;  %v650_v13 = vld [vmem:[%s4561_s9 + $0xf8] sm:$0xff] }
 0x13a   :  { %470 = vmatpush.msra.mxu2 %v386_v44  ;;  %514 = vmatpush.msra.mxu3 %v375_v60 }
 0x13b   :  { %v188_v18 = vmul.f32 %v180_v17, %v180_v17  ;;  %559 = vmatpush.msrb.mxu0 %v360_v21 }
 0x13c   :  { %471 = vmatpush.msra.mxu2 %v382_v49  ;;  %515 = vmatpush.msra.mxu3 %v371_v1  ;;  %v2861_v1 = vld [vmem:[%s4559_s5] ss:$0 sm:$0xff] }
 0x13d   :  { %203 = vadd.xlane.f32.xlu0 %v188_v18  ;;  %v357_v18 = vld [vmem:[%s4560_s6 + $0x40] sm:$0xff]  ;;  %560 = vmatpush.msrb.mxu0 %v356_v26 }
 0x13e   :  { %472 = vmatpush.msra.mxu2 %v378_v54  ;;  %516 = vmatpush.msra.mxu3 %v367_v6  ;;  %v659_v54 = vld [vmem:[%s4561_s9 + $0x140] sm:$0xff]  ;;  %v653_v6 = vld [vmem:[%s4561_s9 + $0x110] sm:$0xff] }
 0x13f   :  { %436 = vmatpush.msra.mxu1 %v357_v18  ;;  %561 = vmatpush.msrb.mxu0 %v352_v30  ;;  %v644_v30 = vld [vmem:[%s4561_s9 + $0xc8] sm:$0xff] }
 0x140   :  { %473 = vmatpush.msra.mxu2 %v374_v59  ;;  %517 = vmatpush.msra.mxu3 %v363_v11 }
 0x141   :  { %437 = vmatpush.msra.mxu1 %v353_v23  ;;  %v646_v23 = vld [vmem:[%s4561_s9 + $0xd8] sm:$0xff] }
 0x142   :  { %474 = vmatpush.msra.mxu2 %v370_v0  ;;  %518 = vmatpush.msra.mxu3 %v359_v20  ;;  %v657_v0 = vld [vmem:[%s4561_s9 + $0x130] sm:$0xff] }
 0x143   :  { %438 = vmatpush.msra.mxu1 %v349_v27 }
 0x144   :  { %475 = vmatpush.msra.mxu2 %v366_v5  ;;  %519 = vmatpush.msra.mxu3 %v355_v25  ;;  %v648_v25 = vld [vmem:[%s4561_s9 + $0xe8] sm:$0xff] }
 0x145   :  { %675 = vmatpush.msrb.mxu1 %v664_v40 }
 0x146   :  { %476 = vmatpush.msra.mxu2 %v362_v10  ;;  %520 = vmatpush.msra.mxu3 %v351_v29  ;;  %v643_v29 = vld [vmem:[%s4561_s9 + $0xc0] sm:$0xff] }
 0x147   :  { %676 = vmatpush.msrb.mxu1 %v661_v46 }
 0x148   :  { %477 = vmatpush.msra.mxu2 %v358_v19  ;;  %715 = vmatpush.msrb.mxu3 %v666_v41 }
 0x149   :  { %677 = vmatpush.msrb.mxu1 %v658_v55  ;;  %v636_v55 = vld [vmem:[%s4561_s9 + $0x88] sm:$0xff] }
 0x14a   :  { %478 = vmatpush.msra.mxu2 %v354_v24  ;;  %716 = vmatpush.msrb.mxu3 %v663_v48  ;;  %v647_v24 = vld [vmem:[%s4561_s9 + $0xe0] sm:$0xff] }
 0x14b   :  { %678 = vmatpush.msrb.mxu1 %v655_v62 }
 0x14c   :  { %479 = vmatpush.msra.mxu2 %v350_v28  ;;  %717 = vmatpush.msrb.mxu3 %v660_v56 }
 0x14d   :  { %679 = vmatpush.msrb.mxu1 %v652_v7  ;;  %v629_v7 = vld [vmem:[%s4561_s9 + $0x50] sm:$0xff] }
 0x14e   :  { %695 = vmatpush.msrb.mxu2 %v665_v39  ;;  %718 = vmatpush.msrb.mxu3 %v657_v0  ;;  %v2971_v0 = vld [vmem:[%s4562_s7 + $0x1f8] sm:$0xff] }
 0x14f   :  { %905 = vmatpush.msra.mxu0 %v2971_v0 }
 0x150   :  { %696 = vmatpush.msrb.mxu2 %v662_v45  ;;  %719 = vmatpush.msrb.mxu3 %v654_v8  ;;  %v639_v45 = vld [vmem:[%s4561_s9 + $0xa0] sm:$0xff]  ;;  %v2987_v8 = vld [vmem:[%s4562_s7 + $0x1d8] sm:$0xff] }
 0x151   :  { %906 = vmatpush.msra.mxu0 %v2987_v8 }
 0x152   :  { %697 = vmatpush.msrb.mxu2 %v659_v54 }
 0x154   :  { %698 = vmatpush.msrb.mxu2 %v656_v61  ;;  %v632_v61 = vld [vmem:[%s4561_s9 + $0x68] sm:$0xff] }
 0x156   :  { %699 = vmatpush.msrb.mxu2 %v653_v6  ;;  %v628_v6 = vld [vmem:[%s4561_s9 + $0x48] sm:$0xff] }
 0x158   :  { %700 = vmatpush.msrb.mxu2 %v650_v13 }
 0x15a   :  { %701 = vmatpush.msrb.mxu2 %v647_v24  ;;  %v626_v24 = vld [vmem:[%s4561_s9 + $0x38] sm:$0xff] }
 0x15c   :  { %702 = vmatpush.msrb.mxu2 %v644_v30 }
 0x178   :  { %v190_v12 = vpop.xlane.xlu1 %189 }
 0x179   :  { %v205_v17 = vmul.f32 0.013888889, %v190_v12  ;;  %v649_v12 = vld [vmem:[%s4561_s9 + $0xf0] sm:$0xff] }
 0x17a   :  { %680 = vmatpush.msrb.mxu1 %v649_v12 }
 0x17b   :  { %v213_v22 = vadd.f32 1e-05, %v205_v17  ;;  %v651_v17 = vld [vmem:[%s4561_s9 + $0x100] sm:$0xff] }
 0x17c   :  { %720 = vmatpush.msrb.mxu3 %v651_v17  ;;  %681 = vmatpush.msrb.mxu1 %v646_v23  ;;  %v625_v23 = vld [vmem:[%s4561_s9 + $0x30] sm:$0xff] }
 0x17d   :  { %2191 = vrsqrt.f32 %v213_v22  ;;  %vm227_vm3 = vweird.f32 %v213_v22 }
 0x17e   :  { %721 = vmatpush.msrb.mxu3 %v648_v25  ;;  %682 = vmatpush.msrb.mxu1 %v643_v29  ;;  %v3025_v25 = vld [vmem:[%s4562_s7 + $0x198] sm:$0xff]  ;;  %v623_v29 = vld [vmem:[%s4561_s9 + $0x20] sm:$0xff] }
 0x180   :  { %v192_v31 = vpop.xlane.xlu0 %191 }
 0x181   :  { %v206_v32 = vmul.f32 0.013888889, %v192_v31  ;;  %v645_v31 = vld [vmem:[%s4561_s9 + $0xd0] sm:$0xff] }
 0x182   :  { %722 = vmatpush.msrb.mxu3 %v645_v31 }
 0x183   :  { %v2192_v33 = vpop.eup %2191  ;;  %v2805_v34 = vadd.f32 1e-05, %v206_v32 }
 0x184   :  { %v222_v35 = vmul.f32 %v2192_v33, %v213_v22  ;;  %vm228_vm2 = vweird.f32 %v2192_v33 }
 0x185   :  { %2193 = vrsqrt.f32 %v2805_v34  ;;  %vm229_vm4 = vmor %vm227_vm3, %vm228_vm2  ;;  %vm237_vm6 = vweird.f32 %v2805_v34 }
 0x186   :  { %v223_v36 = vmul.f32 %v2192_v33, %v222_v35 }
 0x188   :  { %v224_v37 = vmul.f32 0.5, %v223_v36  ;;  %v194_v38 = vpop.xlane.xlu1 %193  ;;  %v641_v36 = vld [vmem:[%s4561_s9 + $0xb0] sm:$0xff] }
 0x189   :  { %v207_v43 = vmul.f32 0.013888889, %v194_v38  ;;  %703 = vmatpush.msrb.mxu2 %v641_v36 }
 0x18a   :  { %v225_v44 = vsub.f32 1.5, %v224_v37  ;;  %v642_v37 = vld [vmem:[%s4561_s9 + $0xb8] sm:$0xff] }
 0x18b   :  { %v2826_v49 = vpop.eup %2193  ;;  %v2828_v50 = vadd.f32 1e-05, %v207_v43  ;;  %723 = vmatpush.msrb.mxu3 %v642_v37  ;;  %v637_v43 = vld [vmem:[%s4561_s9 + $0x90] sm:$0xff] }
 0x18c   :  { %v226_v51 = vmul.f32 %v2192_v33, %v225_v44  ;;  %v232_v53 = vmul.f32 %v2826_v49, %v2805_v34  ;;  %vm238_vm5 = vweird.f32 %v2826_v49  ;;  %v638_v44 = vld [vmem:[%s4561_s9 + $0x98] sm:$0xff]  ;;  %v621_v37 = vld [vmem:[%s4561_s9 + $0x10] sm:$0xff] }
 0x18d   :  { %2195 = vrsqrt.f32 %v2828_v50  ;;  %vm239_vm7 = vmor %vm237_vm6, %vm238_vm5  ;;  %vm247_vm9 = vweird.f32 %v2828_v50  ;;  %704 = vmatpush.msrb.mxu2 %v638_v44  ;;  %724 = vmatpush.msrb.mxu3 %v639_v45 }
 0x18e   :  { %v230_v59 = vsel %vm229_vm4, %v2192_v33, %v226_v51  ;;  %v233_v60 = vmul.f32 %v2826_v49, %v232_v53  ;;  %v634_v53 = vld [vmem:[%s4561_s9 + $0x78] sm:$0xff] }
 0x18f   :  { %v301_v2 = vmul.f32 %v230_v59, %v2581_v42  ;;  %725 = vmatpush.msrb.mxu3 %v636_v55 }
 0x190   :  { %v234_v3 = vmul.f32 0.5, %v233_v60  ;;  %v196_v5 = vpop.xlane.xlu2 %195  ;;  %v631_v60 = vld [vmem:[%s4561_s9 + $0x60] sm:$0xff] }
 0x191   :  { %v313_v10 = vmul.f32 %v2844_v58, %v301_v2  ;;  %v208_v42 = vmul.f32 0.013888889, %v196_v5 }
 0x192   :  { %v235_v11 = vsub.f32 1.5, %v234_v3 }
 0x193   :  { %v2884_v18 = vpop.eup %2195  ;;  %v325_v19 = vadd.f32 %v2861_v1, %v313_v10  ;;  %v2887_v20 = vadd.f32 1e-05, %v208_v42  ;;  %v630_v10 = vld [vmem:[%s4561_s9 + $0x58] sm:$0xff] }
 0x194   :  { %v236_v21 = vmul.f32 %v2826_v49, %v235_v11  ;;  %v242_v22 = vmul.f32 %v2884_v18, %v2828_v50  ;;  %vm248_vm8 = vweird.f32 %v2884_v18  ;;  %v635_v50 = vld [vmem:[%s4561_s9 + $0x80] sm:$0xff] }
 0x195   :  { %2197 = vtanh.f32 %v325_v19  ;;  %vm249_vm10 = vmor %vm247_vm9, %vm248_vm8  ;;  %705 = vmatpush.msrb.mxu2 %v635_v50  ;;  %v3003_v19 = vld [vmem:[%s4562_s7 + $0x1b8] sm:$0xff]  ;;  %vm257_vm12 = vweird.f32 %v2887_v20 }
 0x196   :  { %v240_v26 = vsel %vm239_vm7, %v2826_v49, %v236_v21  ;;  %v243_v27 = vmul.f32 %v2884_v18, %v242_v22  ;;  %2199 = vrsqrt.f32 %v2887_v20  ;;  %907 = vmatpush.msra.mxu0 %v3003_v19  ;;  %v3094_v50 = vld [vmem:[%s4562_s7 + $0x158] sm:$0xff] }
 0x197   :  { %v302_v28 = vmul.f32 %v240_v26, %v2585_v47  ;;  %v640_v47 = vld [vmem:[%s4561_s9 + $0xa8] sm:$0xff]  ;;  %706 = vmatpush.msrb.mxu2 %v632_v61 }
 0x198   :  { %v244_v32 = vmul.f32 0.5, %v243_v27  ;;  %v198_v33 = vpop.xlane.xlu0 %197  ;;  %683 = vmatpush.msrb.mxu1 %v640_v47  ;;  %908 = vmatpush.msra.mxu0 %v3025_v25  ;;  %v3049_v47 = vld [vmem:[%s4562_s7 + $0x178] sm:$0xff] }
 0x199   :  { %v314_v34 = vmul.f32 %v2844_v58, %v302_v28  ;;  %v209_v35 = vmul.f32 0.013888889, %v198_v33  ;;  %707 = vmatpush.msrb.mxu2 %v629_v7  ;;  %v622_v28 = vld [vmem:[%s4561_s9 + $0x18] sm:$0xff]  ;;  %v3139_v7 = vld [vmem:[%s4562_s7 + $0x180] sm:$0xff] }
 0x19a   :  { %v245_v38 = vsub.f32 1.5, %v244_v32  ;;  %684 = vmatpush.msrb.mxu1 %v637_v43  ;;  %v624_v32 = vld [vmem:[%s4561_s9 + $0x28] sm:$0xff]  ;;  %909 = vmatpush.msra.mxu0 %v3049_v47 }
 0x19b   :  { %v2198_v39 = vpop.eup %2197  ;;  %v326_v40 = vadd.f32 %v2861_v1, %v314_v34  ;;  %v2929_v41 = vadd.f32 1e-05, %v209_v35  ;;  %708 = vmatpush.msrb.mxu2 %v626_v24  ;;  %v619_v35 = vld [vmem:[%s4561_s9] sm:$0xff] }
 0x19c   :  { %v2940_v46 = vpop.eup %2199  ;;  %v246_v48 = vmul.f32 %v2884_v18, %v245_v38  ;;  %v341_v49 = vmul.f32 %v2198_v39, %v2571_v16  ;;  %685 = vmatpush.msrb.mxu1 %v634_v53  ;;  %v3058_v38 = vld [vmem:[%s4562_s7 + $0x1e0] sm:$0xff]  ;;  %v3082_v53 = vld [vmem:[%s4562_s7 + $0x1f0] sm:$0xff]  ;;  %910 = vmatpush.msra.mxu0 %v3094_v50 }
 0x19d   :  { %2201 = vtanh.f32 %v326_v40  ;;  %v252_v51 = vmul.f32 %v2940_v46, %v2887_v20  ;;  %vm258_vm11 = vweird.f32 %v2940_v46  ;;  %v627_v20 = vld [vmem:[%s4561_s9 + $0x40] sm:$0xff]  ;;  %709 = vmatpush.msrb.mxu2 %v623_v29  ;;  %vm267_vm15 = vweird.f32 %v2929_v41  ;;  %v3193_v29 = vld [vmem:[%s4562_s7 + $0x170] sm:$0xff] }
 0x19e   :  { %v250_v54 = vsel %vm249_vm10, %v2884_v18, %v246_v48  ;;  %2203 = vrsqrt.f32 %v2929_v41  ;;  %439 = vmatmul.f32.vlgmr.msra.gmra.mxu1 %v341_v49  ;;  %480 = vmatmul.f32.vlgmr.msra.gmra.mxu2 %v341_v49  ;;  %vm259_vm13 = vmor %vm257_vm12, %vm258_vm11 }
 0x19f   :  { %v303_v56 = vmul.f32 %v250_v54, %v2589_v52  ;;  %v253_v59 = vmul.f32 %v2940_v46, %v252_v51  ;;  %521 = vmatmul.f32.vlgmr.msra.gmra.mxu3 %v341_v49  ;;  %562 = vmatmul.f32.vlgmr.msrb.gmra.mxu0 %v341_v49  ;;  %v633_v52 = vld [vmem:[%s4561_s9 + $0x70] sm:$0xff]  ;;  %v3077_v51 = vld [vmem:[%s4562_s7 + $0x1e8] sm:$0xff] }
 0x1a0   :  { %v200_v62 = vpop.xlane.xlu1 %199  ;;  %686 = vmatpush.msrb.mxu1 %v631_v60  ;;  %726 = vmatpush.msrb.mxu3 %v633_v52  ;;  %v3119_v52 = vld [vmem:[%s4562_s7 + $0x138] sm:$0xff] }
 0x1a1   :  { %v315_v2 = vmul.f32 %v2844_v58, %v303_v56  ;;  %v254_v3 = vmul.f32 0.5, %v253_v59  ;;  %v210_v5 = vmul.f32 0.013888889, %v200_v62  ;;  %v3101_v56 = vld [vmem:[%s4562_s7 + $0x1c8] sm:$0xff]  ;;  %v3106_v59 = vld [vmem:[%s4562_s7 + $0x1d0] sm:$0xff]  ;;  %v3114_v62 = vld [vmem:[%s4562_s7 + $0x1a0] sm:$0xff]  ;;  %911 = vmatpush.msra.mxu0 %v3119_v52 }
 0x1a2   :  { %687 = vmatpush.msrb.mxu1 %v628_v6  ;;  %727 = vmatpush.msrb.mxu3 %v630_v10  ;;  %v3144_v10 = vld [vmem:[%s4562_s7 + $0x118] sm:$0xff] }
 0x1a3   :  { %v2202_v42 = vpop.eup %2201  ;;  %v327_v11 = vadd.f32 %v2861_v1, %v315_v2  ;;  %v255_v12 = vsub.f32 1.5, %v254_v3  ;;  %v2994_v13 = vadd.f32 1e-05, %v210_v5  ;;  %v3131_v5 = vld [vmem:[%s4562_s7 + $0x1b0] sm:$0xff]  ;;  %912 = vmatpush.msra.mxu0 %v3144_v10 }
 0x1a4   :  { %v2997_v17 = vpop.eup %2203  ;;  %v342_v18 = vmul.f32 %v2202_v42, %v2571_v16  ;;  %688 = vmatpush.msrb.mxu1 %v625_v23  ;;  %728 = vmatpush.msrb.mxu3 %v627_v20 }
 0x1a5   :  { %2205 = vtanh.f32 %v327_v11  ;;  %v256_v21 = vmul.f32 %v2940_v46, %v255_v12  ;;  %v262_v22 = vmul.f32 %v2997_v17, %v2929_v41  ;;  %vm268_vm14 = vweird.f32 %v2997_v17  ;;  %v3089_v41 = vld [vmem:[%s4562_s7 + $0x1c0] sm:$0xff] }
 0x1a6   :  { %2207 = vrsqrt.f32 %v2994_v13  ;;  %442 = vmatmul.f32.gmra.mxu1 %v342_v18  ;;  %483 = vmatmul.f32.gmra.mxu2 %v342_v18  ;;  %vm269_vm0 = vmor %vm267_vm15, %vm268_vm14  ;;  %vm277_vm2 = vweird.f32 %v2994_v13 }
 0x1a7   :  { %v260_v26 = vsel %vm259_vm13, %v2940_v46, %v256_v21  ;;  %v263_v27 = vmul.f32 %v2997_v17, %v262_v22  ;;  %524 = vmatmul.f32.gmra.mxu3 %v342_v18  ;;  %565 = vmatmul.f32.gmra.mxu0 %v342_v18  ;;  %v3161_v18 = vld [vmem:[%s4562_s7 + $0x190] sm:$0xff] }
 0x1a8   :  { %v304_v30 = vmul.f32 %v260_v26, %v2593_v57  ;;  %v202_v31 = vpop.xlane.xlu2 %201  ;;  %v620_v57 = vld [vmem:[%s4561_s9 + $0x8] sm:$0xff]  ;;  %689 = vmatpush.msrb.mxu1 %v622_v28  ;;  %729 = vmatpush.msrb.mxu3 %v624_v32 }
 0x1a9   :  { %v264_v33 = vmul.f32 0.5, %v263_v27  ;;  %v211_v34 = vmul.f32 0.013888889, %v202_v31  ;;  %710 = vmatpush.msrb.mxu2 %v620_v57  ;;  %v3187_v27 = vld [vmem:[%s4562_s7 + $0x168] sm:$0xff] }
 0x1aa   :  { %v316_v36 = vmul.f32 %v2844_v58, %v304_v30  ;;  %690 = vmatpush.msrb.mxu1 %v619_v35  ;;  %730 = vmatpush.msrb.mxu3 %v621_v37  ;;  %v3198_v30 = vld [vmem:[%s4562_s7 + $0xf8] sm:$0xff]  ;;  %v3230_v37 = vld [vmem:[%s4562_s7 + $0x120] sm:$0xff] }
 0x1ab   :  { %v2206_v39 = vpop.eup %2205  ;;  %v265_v40 = vsub.f32 1.5, %v264_v33  ;;  %v3061_v43 = vadd.f32 1e-05, %v211_v34  ;;  %865 = vmatpush.msra.mxu2 %v3077_v51  ;;  %v3204_v33 = vld [vmem:[%s4562_s7 + $0x140] sm:$0xff]  ;;  %v3209_v34 = vld [vmem:[%s4562_s7 + $0x148] sm:$0xff]  ;;  %v3221_v35 = vld [vmem:[%s4562_s7 + $0xd8] sm:$0xff]  ;;  %913 = vmatpush.msra.mxu0 %v3198_v30 }
 0x1ac   :  { %v3064_v44 = vpop.eup %2207  ;;  %v328_v45 = vadd.f32 %v2861_v1, %v316_v36  ;;  %v343_v46 = vmul.f32 %v2206_v39, %v2571_v16  ;;  %845 = vmatpush.msra.mxu1 %v3058_v38  ;;  %885 = vmatpush.msra.mxu3 %v3082_v53  ;;  %v3235_v39 = vld [vmem:[%s4562_s7 + $0x128] sm:$0xff] }
 0x1ad   :  { %v266_v48 = vmul.f32 %v2997_v17, %v265_v40  ;;  %v272_v49 = vmul.f32 %v3064_v44, %v2994_v13  ;;  %2209 = vrsqrt.f32 %v3061_v43  ;;  %866 = vmatpush.msra.mxu2 %v3101_v56  ;;  %vm278_vm1 = vweird.f32 %v3064_v44  ;;  %v3182_v13 = vld [vmem:[%s4562_s7 + $0x160] sm:$0xff]  ;;  %914 = vmatpush.msra.mxu0 %v3221_v35 }
 0x1ae   :  { %2211 = vtanh.f32 %v328_v45  ;;  %445 = vmatmul.f32.gmra.mxu1 %v343_v46  ;;  %486 = vmatmul.f32.gmra.mxu2 %v343_v46  ;;  %vm279_vm3 = vmor %vm277_vm2, %vm278_vm1  ;;  %v3249_v45 = vld [vmem:[%s4562_s7 + $0xb8] sm:$0xff]  ;;  %vm287_vm5 = vweird.f32 %v3061_v43 }
 0x1af   :  { %v270_v54 = vsel %vm269_vm0, %v2997_v17, %v266_v48  ;;  %v273_v55 = vmul.f32 %v3064_v44, %v272_v49  ;;  %527 = vmatmul.f32.gmra.mxu3 %v343_v46  ;;  %568 = vmatmul.f32.gmra.mxu0 %v343_v46  ;;  %v3156_v17 = vld [vmem:[%s4562_s7 + $0x188] sm:$0xff] }
 0x1b0   :  { %v305_v60 = vmul.f32 %v270_v54, %v2600_v63  ;;  %v204_v61 = vpop.xlane.xlu0 %203  ;;  %846 = vmatpush.msra.mxu1 %v3089_v41  ;;  %v3126_v63 = vld [vmem:[%s4562_s7 + $0x1a8] sm:$0xff]  ;;  %886 = vmatpush.msra.mxu3 %v3106_v59 }
 0x1b1   :  { %v274_v2 = vmul.f32 0.5, %v273_v55  ;;  %v212_v3 = vmul.f32 0.013888889, %v204_v61  ;;  %867 = vmatpush.msra.mxu2 %v3126_v63  ;;  %915 = vmatpush.msra.mxu0 %v3249_v45  ;;  %v3270_v61 = vld [vmem:[%s4562_s7 + $0x100] sm:$0xff] }
 0x1b2   :  { %v317_v6 = vmul.f32 %v2844_v58, %v305_v60  ;;  %847 = vmatpush.msra.mxu1 %v3114_v62  ;;  %887 = vmatpush.msra.mxu3 %v3131_v5 }
 0x1b3   :  { %v3146_v42 = vpop.eup %2209  ;;  %v275_v11 = vsub.f32 1.5, %v274_v2  ;;  %v3149_v12 = vadd.f32 1e-05, %v212_v3  ;;  %868 = vmatpush.msra.mxu2 %v3156_v17  ;;  %v3275_v2 = vld [vmem:[%s4562_s7 + $0x108] sm:$0xff] }
 0x1b4   :  { %v2212_v21 = vpop.eup %2211  ;;  %v329_v22 = vadd.f32 %v2861_v1, %v317_v6  ;;  %v282_v23 = vmul.f32 %v3146_v42, %v3061_v43  ;;  %848 = vmatpush.msra.mxu1 %v3139_v7  ;;  %888 = vmatpush.msra.mxu3 %v3161_v18  ;;  %vm288_vm4 = vweird.f32 %v3146_v42  ;;  %v3281_v6 = vld [vmem:[%s4562_s7 + $0x110] sm:$0xff] }
 0x1b5   :  { %v276_v24 = vmul.f32 %v3064_v44, %v275_v11  ;;  %2213 = vrsqrt.f32 %v3149_v12  ;;  %v344_v20 = vmul.f32 %v2212_v21, %v2571_v16  ;;  %869 = vmatpush.msra.mxu2 %v3187_v27  ;;  %vm289_vm6 = vmor %vm287_vm5, %vm288_vm4  ;;  %v3291_v21 = vld [vmem:[%s4562_s7 + $0xe0] sm:$0xff]  ;;  %vm297_vm8 = vweird.f32 %v3149_v12 }
 0x1b6   :  { %2215 = vtanh.f32 %v329_v22  ;;  %v283_v26 = vmul.f32 %v3146_v42, %v282_v23  ;;  %849 = vmatpush.msra.mxu1 %v3182_v13  ;;  %889 = vmatpush.msra.mxu3 %v3193_v29  ;;  %v3304_v23 = vld [vmem:[%s4562_s7 + $0xf0] sm:$0xff] }
 0x1b7   :  { %v280_v28 = vsel %vm279_vm3, %v3064_v44, %v276_v24  ;;  %448 = vmatmul.f32.gmra.mxu1 %v344_v20  ;;  %489 = vmatmul.f32.gmra.mxu2 %v344_v20  ;;  %v3244_v44 = vld [vmem:[%s4562_s7 + $0x130] sm:$0xff]  ;;  %v3309_v24 = vld [vmem:[%s4562_s7 + $0x78] sm:$0xff] }
 0x1b8   :  { %v306_v31 = vmul.f32 %v280_v28, %v2604_v4  ;;  %v284_v32 = vmul.f32 0.5, %v283_v26  ;;  %530 = vmatmul.f32.gmra.mxu3 %v344_v20  ;;  %571 = vmatmul.f32.gmra.mxu0 %v344_v20  ;;  %v3216_v4 = vld [vmem:[%s4562_s7 + $0x150] sm:$0xff]  ;;  %v3317_v26 = vld [vmem:[%s4562_s7 + $0xc0] sm:$0xff]  ;;  %v3322_v28 = vld [vmem:[%s4562_s7 + $0xc8] sm:$0xff] }
 0x1b9   :  { %850 = vmatpush.msra.mxu1 %v3204_v33  ;;  %870 = vmatpush.msra.mxu2 %v3209_v34 }
 0x1ba   :  { %v318_v57 = vmul.f32 %v2844_v58, %v306_v31  ;;  %v285_v36 = vsub.f32 1.5, %v284_v32  ;;  %890 = vmatpush.msra.mxu3 %v3216_v4  ;;  %v3330_v32 = vld [vmem:[%s4562_s7 + $0xd0] sm:$0xff] }
 0x1bb   :  { %v3237_v40 = vpop.eup %2213  ;;  %851 = vmatpush.msra.mxu1 %v3230_v37  ;;  %871 = vmatpush.msra.mxu2 %v3235_v39 }
 0x1bc   :  { %v2216_v46 = vpop.eup %2215  ;;  %v330_v48 = vadd.f32 %v2861_v1, %v318_v57  ;;  %v286_v49 = vmul.f32 %v3146_v42, %v285_v36  ;;  %v292_v54 = vmul.f32 %v3237_v40, %v3149_v12  ;;  %891 = vmatpush.msra.mxu3 %v3244_v44  ;;  %vm298_vm7 = vweird.f32 %v3237_v40  ;;  %v3335_v57 = vld [vmem:[%s4562_s7 + $0x58] sm:$0xff]  ;;  %v3352_v12 = vld [vmem:[%s4562_s7 + $0xa0] sm:$0xff] }
 0x1bd   :  { %v345_v55 = vmul.f32 %v2216_v46, %v2571_v16  ;;  %852 = vmatpush.msra.mxu1 %v3270_v61  ;;  %872 = vmatpush.msra.mxu2 %v3275_v2  ;;  %vm299_vm9 = vmor %vm297_vm8, %vm298_vm7 }
 0x1be   :  { %2217 = vtanh.f32 %v330_v48  ;;  %v290_v60 = vsel %vm289_vm6, %v3146_v42, %v286_v49  ;;  %v293_v43 = vmul.f32 %v3237_v40, %v292_v54  ;;  %v3286_v42 = vld [vmem:[%s4562_s7 + $0x98] sm:$0xff]  ;;  %892 = vmatpush.msra.mxu3 %v3281_v6  ;;  %v3357_v54 = vld [vmem:[%s4562_s7 + $0xa8] sm:$0xff] }
 0x1bf   :  { %v307_v3 = vmul.f32 %v290_v60, %v2608_v9  ;;  %451 = vmatmul.f32.gmra.mxu1 %v345_v55  ;;  %492 = vmatmul.f32.gmra.mxu2 %v345_v55  ;;  %v3296_v9 = vld [vmem:[%s4562_s7 + $0xe8] sm:$0xff]  ;;  %v3368_v60 = vld [vmem:[%s4562_s7 + $0x38] sm:$0xff] }
 0x1c0   :  { %v294_v11 = vmul.f32 0.5, %v293_v43  ;;  %533 = vmatmul.f32.gmra.mxu3 %v345_v55  ;;  %574 = vmatmul.f32.gmra.mxu0 %v345_v55  ;;  %4638 = vst [vmem:[#allocation3_spill] sm:$0xff] %v3368_v60  ;;  %v3373_v43 = vld [vmem:[%s4562_s7 + $0x80] sm:$0xff] }
 0x1c1   :  { %v319_v22 = vmul.f32 %v2844_v58, %v307_v3  ;;  %916 = vmatpush.msra.mxu0 %v3286_v42  ;;  %853 = vmatpush.msra.mxu1 %v3291_v21 }
 0x1c2   :  { %v295_v20 = vsub.f32 1.5, %v294_v11  ;;  %873 = vmatpush.msra.mxu2 %v3296_v9  ;;  %893 = vmatpush.msra.mxu3 %v3304_v23  ;;  %v3386_v11 = vld [vmem:[%s4562_s7 + $0x90] sm:$0xff] }
 0x1c3   :  { %v331_v31 = vadd.f32 %v2861_v1, %v319_v22  ;;  %917 = vmatpush.msra.mxu0 %v3309_v24  ;;  %854 = vmatpush.msra.mxu1 %v3317_v26  ;;  %v3391_v22 = vld [vmem:[%s4562_s7 + $0x18] sm:$0xff] }
 0x1c4   :  { %v2218_v36 = vpop.eup %2217  ;;  %v296_v46 = vmul.f32 %v3237_v40, %v295_v20  ;;  %874 = vmatpush.msra.mxu2 %v3322_v28  ;;  %894 = vmatpush.msra.mxu3 %v3330_v32  ;;  %4639 = vst [vmem:[#allocation4_spill] sm:$0xff] %v3391_v22  ;;  %v3403_v20 = vld [vmem:[%s4562_s7 + $0x68] sm:$0xff] }
 0x1c5   :  { %2219 = vtanh.f32 %v331_v31  ;;  %v346_v48 = vmul.f32 %v2218_v36, %v2571_v16  ;;  %918 = vmatpush.msra.mxu0 %v3335_v57  ;;  %855 = vmatpush.msra.mxu1 %v3352_v12 }
 0x1c6   :  { %v300_v49 = vsel %vm299_vm9, %v3237_v40, %v296_v46  ;;  %v3363_v40 = vld [vmem:[%s4562_s7 + $0xb0] sm:$0xff]  ;;  %875 = vmatpush.msra.mxu2 %v3357_v54 }
 0x1c7   :  { %v308_v55 = vmul.f32 %v300_v49, %v2612_v14  ;;  %454 = vmatmul.f32.gmra.mxu1 %v346_v48  ;;  %495 = vmatmul.f32.gmra.mxu2 %v346_v48  ;;  %v3378_v14 = vld [vmem:[%s4562_s7 + $0x88] sm:$0xff]  ;;  %v3411_v46 = vld [vmem:[%s4562_s7 + $0x70] sm:$0xff] }
 0x1c8   :  { %536 = vmatmul.f32.gmra.mxu3 %v346_v48  ;;  %577 = vmatmul.f32.gmra.mxu0 %v346_v48  ;;  %v3427_v49 = vld [vmem:[%s4562_s7 + $0x48] sm:$0xff] }
 0x1c9   :  { %v320_v3 = vmul.f32 %v2844_v58, %v308_v55  ;;  %895 = vmatpush.msra.mxu3 %v3363_v40  ;;  %919 = vmatpush.msra.mxu0 %v3368_v60  ;;  %v3398_v58 = vld [vmem:[%s4562_s7 + $0x60] sm:$0xff]  ;;  %4641 = vst [vmem:[#allocation6_spill] sm:$0xff] %v3427_v49  ;;  %v3433_v55 = vld [vmem:[%s4562_s7 + $0x50] sm:$0xff] }
 0x1ca   :  { %856 = vmatpush.msra.mxu1 %v3373_v43  ;;  %876 = vmatpush.msra.mxu2 %v3378_v14  ;;  %4642 = vst [vmem:[#allocation7_spill] sm:$0xff] %v3433_v55 }
 0x1cb   :  { %v2220_v31 = vpop.eup %2219  ;;  %v332_v36 = vadd.f32 %v2861_v1, %v320_v3  ;;  %896 = vmatpush.msra.mxu3 %v3386_v11  ;;  %920 = vmatpush.msra.mxu0 %v3391_v22  ;;  %v3422_v1 = vld [vmem:[%s4562_s7 + $0x40] sm:$0xff] }
 0x1cc   :  { %v347_v48 = vmul.f32 %v2220_v31, %v2571_v16  ;;  %857 = vmatpush.msra.mxu1 %v3398_v58  ;;  %877 = vmatpush.msra.mxu2 %v3403_v20  ;;  %4640 = vst [vmem:[#allocation5_spill] sm:$0xff] %v3422_v1  ;;  %v3438_v3 = vld [vmem:[%s4562_s7 + $0x20] sm:$0xff]  ;;  %v3443_v31 = vld [vmem:[%s4562_s7 + $0x28] sm:$0xff] }
 0x1cd   :  { %2221 = vtanh.f32 %v332_v36  ;;  %897 = vmatpush.msra.mxu3 %v3411_v46  ;;  %1056 = vmatpush.msrb.mxu0 %v2971_v0  ;;  %4643 = vst [vmem:[#allocation8_spill] sm:$0xff] %v3438_v3  ;;  %v3450_v36 = vld [vmem:[%s4562_s7 + $0x30] sm:$0xff] }
 0x1ce   :  { %4644 = vst [vmem:[#allocation9_spill] sm:$0xff] %v3443_v31  ;;  %858 = vmatpush.msra.mxu1 %v3422_v1  ;;  %878 = vmatpush.msra.mxu2 %v3427_v49 }
 0x1cf   :  { %457 = vmatmul.f32.gmra.mxu1 %v347_v48  ;;  %498 = vmatmul.f32.gmra.mxu2 %v347_v48  ;;  %4645 = vst [vmem:[#allocation10_spill] sm:$0xff] %v3450_v36 }
 0x1d0   :  { %539 = vmatmul.f32.gmra.mxu3 %v347_v48  ;;  %580 = vmatmul.f32.gmra.mxu0 %v347_v48  ;;  %v3456_v48 = vld [vmem:[%s4562_s7] sm:$0xff] }
 0x1d1   :  { %898 = vmatpush.msra.mxu3 %v3433_v55  ;;  %4646 = vst [vmem:[#allocation11_spill] sm:$0xff] %v3456_v48  ;;  %1057 = vmatpush.msrb.mxu0 %v2987_v8  ;;  %v3469_v55 = vld [vmem:[%s4562_s7 + $0x10] sm:$0xff] }
 0x1d2   :  { %859 = vmatpush.msra.mxu1 %v3438_v3  ;;  %879 = vmatpush.msra.mxu2 %v3443_v31  ;;  %4648 = vst [vmem:[#allocation13_spill] sm:$0xff] %v3469_v55 }
 0x1d3   :  { %v2222_v49 = vpop.eup %2221  ;;  %899 = vmatpush.msra.mxu3 %v3450_v36  ;;  %1058 = vmatpush.msrb.mxu0 %v3003_v19 }
 0x1d4   :  { %v348_v1 = vmul.f32 %v2222_v49, %v2571_v16  ;;  %860 = vmatpush.msra.mxu1 %v3456_v48  ;;  %880 = vmatpush.msra.mxu2 %v3461_v15  ;;  %v4649_v16 = vmov 0.0   ;;  %v4652_v49 = vld [vmem:[#allocation7_spill] sm:$0xff] }
 0x1d5   :  { %900 = vmatpush.msra.mxu3 %v3469_v55  ;;  %1059 = vmatpush.msrb.mxu0 %v3025_v25 }
 0x1d7   :  { %460 = vmatmul.f32.gmra.mxu1 %v348_v1  ;;  %501 = vmatmul.f32.gmra.mxu2 %v348_v1 }
 0x1d8   :  { %542 = vmatmul.f32.gmra.mxu3 %v348_v1  ;;  %583 = vmatmul.f32.gmra.mxu0 %v348_v1 }
 0x1d9   :  { %1060 = vmatpush.msrb.mxu0 %v3049_v47 }
 0x1db   :  { %1061 = vmatpush.msrb.mxu0 %v3094_v50 }
 0x1dd   :  { %1062 = vmatpush.msrb.mxu0 %v3119_v52 }
 0x1df   :  { %691 = vmatmul.f32.vlgmr.msrb.gmra.mxu1 %v348_v1  ;;  %711 = vmatmul.f32.vlgmr.msrb.gmra.mxu2 %v348_v1 }
 0x1e0   :  { %731 = vmatmul.f32.vlgmr.msrb.gmra.mxu3 %v348_v1  ;;  %921 = vmatmul.f32.vlgmr.msra.gmra.mxu0 %v4649_v16  ;;  %v4651_v1 = vld [vmem:[#allocation6_spill] sm:$0xff] }
 0x1e1   :  { %996 = vmatpush.msrb.mxu1 %v3058_v38  ;;  %1016 = vmatpush.msrb.mxu2 %v3077_v51 }
 0x1e2   :  { %1036 = vmatpush.msrb.mxu3 %v3082_v53  ;;  %1063 = vmatpush.msrb.mxu0 %v3144_v10 }
 0x1e3   :  { %997 = vmatpush.msrb.mxu1 %v3089_v41  ;;  %1017 = vmatpush.msrb.mxu2 %v3101_v56 }
 0x1e4   :  { %1037 = vmatpush.msrb.mxu3 %v3106_v59  ;;  %1064 = vmatpush.msrb.mxu0 %v3198_v30 }
 0x1e5   :  { %998 = vmatpush.msrb.mxu1 %v3114_v62  ;;  %1018 = vmatpush.msrb.mxu2 %v3126_v63 }
 0x1e6   :  { %1038 = vmatpush.msrb.mxu3 %v3131_v5  ;;  %1065 = vmatpush.msrb.mxu0 %v3221_v35 }
 0x1e7   :  { %861 = vmatmul.f32.vlgmr.msra.gmra.mxu1 %v4649_v16  ;;  %881 = vmatmul.f32.vlgmr.msra.gmra.mxu2 %v4649_v16 }
 0x1e8   :  { %901 = vmatmul.f32.vlgmr.msra.gmra.mxu3 %v4649_v16  ;;  %999 = vmatpush.msrb.mxu1 %v3139_v7 }
 0x1e9   :  { %1019 = vmatpush.msrb.mxu2 %v3156_v17  ;;  %1039 = vmatpush.msrb.mxu3 %v3161_v18 }
 0x1ea   :  { %1000 = vmatpush.msrb.mxu1 %v3182_v13  ;;  %1066 = vmatpush.msrb.mxu0 %v3249_v45 }
 0x1eb   :  { %1020 = vmatpush.msrb.mxu2 %v3187_v27  ;;  %1040 = vmatpush.msrb.mxu3 %v3193_v29 }
 0x1ec   :  { %1001 = vmatpush.msrb.mxu1 %v3204_v33  ;;  %1067 = vmatpush.msrb.mxu0 %v3286_v42 }
 0x1ed   :  { %1021 = vmatpush.msrb.mxu2 %v3209_v34  ;;  %1041 = vmatpush.msrb.mxu3 %v3216_v4 }
 0x1ee   :  { %1002 = vmatpush.msrb.mxu1 %v3230_v37  ;;  %1068 = vmatpush.msrb.mxu0 %v3309_v24 }
 0x1ef   :  { %1022 = vmatpush.msrb.mxu2 %v3235_v39  ;;  %1042 = vmatpush.msrb.mxu3 %v3244_v44 }
 0x1f0   :  { %1003 = vmatpush.msrb.mxu1 %v3270_v61  ;;  %1069 = vmatpush.msrb.mxu0 %v3335_v57 }
 0x1f1   :  { %1023 = vmatpush.msrb.mxu2 %v3275_v2  ;;  %1043 = vmatpush.msrb.mxu3 %v3281_v6 }
 0x1f2   :  { %1004 = vmatpush.msrb.mxu1 %v3291_v21  ;;  %1070 = vmatpush.msrb.mxu0 %v3368_v60 }
 0x1f3   :  { %1024 = vmatpush.msrb.mxu2 %v3296_v9  ;;  %1044 = vmatpush.msrb.mxu3 %v3304_v23 }
 0x1f4   :  { %1005 = vmatpush.msrb.mxu1 %v3317_v26  ;;  %1071 = vmatpush.msrb.mxu0 %v3391_v22 }
 0x1f5   :  { %1025 = vmatpush.msrb.mxu2 %v3322_v28  ;;  %1045 = vmatpush.msrb.mxu3 %v3330_v32 }
 0x1f6   :  { %1006 = vmatpush.msrb.mxu1 %v3352_v12  ;;  %1207 = vmatpush.msra.mxu0 %v2971_v0  ;;  %v4650_v0 = vld [vmem:[#allocation5_spill] sm:$0xff] }
 0x1f7   :  { %1026 = vmatpush.msrb.mxu2 %v3357_v54  ;;  %1046 = vmatpush.msrb.mxu3 %v3363_v40 }
 0x1f8   :  { %1007 = vmatpush.msrb.mxu1 %v3373_v43  ;;  %1208 = vmatpush.msra.mxu0 %v2987_v8 }
 0x1f9   :  { %1027 = vmatpush.msrb.mxu2 %v3378_v14  ;;  %1047 = vmatpush.msrb.mxu3 %v3386_v11 }
 0x1fa   :  { %1008 = vmatpush.msrb.mxu1 %v3398_v58  ;;  %1209 = vmatpush.msra.mxu0 %v3003_v19 }
 0x1fb   :  { %1028 = vmatpush.msrb.mxu2 %v3403_v20  ;;  %1048 = vmatpush.msrb.mxu3 %v3411_v46 }
 0x1fc   :  { %1009 = vmatpush.msrb.mxu1 %v4650_v0  ;;  %1210 = vmatpush.msra.mxu0 %v3025_v25  ;;  %v413_v25 = vld [vmem:[%s4563_s8] sm:$0xf] }
 0x1fd   :  { %1029 = vmatpush.msrb.mxu2 %v4651_v1  ;;  %1049 = vmatpush.msrb.mxu3 %v4652_v49 }
 0x1fe   :  { %1010 = vmatpush.msrb.mxu1 %v3438_v3  ;;  %1211 = vmatpush.msra.mxu0 %v3049_v47 }
 0x1ff   :  { %1030 = vmatpush.msrb.mxu2 %v3443_v31  ;;  %1050 = vmatpush.msrb.mxu3 %v3450_v36 }
 0x200   :  { %1011 = vmatpush.msrb.mxu1 %v3456_v48  ;;  %1212 = vmatpush.msra.mxu0 %v3094_v50 }
 0x201   :  { %1031 = vmatpush.msrb.mxu2 %v3461_v15  ;;  %1051 = vmatpush.msrb.mxu3 %v3469_v55 }
 0x202   :  { %1147 = vmatpush.msra.mxu1 %v3058_v38  ;;  %1213 = vmatpush.msra.mxu0 %v3119_v52  ;;  %v3615_v38 = vperm.slane %v413_v25, 0  ;;  %v3629_v52 = vperm.slane %v413_v25, 2 }
 0x203   :  { %1167 = vmatpush.msra.mxu2 %v3077_v51  ;;  %1187 = vmatpush.msra.mxu3 %v3082_v53  ;;  %v3619_v53 = vperm.slane %v413_v25, 3 }
 0x204   :  { %1148 = vmatpush.msra.mxu1 %v3089_v41  ;;  %1214 = vmatpush.msra.mxu0 %v3144_v10 }
 0x205   :  { %1168 = vmatpush.msra.mxu2 %v3101_v56  ;;  %1188 = vmatpush.msra.mxu3 %v3106_v59 }
 0x206   :  { %1149 = vmatpush.msra.mxu1 %v3114_v62  ;;  %1215 = vmatpush.msra.mxu0 %v3198_v30  ;;  %v3627_v62 = vperm.slane %v413_v25, 1 }
 0x207   :  { %1169 = vmatpush.msra.mxu2 %v3126_v63  ;;  %1189 = vmatpush.msra.mxu3 %v3131_v5 }
 0x208   :  { %1150 = vmatpush.msra.mxu1 %v3139_v7  ;;  %1216 = vmatpush.msra.mxu0 %v3221_v35 }
 0x209   :  { %1170 = vmatpush.msra.mxu2 %v3156_v17  ;;  %1190 = vmatpush.msra.mxu3 %v3161_v18 }
 0x20a   :  { %1151 = vmatpush.msra.mxu1 %v3182_v13  ;;  %1217 = vmatpush.msra.mxu0 %v3249_v45 }
 0x20b   :  { %1171 = vmatpush.msra.mxu2 %v3187_v27  ;;  %1191 = vmatpush.msra.mxu3 %v3193_v29 }
 0x20c   :  { %1152 = vmatpush.msra.mxu1 %v3204_v33  ;;  %1218 = vmatpush.msra.mxu0 %v3286_v42 }
 0x20d   :  { %1172 = vmatpush.msra.mxu2 %v3209_v34  ;;  %1192 = vmatpush.msra.mxu3 %v3216_v4 }
 0x20e   :  { %1153 = vmatpush.msra.mxu1 %v3230_v37  ;;  %1219 = vmatpush.msra.mxu0 %v3309_v24 }
 0x20f   :  { %1173 = vmatpush.msra.mxu2 %v3235_v39  ;;  %1193 = vmatpush.msra.mxu3 %v3244_v44 }
 0x210   :  { %1154 = vmatpush.msra.mxu1 %v3270_v61  ;;  %1220 = vmatpush.msra.mxu0 %v3335_v57 }
 0x211   :  { %1174 = vmatpush.msra.mxu2 %v3275_v2  ;;  %1194 = vmatpush.msra.mxu3 %v3281_v6 }
 0x212   :  { %1155 = vmatpush.msra.mxu1 %v3291_v21  ;;  %1221 = vmatpush.msra.mxu0 %v3368_v60 }
 0x213   :  { %1175 = vmatpush.msra.mxu2 %v3296_v9  ;;  %1195 = vmatpush.msra.mxu3 %v3304_v23 }
 0x214   :  { %1156 = vmatpush.msra.mxu1 %v3317_v26  ;;  %1222 = vmatpush.msra.mxu0 %v3391_v22 }
 0x215   :  { %1176 = vmatpush.msra.mxu2 %v3322_v28  ;;  %1196 = vmatpush.msra.mxu3 %v3330_v32 }
 0x216   :  { %1157 = vmatpush.msra.mxu1 %v3352_v12 }
 0x217   :  { %1177 = vmatpush.msra.mxu2 %v3357_v54  ;;  %1197 = vmatpush.msra.mxu3 %v3363_v40 }
 0x218   :  { %1158 = vmatpush.msra.mxu1 %v3373_v43 }
 0x219   :  { %1178 = vmatpush.msra.mxu2 %v3378_v14  ;;  %1198 = vmatpush.msra.mxu3 %v3386_v11 }
 0x21a   :  { %1159 = vmatpush.msra.mxu1 %v3398_v58 }
 0x21b   :  { %1179 = vmatpush.msra.mxu2 %v3403_v20  ;;  %v3596_v8 = vpop.f32.mrf.mxu1  ;;  %1199 = vmatpush.msra.mxu3 %v3411_v46 }
 0x21c   :  { %v3599_v19 = vpop.f32.mrf.mxu0  ;;  %1160 = vmatpush.msra.mxu1 %v4650_v0 }
 0x21d   :  { %1180 = vmatpush.msra.mxu2 %v4651_v1  ;;  %1200 = vmatpush.msra.mxu3 %v4652_v49 }
 0x21e   :  { %1161 = vmatpush.msra.mxu1 %v3438_v3 }
 0x21f   :  { %1181 = vmatpush.msra.mxu2 %v3443_v31  ;;  %1201 = vmatpush.msra.mxu3 %v3450_v36 }
 0x220   :  { %1162 = vmatpush.msra.mxu1 %v3456_v48 }
 0x221   :  { %1182 = vmatpush.msra.mxu2 %v3461_v15  ;;  %v3612_v47 = vpop.f32.mrf.mxu2  ;;  %1202 = vmatpush.msra.mxu3 %v3469_v55  ;;  %v441_v55 = vadd.f32 %v3596_v8, %v3615_v38 }
 0x222   :  { %v3617_v51 = vpop.f32.mrf.mxu3 }
 0x223   :  { %v443_v41 = vpop.f32.mrf.mxu1 }
 0x224   :  { %v3622_v50 = vadd.f32 %v443_v41, %v3615_v38  ;;  %v566_v56 = vpop.f32.mrf.mxu0 }
 0x225   :  { %v3625_v59 = vadd.f32 %v566_v56, %v3619_v53 }
 0x226   :  { %4653 = vst [vmem:[#allocation5_spill] sm:$0xff] %v3622_v50 }
 0x227   :  { %4654 = vst [vmem:[#allocation6_spill] sm:$0xff] %v3625_v59 }
 0x229   :  { %v484_v63 = vpop.f32.mrf.mxu2 }
 0x22a   :  { %v3632_v5 = vadd.f32 %v484_v63, %v3627_v62  ;;  %v525_v7 = vpop.f32.mrf.mxu3 }
 0x22b   :  { %v3635_v10 = vadd.f32 %v525_v7, %v3629_v52  ;;  %v446_v17 = vpop.f32.mrf.mxu1 }
 0x22c   :  { %4655 = vst [vmem:[#allocation7_spill] sm:$0xff] %v3632_v5  ;;  %v3638_v18 = vadd.f32 %v446_v17, %v3615_v38  ;;  %v569_v30 = vpop.f32.mrf.mxu0 }
 0x22d   :  { %4656 = vst [vmem:[#allocation14_spill] sm:$0xff] %v3635_v10  ;;  %v3641_v16 = vadd.f32 %v569_v30, %v3619_v53 }
 0x22e   :  { %4657 = vst [vmem:[#allocation15_spill] sm:$0xff] %v3638_v18 }
 0x22f   :  { %4658 = vst [vmem:[#allocation16_spill] sm:$0xff] %v3641_v16 }
 0x231   :  { %v487_v41 = vpop.f32.mrf.mxu2 }
 0x232   :  { %v3644_v25 = vadd.f32 %v487_v41, %v3627_v62  ;;  %v528_v56 = vpop.f32.mrf.mxu3 }
 0x233   :  { %v3647_v63 = vadd.f32 %v528_v56, %v3629_v52 }
 0x234   :  { %4659 = vst [vmem:[#allocation17_spill] sm:$0xff] %v3644_v25  ;;  %v449_v5 = vpop.f32.mrf.mxu1 }
 0x235   :  { %4660 = vst [vmem:[#allocation18_spill] sm:$0xff] %v3647_v63  ;;  %v3650_v7 = vadd.f32 %v449_v5, %v3615_v38  ;;  %v572_v10 = vpop.f32.mrf.mxu0 }
 0x236   :  { %v3653_v17 = vadd.f32 %v572_v10, %v3619_v53 }
 0x237   :  { %4661 = vst [vmem:[#allocation19_spill] sm:$0xff] %v3650_v7 }
 0x238   :  { %4662 = vst [vmem:[#allocation20_spill] sm:$0xff] %v3653_v17 }
 0x23a   :  { %v490_v18 = vpop.f32.mrf.mxu2 }
 0x23b   :  { %v3656_v30 = vadd.f32 %v490_v18, %v3627_v62  ;;  %v531_v16 = vpop.f32.mrf.mxu3 }
 0x23c   :  { %v3659_v41 = vadd.f32 %v531_v16, %v3629_v52  ;;  %v452_v25 = vpop.f32.mrf.mxu1 }
 0x23d   :  { %4663 = vst [vmem:[#allocation21_spill] sm:$0xff] %v3656_v30  ;;  %v3662_v56 = vadd.f32 %v452_v25, %v3615_v38  ;;  %v575_v63 = vpop.f32.mrf.mxu0 }
 0x23e   :  { %4664 = vst [vmem:[#allocation22_spill] sm:$0xff] %v3659_v41  ;;  %v3665_v5 = vadd.f32 %v575_v63, %v3619_v53 }
 0x23f   :  { %4665 = vst [vmem:[#allocation23_spill] sm:$0xff] %v3662_v56 }
 0x240   :  { %4666 = vst [vmem:[#allocation24_spill] sm:$0xff] %v3665_v5 }
 0x242   :  { %v493_v7 = vpop.f32.mrf.mxu2 }
 0x243   :  { %v3668_v10 = vadd.f32 %v493_v7, %v3627_v62  ;;  %v534_v17 = vpop.f32.mrf.mxu3 }
 0x244   :  { %v3671_v18 = vadd.f32 %v534_v17, %v3629_v52  ;;  %v455_v30 = vpop.f32.mrf.mxu1 }
 0x245   :  { %4667 = vst [vmem:[#allocation25_spill] sm:$0xff] %v3668_v10  ;;  %v3674_v16 = vadd.f32 %v455_v30, %v3615_v38  ;;  %v578_v41 = vpop.f32.mrf.mxu0 }
 0x246   :  { %4668 = vst [vmem:[#allocation26_spill] sm:$0xff] %v3671_v18  ;;  %v3677_v25 = vadd.f32 %v578_v41, %v3619_v53 }
 0x247   :  { %4669 = vst [vmem:[#allocation27_spill] sm:$0xff] %v3674_v16 }
 0x248   :  { %4670 = vst [vmem:[#allocation28_spill] sm:$0xff] %v3677_v25 }
 0x24a   :  { %v496_v56 = vpop.f32.mrf.mxu2 }
 0x24b   :  { %v3680_v63 = vadd.f32 %v496_v56, %v3627_v62  ;;  %v537_v5 = vpop.f32.mrf.mxu3 }
 0x24c   :  { %v3683_v7 = vadd.f32 %v537_v5, %v3629_v52  ;;  %v458_v10 = vpop.f32.mrf.mxu1 }
 0x24d   :  { %4671 = vst [vmem:[#allocation29_spill] sm:$0xff] %v3680_v63  ;;  %v3686_v17 = vadd.f32 %v458_v10, %v3615_v38  ;;  %v581_v18 = vpop.f32.mrf.mxu0 }
 0x24e   :  { %4672 = vst [vmem:[#allocation30_spill] sm:$0xff] %v3683_v7  ;;  %v3689_v30 = vadd.f32 %v581_v18, %v3619_v53  ;;  %v667_v18 = vld [vmem:[%s4564_s10] sm:$0x7] }
 0x24f   :  { %4673 = vst [vmem:[#allocation31_spill] sm:$0xff] %v3686_v17  ;;  %v671_v50 = vperm.slane %v667_v18, 2 }
 0x250   :  { %4674 = vst [vmem:[#allocation32_spill] sm:$0xff] %v3689_v30  ;;  %v669_v30 = vperm.slane %v667_v18, 0 }
 0x252   :  { %v499_v16 = vpop.f32.mrf.mxu2 }
 0x253   :  { %v3692_v41 = vadd.f32 %v499_v16, %v3627_v62  ;;  %v540_v25 = vpop.f32.mrf.mxu3 }
 0x254   :  { %v3695_v56 = vadd.f32 %v540_v25, %v3629_v52  ;;  %v461_v63 = vpop.f32.mrf.mxu1 }
 0x255   :  { %4675 = vst [vmem:[#allocation33_spill] sm:$0xff] %v3692_v41  ;;  %v3698_v5 = vadd.f32 %v461_v63, %v3615_v38  ;;  %v584_v7 = vpop.f32.mrf.mxu0  ;;  %v564_v63 = vadd.f32 %v3599_v19, %v3619_v53 }
 0x256   :  { %4676 = vst [vmem:[#allocation34_spill] sm:$0xff] %v3695_v56  ;;  %v3701_v10 = vadd.f32 %v584_v7, %v3619_v53  ;;  %v482_v53 = vadd.f32 %v3612_v47, %v3627_v62 }
 0x257   :  { %4677 = vst [vmem:[#allocation35_spill] sm:$0xff] %v3698_v5 }
 0x258   :  { %4678 = vst [vmem:[#allocation36_spill] sm:$0xff] %v3701_v10 }
 0x25a   :  { %v502_v17 = vpop.f32.mrf.mxu2 }
 0x25b   :  { %v3707_v16 = vadd.f32 %v502_v17, %v3627_v62  ;;  %v543_v41 = vpop.f32.mrf.mxu3 }
 0x25c   :  { %v3710_v25 = vadd.f32 %v543_v41, %v3629_v52  ;;  %v692_v56 = vpop.f32.mrf.mxu1 }
 0x25d   :  { %4679 = vst [vmem:[#allocation37_spill] sm:$0xff] %v3707_v16  ;;  %v693_v5 = vadd.f32 %v692_v56, %v669_v30  ;;  %v922_v7 = vpop.f32.mrf.mxu0 }
 0x25e   :  { %4680 = vst [vmem:[#allocation38_spill] sm:$0xff] %v3710_v25  ;;  %v928_v59 = vadd.f32 %v922_v7, %v564_v63 }
 0x25f   :  { %v2158_v10 = vmul.f32 -1.442695, %v693_v5  ;;  %v670_v5 = vperm.slane %v667_v18, 1 }
 0x260   :  { %v2162_v17 = vmul.f32 -1.442695, %v928_v59 }
 0x261   :  { %2223 = vpow2.f32 %v2158_v10 }
 0x262   :  { %v712_v22 = vpop.f32.mrf.mxu2  ;;  %2225 = vpow2.f32 %v2162_v17 }
 0x263   :  { %v732_v16 = vpop.f32.mrf.mxu3 }
 0x264   :  { %v733_v15 = vadd.f32 %v732_v16, %v671_v50  ;;  %v862_v48 = vpop.f32.mrf.mxu1 }
 0x265   :  { %v925_v41 = vadd.f32 %v862_v48, %v441_v55  ;;  %v713_v55 = vadd.f32 %v712_v22, %v670_v5 }
 0x266   :  { %v2159_v25 = vmul.f32 -1.442695, %v733_v15 }
 0x267   :  { %v2224_v60 = vpop.eup %2223  ;;  %v2160_v36 = vmul.f32 -1.442695, %v925_v41 }
 0x268   :  { %v738_v19 = vadd.f32 1.0, %v2224_v60  ;;  %2227 = vpow2.f32 %v2159_v25  ;;  %v2226_v8 = vpop.eup %2225  ;;  %v523_v25 = vadd.f32 %v3617_v51, %v3629_v52 }
 0x269   :  { %2229 = vpow2.f32 %v2160_v36  ;;  %v3721_v36 = vadd.f32 1.0, %v2226_v8 }
 0x26a   :  { %2231 = vrcp.f32 %v738_v19  ;;  %v882_v30 = vpop.f32.mrf.mxu2  ;;  %v750_v62 = vand.u32 2147483648, %v738_v19  ;;  %v748_v7 = vand.u32 2147483647, %v738_v19  ;;  %vm744_vm11 = vweird.f32 %v738_v19 }
 0x26b   :  { %v926_v56 = vadd.f32 %v882_v30, %v482_v53  ;;  %v902_v18 = vpop.f32.mrf.mxu3 }
 0x26c   :  { %v927_v53 = vadd.f32 %v902_v18, %v523_v25  ;;  %vm749_vm13 = vcmp.eq.f32.partialorder %v748_v7, 8.507059e+37 }
 0x26d   :  { %v2161_v38 = vmul.f32 -1.442695, %v926_v56  ;;  %v751_v56 = vor.u32 1.1754944e-38, %v750_v62 }
 0x26e   :  { %v2228_v59 = vpop.eup %2227 }
 0x26f   :  { %v2230_v50 = vpop.eup %2229  ;;  %v3718_v10 = vadd.f32 1.0, %v2228_v59  ;;  %2233 = vpow2.f32 %v2161_v38 }
 0x270   :  { %v2232_v15 = vpop.eup %2231  ;;  %v932_v48 = vadd.f32 1.0, %v2230_v50 }
 0x271   :  { %v740_v60 = vmul.f32 %v2232_v15, %v738_v19  ;;  %2235 = vrcp.f32 %v3718_v10  ;;  %vm745_vm10 = vweird.f32 %v2232_v15  ;;  %v770_v19 = vand.u32 2147483648, %v3718_v10 }
 0x272   :  { %2237 = vrcp.f32 %v932_v48  ;;  %vm746_vm12 = vmor %vm744_vm11, %vm745_vm10  ;;  %vm764_vm0 = vweird.f32 %v3718_v10  ;;  %vm938_vm2 = vweird.f32 %v932_v48  ;;  %vm977_vm11 = vweird.f32 %v3721_v36 }
 0x273   :  { %v741_v47 = vsub.f32 1.0, %v740_v60  ;;  %2239 = vtanh.f32 %v713_v55 }
 0x274   :  { %2241 = vrcp.f32 %v3721_v36 }
 0x275   :  { %v2234_v16 = vpop.eup %2233  ;;  %v742_v63 = vmul.f32 %v2232_v15, %v741_v47  ;;  %v944_v47 = vand.u32 2147483648, %v932_v48 }
 0x276   :  { %v3725_v17 = vadd.f32 1.0, %v2234_v16  ;;  %v942_v16 = vand.u32 2147483647, %v932_v48 }
 0x277   :  { %v2236_v22 = vpop.eup %2235  ;;  %v743_v41 = vadd.f32 %v2232_v15, %v742_v63  ;;  %v768_v63 = vand.u32 2147483647, %v3718_v10 }
 0x278   :  { %v2238_v30 = vpop.eup %2237  ;;  %v760_v5 = vmul.f32 %v2236_v22, %v3718_v10  ;;  %2243 = vrcp.f32 %v3725_v17  ;;  %vm765_vm14 = vweird.f32 %v2236_v22  ;;  %vm943_vm4 = vcmp.eq.f32.partialorder %v942_v16, 8.507059e+37 }
 0x279   :  { %v747_v8 = vsel %vm746_vm12, %v2232_v15, %v743_v41  ;;  %v934_v51 = vmul.f32 %v2238_v30, %v932_v48  ;;  %v2240_v52 = vpop.eup %2239  ;;  %2245 = vtanh.f32 %v927_v53  ;;  %vm939_vm15 = vweird.f32 %v2238_v30  ;;  %vm3733_vm1 = vmor %vm764_vm0, %vm765_vm14 }
 0x27a   :  { %v752_v38 = vsel %vm749_vm13, %v751_v56, %v747_v8  ;;  %v761_v59 = vsub.f32 1.0, %v760_v5  ;;  %v2242_v18 = vpop.eup %2241  ;;  %vm940_vm3 = vmor %vm938_vm2, %vm939_vm15  ;;  %v945_v5 = vor.u32 1.1754944e-38, %v944_v47  ;;  %v963_v10 = vand.u32 2147483648, %v3725_v17 }
 0x27b   :  { %v774_v50 = vmul.f32 %v2240_v52, %v752_v38  ;;  %v935_v55 = vsub.f32 1.0, %v934_v51  ;;  %v973_v56 = vmul.f32 %v2242_v18, %v3721_v36  ;;  %v771_v52 = vor.u32 1.1754944e-38, %v770_v19 }
 0x27c   :  { %v762_v60 = vmul.f32 %v2236_v22, %v761_v59  ;;  %vm769_vm5 = vcmp.eq.f32.partialorder %v768_v63, 8.507059e+37  ;;  %vm957_vm7 = vweird.f32 %v3725_v17  ;;  %v964_v19 = vor.u32 1.1754944e-38, %v963_v10  ;;  %v3791_v10 = vld [vmem:[%s4562_s7 + $0x1d0] sm:$0xff] }
 0x27d   :  { %2247 = vtanh.f32 %v774_v50  ;;  %v936_v62 = vmul.f32 %v2238_v30, %v935_v55  ;;  %v961_v55 = vand.u32 2147483647, %v3725_v17  ;;  %v974_v47 = vsub.f32 1.0, %v973_v56 }
 0x27e   :  { %v2244_v25 = vpop.eup %2243  ;;  %v763_v15 = vadd.f32 %v2236_v22, %v762_v60  ;;  %vm978_vm10 = vweird.f32 %v2242_v18 }
 0x27f   :  { %v953_v41 = vmul.f32 %v2244_v25, %v3725_v17  ;;  %v937_v53 = vadd.f32 %v2238_v30, %v936_v62  ;;  %v2246_v51 = vpop.eup %2245  ;;  %vm958_vm6 = vweird.f32 %v2244_v25  ;;  %vm962_vm9 = vcmp.eq.f32.partialorder %v961_v55, 8.507059e+37  ;;  %vm979_vm12 = vmor %vm977_vm11, %vm978_vm10  ;;  %v3803_v55 = vld [vmem:[%s4562_s7 + $0x1a0] sm:$0xff] }
 0x280   :  { %v767_v8 = vsel %vm3733_vm1, %v2236_v22, %v763_v15  ;;  %vm959_vm8 = vmor %vm957_vm7, %vm958_vm6  ;;  %v975_v15 = vmul.f32 %v2242_v18, %v974_v47  ;;  %v3827_v47 = vld [vmem:[%s4562_s7 + $0x180] sm:$0xff] }
 0x281   :  { %v954_v38 = vsub.f32 1.0, %v953_v41  ;;  %v941_v59 = vsel %vm940_vm3, %v2238_v30, %v937_v53  ;;  %v772_v31 = vsel %vm769_vm5, %v771_v52, %v767_v8  ;;  %v983_v53 = vand.u32 2147483648, %v3721_v36  ;;  %v3773_v52 = vld [vmem:[%s4562_s7 + $0x1f8] sm:$0xff] }
 0x282   :  { %v946_v50 = vsel %vm943_vm4, %v945_v5, %v941_v59  ;;  %v976_v63 = vadd.f32 %v2242_v18, %v975_v15  ;;  %v3785_v59 = vld [vmem:[%s4562_s7 + $0x1c8] sm:$0xff] }
 0x283   :  { %v2248_v60 = vpop.eup %2247  ;;  %v955_v48 = vmul.f32 %v2244_v25, %v954_v38  ;;  %v988_v62 = vmul.f32 %v2246_v51, %v946_v50  ;;  %v984_v56 = vor.u32 1.1754944e-38, %v983_v53  ;;  %v3755_v51 = vld [vmem:[%s4562_s7 + $0x1e0] sm:$0xff]  ;;  %v3797_v50 = vld [vmem:[%s4562_s7 + $0x1d8] sm:$0xff] }
 0x284   :  { %v3743_v3 = vmul.f32 %v2248_v60, %v772_v31  ;;  %v981_v31 = vand.u32 2147483647, %v3721_v36  ;;  %v980_v17 = vsel %vm979_vm12, %v2242_v18, %v976_v63  ;;  %v3761_v36 = vld [vmem:[%s4562_s7 + $0x1e8] sm:$0xff]  ;;  %v3767_v18 = vld [vmem:[%s4562_s7 + $0x1f0] sm:$0xff]  ;;  %v3779_v38 = vld [vmem:[%s4562_s7 + $0x1c0] sm:$0xff] }
 0x285   :  { %v956_v22 = vadd.f32 %v2244_v25, %v955_v48  ;;  %v3809_v60 = vld [vmem:[%s4562_s7 + $0x1a8] sm:$0xff]  ;;  %v3815_v48 = vld [vmem:[%s4562_s7 + $0x1b0] sm:$0xff] }
 0x286   :  { %4683 = vst [vmem:[#allocation39_spill] sm:$0xff] %v3743_v3  ;;  %vm982_vm13 = vcmp.eq.f32.partialorder %v981_v31, 8.507059e+37  ;;  %v4199_v3 = vld [vmem:[%s4562_s7 + $0x10] sm:$0xff] }
 0x287   :  { %v960_v30 = vsel %vm959_vm8, %v2244_v25, %v956_v22  ;;  %v985_v5 = vsel %vm982_vm13, %v984_v56, %v980_v17  ;;  %v3833_v22 = vld [vmem:[%s4562_s7 + $0x188] sm:$0xff]  ;;  %4720 = vst [vmem:[#allocation52_spill] sm:$0xff] %v4199_v3 }
 0x288   :  { %v965_v16 = vsel %vm962_vm9, %v964_v19, %v960_v30  ;;  %v3839_v19 = vld [vmem:[%s4562_s7 + $0x190] sm:$0xff]  ;;  %v3845_v30 = vld [vmem:[%s4562_s7 + $0x198] sm:$0xff] }
 0x289   :  { %v987_v7 = vmul.f32 0.0, %v965_v16  ;;  %v3854_v16 = vld [vmem:[%s4562_s7 + $0x178] sm:$0xff] }
 0x28b   :  { %v3746_v41 = vadd.f32 %v988_v62, %v987_v7  ;;  %v3821_v62 = vld [vmem:[%s4562_s7 + $0x1b8] sm:$0xff] }
 0x28d   :  { %2249 = vtanh.f32 %v3746_v41 }
 0x293   :  { %v2250_v25 = vpop.eup %2249 }
 0x294   :  { %v991_v8 = vmul.f32 %v2250_v25, %v985_v5 }
 0x296   :  { %1012 = vmatmul.f32.vlgmr.msrb.gmra.mxu1 %v991_v8  ;;  %1032 = vmatmul.f32.vlgmr.msrb.gmra.mxu2 %v991_v8 }
 0x297   :  { %1052 = vmatmul.f32.vlgmr.msrb.gmra.mxu3 %v991_v8  ;;  %1072 = vmatmul.f32.vlgmr.msrb.gmra.mxu0 %v991_v8 }
 0x298   :  { %1298 = vmatpush.msrb.mxu1 %v3755_v51  ;;  %1318 = vmatpush.msrb.mxu2 %v3761_v36 }
 0x299   :  { %1338 = vmatpush.msrb.mxu3 %v3767_v18  ;;  %1358 = vmatpush.msrb.mxu0 %v3773_v52 }
 0x29a   :  { %1299 = vmatpush.msrb.mxu1 %v3779_v38  ;;  %1319 = vmatpush.msrb.mxu2 %v3785_v59 }
 0x29b   :  { %1339 = vmatpush.msrb.mxu3 %v3791_v10  ;;  %1359 = vmatpush.msrb.mxu0 %v3797_v50 }
 0x29c   :  { %1300 = vmatpush.msrb.mxu1 %v3803_v55  ;;  %1320 = vmatpush.msrb.mxu2 %v3809_v60 }
 0x29d   :  { %1340 = vmatpush.msrb.mxu3 %v3815_v48  ;;  %1360 = vmatpush.msrb.mxu0 %v3821_v62 }
 0x29e   :  { %1301 = vmatpush.msrb.mxu1 %v3827_v47  ;;  %1321 = vmatpush.msrb.mxu2 %v3833_v22 }
 0x29f   :  { %1341 = vmatpush.msrb.mxu3 %v3839_v19  ;;  %1361 = vmatpush.msrb.mxu0 %v3845_v30 }
 0x2a0   :  { %1302 = vmatpush.msrb.mxu1 %v3182_v13  ;;  %1322 = vmatpush.msrb.mxu2 %v3187_v27  ;;  %v3863_v13 = vld [vmem:[%s4562_s7 + $0x158] sm:$0xff] }
 0x2a1   :  { %1342 = vmatpush.msrb.mxu3 %v3193_v29  ;;  %1362 = vmatpush.msrb.mxu0 %v3854_v16  ;;  %v3872_v27 = vld [vmem:[%s4562_s7 + $0x138] sm:$0xff] }
 0x2a2   :  { %1303 = vmatpush.msrb.mxu1 %v3204_v33  ;;  %1323 = vmatpush.msrb.mxu2 %v3209_v34  ;;  %v3881_v29 = vld [vmem:[%s4562_s7 + $0x118] sm:$0xff]  ;;  %v4684_v34 = vld [vmem:[#allocation8_spill] sm:$0xff] }
 0x2a3   :  { %1343 = vmatpush.msrb.mxu3 %v3216_v4  ;;  %1363 = vmatpush.msrb.mxu0 %v3863_v13  ;;  %v3890_v33 = vld [vmem:[%s4562_s7 + $0xf8] sm:$0xff]  ;;  %v4685_v4 = vld [vmem:[#allocation9_spill] sm:$0xff] }
 0x2a4   :  { %1304 = vmatpush.msrb.mxu1 %v3230_v37  ;;  %1324 = vmatpush.msrb.mxu2 %v3235_v39  ;;  %v4687_v37 = vld [vmem:[#allocation3_spill] sm:$0xff] }
 0x2a5   :  { %1344 = vmatpush.msrb.mxu3 %v3244_v44  ;;  %1364 = vmatpush.msrb.mxu0 %v3872_v27  ;;  %v4688_v39 = vld [vmem:[#allocation11_spill] sm:$0xff]  ;;  %v4689_v44 = vld [vmem:[#allocation12_spill] sm:$0xff] }
 0x2a6   :  { %1305 = vmatpush.msrb.mxu1 %v3270_v61  ;;  %1325 = vmatpush.msrb.mxu2 %v3275_v2  ;;  %v4691_v61 = vld [vmem:[#allocation4_spill] sm:$0xff] }
 0x2a7   :  { %1345 = vmatpush.msrb.mxu3 %v3281_v6  ;;  %1365 = vmatpush.msrb.mxu0 %v3881_v29  ;;  %v4692_v6 = vld [vmem:[#allocation5_spill] sm:$0xff] }
 0x2a8   :  { %1306 = vmatpush.msrb.mxu1 %v3291_v21  ;;  %1326 = vmatpush.msrb.mxu2 %v3296_v9  ;;  %v4693_v9 = vld [vmem:[#allocation6_spill] sm:$0xff] }
 0x2a9   :  { %1346 = vmatpush.msrb.mxu3 %v3304_v23  ;;  %1366 = vmatpush.msrb.mxu0 %v3890_v33 }
 0x2aa   :  { %1307 = vmatpush.msrb.mxu1 %v3317_v26  ;;  %1327 = vmatpush.msrb.mxu2 %v3322_v28 }
 0x2ab   :  { %1347 = vmatpush.msrb.mxu3 %v3330_v32  ;;  %1367 = vmatpush.msrb.mxu0 %v3221_v35  ;;  %v4686_v35 = vld [vmem:[#allocation10_spill] sm:$0xff]  ;;  %v4694_v32 = vld [vmem:[#allocation7_spill] sm:$0xff] }
 0x2ac   :  { %1308 = vmatpush.msrb.mxu1 %v3352_v12  ;;  %1328 = vmatpush.msrb.mxu2 %v3357_v54 }
 0x2ad   :  { %1348 = vmatpush.msrb.mxu3 %v3363_v40  ;;  %1368 = vmatpush.msrb.mxu0 %v3249_v45  ;;  %v4690_v45 = vld [vmem:[#allocation13_spill] sm:$0xff] }
 0x2ae   :  { %1309 = vmatpush.msrb.mxu1 %v3373_v43  ;;  %1329 = vmatpush.msrb.mxu2 %v3378_v14 }
 0x2af   :  { %1349 = vmatpush.msrb.mxu3 %v3386_v11  ;;  %1369 = vmatpush.msrb.mxu0 %v3286_v42 }
 0x2b0   :  { %1310 = vmatpush.msrb.mxu1 %v3398_v58  ;;  %1330 = vmatpush.msrb.mxu2 %v3403_v20 }
 0x2b1   :  { %1350 = vmatpush.msrb.mxu3 %v3411_v46  ;;  %1370 = vmatpush.msrb.mxu0 %v3309_v24 }
 0x2b2   :  { %1311 = vmatpush.msrb.mxu1 %v4650_v0  ;;  %1331 = vmatpush.msrb.mxu2 %v4651_v1  ;;  %v4695_v0 = vld [vmem:[#allocation14_spill] sm:$0xff] }
 0x2b3   :  { %1351 = vmatpush.msrb.mxu3 %v4652_v49  ;;  %1371 = vmatpush.msrb.mxu0 %v3335_v57 }
 0x2b4   :  { %1312 = vmatpush.msrb.mxu1 %v4684_v34  ;;  %1332 = vmatpush.msrb.mxu2 %v4685_v4 }
 0x2b5   :  { %1352 = vmatpush.msrb.mxu3 %v4686_v35  ;;  %1372 = vmatpush.msrb.mxu0 %v4687_v37 }
 0x2b6   :  { %1313 = vmatpush.msrb.mxu1 %v4688_v39  ;;  %1333 = vmatpush.msrb.mxu2 %v4689_v44 }
 0x2b7   :  { %1353 = vmatpush.msrb.mxu3 %v4690_v45  ;;  %1373 = vmatpush.msrb.mxu0 %v4691_v61 }
 0x313   :  { %v1013_v2 = vpop.f32.mrf.mxu1 }
 0x314   :  { %v1076_v42 = vadd.f32 %v1013_v2, %v4692_v6  ;;  %v1073_v21 = vpop.f32.mrf.mxu0 }
 0x315   :  { %v1079_v23 = vadd.f32 %v1073_v21, %v4693_v9 }
 0x316   :  { %v2163_v24 = vmul.f32 -1.442695, %v1076_v42 }
 0x317   :  { %v2165_v26 = vmul.f32 -1.442695, %v1079_v23 }
 0x318   :  { %2251 = vpow2.f32 %v2163_v24 }
 0x319   :  { %2253 = vpow2.f32 %v2165_v26  ;;  %v1033_v28 = vpop.f32.mrf.mxu2 }
 0x31a   :  { %v1077_v57 = vadd.f32 %v1033_v28, %v4694_v32  ;;  %v1053_v58 = vpop.f32.mrf.mxu3 }
 0x31b   :  { %v1078_v1 = vadd.f32 %v1053_v58, %v4695_v0  ;;  %v3960_v58 = vld [vmem:[%s4562_s7 + $0x170] sm:$0xff] }
 0x31c   :  { %v2164_v12 = vmul.f32 -1.442695, %v1077_v57  ;;  %v3979_v0 = vld [vmem:[%s4562_s7 + $0x150] sm:$0xff] }
 0x31e   :  { %v2252_v54 = vpop.eup %2251  ;;  %2255 = vpow2.f32 %v2164_v12 }
 0x31f   :  { %v2254_v40 = vpop.eup %2253  ;;  %v1083_v43 = vadd.f32 1.0, %v2252_v54 }
 0x320   :  { %v1122_v14 = vadd.f32 1.0, %v2254_v40 }
 0x321   :  { %2257 = vrcp.f32 %v1083_v43  ;;  %v1095_v7 = vand.u32 2147483648, %v1083_v43  ;;  %v1093_v31 = vand.u32 2147483647, %v1083_v43  ;;  %vm1089_vm15 = vweird.f32 %v1083_v43 }
 0x322   :  { %2259 = vrcp.f32 %v1122_v14  ;;  %v1134_v32 = vand.u32 2147483648, %v1122_v14  ;;  %vm1128_vm7 = vweird.f32 %v1122_v14  ;;  %v1132_v57 = vand.u32 2147483647, %v1122_v14 }
 0x323   :  { %v1096_v8 = vor.u32 1.1754944e-38, %v1095_v7  ;;  %vm1094_vm1 = vcmp.eq.f32.partialorder %v1093_v31, 8.507059e+37  ;;  %v4005_v7 = vld [vmem:[%s4562_s7 + $0x100] sm:$0xff] }
 0x324   :  { %v2256_v11 = vpop.eup %2255  ;;  %v1135_v54 = vor.u32 1.1754944e-38, %v1134_v32  ;;  %vm1133_vm9 = vcmp.eq.f32.partialorder %v1132_v57, 8.507059e+37  ;;  %v4024_v31 = vld [vmem:[%s4562_s7 + $0xe0] sm:$0xff]  ;;  %v4157_v32 = vld [vmem:[%s4562_s7 + $0x58] sm:$0xff] }
 0x325   :  { %v1102_v20 = vadd.f32 1.0, %v2256_v11  ;;  %4713 = vst [vmem:[#allocation45_spill] sm:$0xff] %v4157_v32  ;;  %v4163_v57 = vld [vmem:[%s4562_s7 + $0x20] sm:$0xff] }
 0x326   :  { %4714 = vst [vmem:[#allocation46_spill] sm:$0xff] %v4163_v57 }
 0x327   :  { %v2258_v46 = vpop.eup %2257  ;;  %2261 = vrcp.f32 %v1102_v20  ;;  %v1114_v37 = vand.u32 2147483648, %v1102_v20  ;;  %v1112_v45 = vand.u32 2147483647, %v1102_v20  ;;  %vm1108_vm3 = vweird.f32 %v1102_v20 }
 0x328   :  { %v1085_v49 = vmul.f32 %v2258_v46, %v1083_v43  ;;  %2263 = vtanh.f32 %v1078_v1  ;;  %v2260_v63 = vpop.eup %2259  ;;  %vm1090_vm14 = vweird.f32 %v2258_v46  ;;  %v3986_v1 = vld [vmem:[%s4562_s7 + $0x120] sm:$0xff] }
 0x329   :  { %v1124_v5 = vmul.f32 %v2260_v63, %v1122_v14  ;;  %vm1091_vm0 = vmor %vm1089_vm15, %vm1090_vm14  ;;  %v1115_v42 = vor.u32 1.1754944e-38, %v1114_v37  ;;  %vm1113_vm5 = vcmp.eq.f32.partialorder %v1112_v45, 8.507059e+37  ;;  %vm1129_vm6 = vweird.f32 %v2260_v63  ;;  %v3954_v14 = vld [vmem:[%s4562_s7 + $0x168] sm:$0xff]  ;;  %v4079_v37 = vld [vmem:[%s4562_s7 + $0xb0] sm:$0xff] }
 0x32a   :  { %v1086_v15 = vsub.f32 1.0, %v1085_v49  ;;  %vm1130_vm8 = vmor %vm1128_vm7, %vm1129_vm6  ;;  %v3992_v49 = vld [vmem:[%s4562_s7 + $0x128] sm:$0xff]  ;;  %4700 = vst [vmem:[#allocation11_spill] sm:$0xff] %v4079_v37 }
 0x32b   :  { %v1125_v2 = vsub.f32 1.0, %v1124_v5  ;;  %v4049_v5 = vld [vmem:[%s4562_s7 + $0xc8] sm:$0xff] }
 0x32c   :  { %v1087_v53 = vmul.f32 %v2258_v46, %v1086_v15  ;;  %v3998_v15 = vld [vmem:[%s4562_s7 + $0x130] sm:$0xff]  ;;  %v4097_v45 = vld [vmem:[%s4562_s7 + $0x88] sm:$0xff] }
 0x32d   :  { %v2262_v17 = vpop.eup %2261  ;;  %v1126_v23 = vmul.f32 %v2260_v63, %v1125_v2  ;;  %4703 = vst [vmem:[#allocation4_spill] sm:$0xff] %v4097_v45  ;;  %v4109_v2 = vld [vmem:[%s4562_s7 + $0x98] sm:$0xff] }
 0x32e   :  { %v1104_v56 = vmul.f32 %v2262_v17, %v1102_v20  ;;  %v1088_v25 = vadd.f32 %v2258_v46, %v1087_v53  ;;  %v2264_v35 = vpop.eup %2263  ;;  %vm1109_vm2 = vweird.f32 %v2262_v17  ;;  %v3967_v20 = vld [vmem:[%s4562_s7 + $0x140] sm:$0xff]  ;;  %v4017_v53 = vld [vmem:[%s4562_s7 + $0x110] sm:$0xff]  ;;  %4705 = vst [vmem:[#allocation6_spill] sm:$0xff] %v4109_v2 }
 0x32f   :  { %vm1110_vm4 = vmor %vm1108_vm3, %vm1109_vm2  ;;  %v1127_v28 = vadd.f32 %v2260_v63, %v1126_v23  ;;  %v4139_v23 = vld [vmem:[%s4562_s7 + $0x40] sm:$0xff] }
 0x330   :  { %v1105_v34 = vsub.f32 1.0, %v1104_v56  ;;  %v1092_v4 = vsel %vm1091_vm0, %v2258_v46, %v1088_v25  ;;  %v3973_v46 = vld [vmem:[%s4562_s7 + $0x148] sm:$0xff]  ;;  %v4036_v56 = vld [vmem:[%s4562_s7 + $0xf0] sm:$0xff]  ;;  %v4043_v25 = vld [vmem:[%s4562_s7 + $0xc0] sm:$0xff]  ;;  %4710 = vst [vmem:[#allocation42_spill] sm:$0xff] %v4139_v23 }
 0x331   :  { %v1097_v39 = vsel %vm1094_vm1, %v1096_v8, %v1092_v4  ;;  %v1131_v12 = vsel %vm1130_vm8, %v2260_v63, %v1127_v28  ;;  %v4011_v63 = vld [vmem:[%s4562_s7 + $0x108] sm:$0xff]  ;;  %v4055_v8 = vld [vmem:[%s4562_s7 + $0xd0] sm:$0xff]  ;;  %v4067_v4 = vld [vmem:[%s4562_s7 + $0xa0] sm:$0xff] }
 0x332   :  { %v1106_v44 = vmul.f32 %v2262_v17, %v1105_v34  ;;  %v1139_v61 = vmul.f32 %v2264_v35, %v1097_v39  ;;  %v1136_v43 = vsel %vm1133_vm9, %v1135_v54, %v1131_v12  ;;  %4696 = vst [vmem:[#allocation8_spill] sm:$0xff] %v4055_v8  ;;  %v4061_v34 = vld [vmem:[%s4562_s7 + $0xd8] sm:$0xff]  ;;  %v4073_v35 = vld [vmem:[%s4562_s7 + $0xa8] sm:$0xff]  ;;  %v4151_v28 = vld [vmem:[%s4562_s7 + $0x50] sm:$0xff] }
 0x333   :  { %4697 = vst [vmem:[#allocation9_spill] sm:$0xff] %v4061_v34  ;;  %v4085_v39 = vld [vmem:[%s4562_s7 + $0xb8] sm:$0xff]  ;;  %v4169_v12 = vld [vmem:[%s4562_s7 + $0x28] sm:$0xff]  ;;  %v4175_v54 = vld [vmem:[%s4562_s7 + $0x30] sm:$0xff] }
 0x334   :  { %v1107_v6 = vadd.f32 %v2262_v17, %v1106_v44  ;;  %4698 = vst [vmem:[#allocation10_spill] sm:$0xff] %v4067_v4  ;;  %v4091_v44 = vld [vmem:[%s4562_s7 + $0x80] sm:$0xff] }
 0x335   :  { %4699 = vst [vmem:[#allocation3_spill] sm:$0xff] %v4073_v35 }
 0x336   :  { %v1111_v21 = vsel %vm1110_vm4, %v2262_v17, %v1107_v6  ;;  %v4030_v17 = vld [vmem:[%s4562_s7 + $0xe8] sm:$0xff]  ;;  %4701 = vst [vmem:[#allocation12_spill] sm:$0xff] %v4085_v39  ;;  %v4115_v6 = vld [vmem:[%s4562_s7 + $0x60] sm:$0xff] }
 0x337   :  { %v1116_v9 = vsel %vm1113_vm5, %v1115_v42, %v1111_v21  ;;  %4702 = vst [vmem:[#allocation13_spill] sm:$0xff] %v4091_v44  ;;  %v4121_v42 = vld [vmem:[%s4562_s7 + $0x68] sm:$0xff]  ;;  %v4127_v21 = vld [vmem:[%s4562_s7 + $0x70] sm:$0xff] }
 0x338   :  { %v1138_v24 = vmul.f32 %v1116_v9, %v3746_v41  ;;  %v3948_v41 = vld [vmem:[%s4562_s7 + $0x160] sm:$0xff]  ;;  %4706 = vst [vmem:[#allocation7_spill] sm:$0xff] %v4115_v6  ;;  %v4133_v9 = vld [vmem:[%s4562_s7 + $0x78] sm:$0xff] }
 0x339   :  { %4707 = vst [vmem:[#allocation14_spill] sm:$0xff] %v4121_v42 }
 0x33a   :  { %v3926_v26 = vadd.f32 %v1139_v61, %v1138_v24  ;;  %v4103_v61 = vld [vmem:[%s4562_s7 + $0x90] sm:$0xff]  ;;  %4708 = vst [vmem:[#allocation40_spill] sm:$0xff] %v4127_v21  ;;  %v4145_v24 = vld [vmem:[%s4562_s7 + $0x48] sm:$0xff] }
 0x33b   :  { %4704 = vst [vmem:[#allocation5_spill] sm:$0xff] %v4103_v61 }
 0x33c   :  { %2265 = vtanh.f32 %v3926_v26  ;;  %4709 = vst [vmem:[#allocation41_spill] sm:$0xff] %v4133_v9 }
 0x33d   :  { %4711 = vst [vmem:[#allocation43_spill] sm:$0xff] %v4145_v24 }
 0x33e   :  { %4712 = vst [vmem:[#allocation44_spill] sm:$0xff] %v4151_v28 }
 0x33f   :  { %4715 = vst [vmem:[#allocation47_spill] sm:$0xff] %v4169_v12 }
 0x340   :  { %4716 = vst [vmem:[#allocation48_spill] sm:$0xff] %v4175_v54 }
 0x342   :  { %v2266_v40 = vpop.eup %2265 }
 0x343   :  { %v1142_v11 = vmul.f32 %v2266_v40, %v1136_v43  ;;  %v4181_v40 = vld [vmem:[%s4562_s7 + $0x38] sm:$0xff]  ;;  %v4187_v43 = vld [vmem:[%s4562_s7] sm:$0xff] }
 0x344   :  { %4717 = vst [vmem:[#allocation49_spill] sm:$0xff] %v4181_v40 }
 0x345   :  { %1163 = vmatmul.f32.vlgmr.msra.gmra.mxu1 %v1142_v11  ;;  %1183 = vmatmul.f32.vlgmr.msra.gmra.mxu2 %v1142_v11  ;;  %4718 = vst [vmem:[#allocation50_spill] sm:$0xff] %v4187_v43 }
 0x346   :  { %1203 = vmatmul.f32.vlgmr.msra.gmra.mxu3 %v1142_v11  ;;  %1223 = vmatmul.f32.vlgmr.msra.gmra.mxu0 %v1142_v11  ;;  %v4193_v11 = vld [vmem:[%s4562_s7 + $0x8] sm:$0xff] }
 0x347   :  { %1449 = vmatpush.msra.mxu1 %v3755_v51  ;;  %1469 = vmatpush.msra.mxu2 %v3761_v36  ;;  %4719 = vst [vmem:[#allocation51_spill] sm:$0xff] %v4193_v11 }
 0x348   :  { %1489 = vmatpush.msra.mxu3 %v3767_v18  ;;  %1509 = vmatpush.msra.mxu0 %v3773_v52 }
 0x349   :  { %1450 = vmatpush.msra.mxu1 %v3779_v38  ;;  %1470 = vmatpush.msra.mxu2 %v3785_v59 }
 0x34a   :  { %1490 = vmatpush.msra.mxu3 %v3791_v10  ;;  %1510 = vmatpush.msra.mxu0 %v3797_v50 }
 0x34b   :  { %1451 = vmatpush.msra.mxu1 %v3803_v55  ;;  %1471 = vmatpush.msra.mxu2 %v3809_v60 }
 0x34c   :  { %1491 = vmatpush.msra.mxu3 %v3815_v48  ;;  %1511 = vmatpush.msra.mxu0 %v3821_v62 }
 0x34d   :  { %1452 = vmatpush.msra.mxu1 %v3827_v47  ;;  %1472 = vmatpush.msra.mxu2 %v3833_v22 }
 0x34e   :  { %1492 = vmatpush.msra.mxu3 %v3839_v19  ;;  %1512 = vmatpush.msra.mxu0 %v3845_v30 }
 0x34f   :  { %1453 = vmatpush.msra.mxu1 %v3948_v41  ;;  %1473 = vmatpush.msra.mxu2 %v3954_v14 }
 0x350   :  { %1493 = vmatpush.msra.mxu3 %v3960_v58  ;;  %1513 = vmatpush.msra.mxu0 %v3854_v16 }
 0x351   :  { %1454 = vmatpush.msra.mxu1 %v3967_v20  ;;  %1474 = vmatpush.msra.mxu2 %v3973_v46 }
 0x352   :  { %1494 = vmatpush.msra.mxu3 %v3979_v0  ;;  %1514 = vmatpush.msra.mxu0 %v3863_v13 }
 0x353   :  { %1455 = vmatpush.msra.mxu1 %v3986_v1  ;;  %1475 = vmatpush.msra.mxu2 %v3992_v49 }
 0x354   :  { %1495 = vmatpush.msra.mxu3 %v3998_v15  ;;  %1515 = vmatpush.msra.mxu0 %v3872_v27 }
 0x355   :  { %1456 = vmatpush.msra.mxu1 %v4005_v7  ;;  %1476 = vmatpush.msra.mxu2 %v4011_v63 }
 0x356   :  { %1496 = vmatpush.msra.mxu3 %v4017_v53  ;;  %1516 = vmatpush.msra.mxu0 %v3881_v29 }
 0x357   :  { %1457 = vmatpush.msra.mxu1 %v4024_v31  ;;  %1477 = vmatpush.msra.mxu2 %v4030_v17 }
 0x358   :  { %1497 = vmatpush.msra.mxu3 %v4036_v56  ;;  %1517 = vmatpush.msra.mxu0 %v3890_v33 }
 0x359   :  { %1458 = vmatpush.msra.mxu1 %v4043_v25  ;;  %1478 = vmatpush.msra.mxu2 %v4049_v5 }
 0x35a   :  { %1498 = vmatpush.msra.mxu3 %v4055_v8  ;;  %1518 = vmatpush.msra.mxu0 %v4061_v34 }
 0x35b   :  { %1459 = vmatpush.msra.mxu1 %v4067_v4  ;;  %1479 = vmatpush.msra.mxu2 %v4073_v35 }
 0x35c   :  { %1499 = vmatpush.msra.mxu3 %v4079_v37  ;;  %1519 = vmatpush.msra.mxu0 %v4085_v39 }
 0x35d   :  { %1460 = vmatpush.msra.mxu1 %v4091_v44  ;;  %1480 = vmatpush.msra.mxu2 %v4097_v45 }
 0x35e   :  { %1500 = vmatpush.msra.mxu3 %v4103_v61  ;;  %1520 = vmatpush.msra.mxu0 %v4109_v2 }
 0x35f   :  { %1461 = vmatpush.msra.mxu1 %v4115_v6  ;;  %1481 = vmatpush.msra.mxu2 %v4121_v42 }
 0x360   :  { %1501 = vmatpush.msra.mxu3 %v4127_v21  ;;  %1521 = vmatpush.msra.mxu0 %v4133_v9  ;;  %v4724_v9 = vld [vmem:[#allocation17_spill] sm:$0xff] }
 0x361   :  { %1462 = vmatpush.msra.mxu1 %v4139_v23  ;;  %1482 = vmatpush.msra.mxu2 %v4145_v24 }
 0x362   :  { %1502 = vmatpush.msra.mxu3 %v4151_v28  ;;  %1522 = vmatpush.msra.mxu0 %v4157_v32  ;;  %v4723_v32 = vld [vmem:[#allocation16_spill] sm:$0xff] }
 0x363   :  { %1463 = vmatpush.msra.mxu1 %v4163_v57  ;;  %1483 = vmatpush.msra.mxu2 %v4169_v12 }
 0x364   :  { %1503 = vmatpush.msra.mxu3 %v4175_v54  ;;  %1523 = vmatpush.msra.mxu0 %v4181_v40  ;;  %v4205_v40 = vld [vmem:[%s4562_s7 + $0x18] sm:$0xff]  ;;  %v4722_v54 = vld [vmem:[#allocation15_spill] sm:$0xff] }
 0x365   :  { %1464 = vmatpush.msra.mxu1 %v4187_v43  ;;  %1484 = vmatpush.msra.mxu2 %v4193_v11  ;;  %4721 = vst [vmem:[#allocation53_spill] sm:$0xff] %v4205_v40 }
 0x366   :  { %1504 = vmatpush.msra.mxu3 %v4199_v3  ;;  %1524 = vmatpush.msra.mxu0 %v4205_v40 }
 0x3c2   :  { %v1164_v43 = vpop.f32.mrf.mxu1 }
 0x3c3   :  { %v1227_v12 = vadd.f32 %v1164_v43, %v4722_v54  ;;  %v1224_v57 = vpop.f32.mrf.mxu0 }
 0x3c4   :  { %v1230_v11 = vadd.f32 %v1224_v57, %v4723_v32  ;;  %v4725_v32 = vld [vmem:[#allocation18_spill] sm:$0xff] }
 0x3c5   :  { %v2166_v28 = vmul.f32 -1.442695, %v1227_v12 }
 0x3c6   :  { %v2168_v24 = vmul.f32 -1.442695, %v1230_v11 }
 0x3c7   :  { %2267 = vpow2.f32 %v2166_v28 }
 0x3c8   :  { %2269 = vpow2.f32 %v2168_v24  ;;  %v1184_v23 = vpop.f32.mrf.mxu2 }
 0x3c9   :  { %v1228_v3 = vadd.f32 %v1184_v23, %v4724_v9  ;;  %v1204_v45 = vpop.f32.mrf.mxu3 }
 0x3ca   :  { %v1229_v57 = vadd.f32 %v1204_v45, %v4725_v32 }
 0x3cb   :  { %v2167_v21 = vmul.f32 -1.442695, %v1228_v3 }
 0x3cd   :  { %v2268_v42 = vpop.eup %2267  ;;  %2271 = vpow2.f32 %v2167_v21 }
 0x3ce   :  { %v2270_v6 = vpop.eup %2269  ;;  %v1234_v2 = vadd.f32 1.0, %v2268_v42 }
 0x3cf   :  { %v1273_v40 = vadd.f32 1.0, %v2270_v6 }
 0x3d0   :  { %2273 = vrcp.f32 %v1234_v2  ;;  %v1246_v12 = vand.u32 2147483648, %v1234_v2  ;;  %v1244_v21 = vand.u32 2147483647, %v1234_v2  ;;  %vm1240_vm11 = vweird.f32 %v1234_v2 }
 0x3d1   :  { %2275 = vrcp.f32 %v1273_v40  ;;  %vm1279_vm3 = vweird.f32 %v1273_v40 }
 0x3d2   :  { %vm1245_vm13 = vcmp.eq.f32.partialorder %v1244_v21, 8.507059e+37 }
 0x3d3   :  { %v2272_v61 = vpop.eup %2271 }
 0x3d4   :  { %v1253_v54 = vadd.f32 1.0, %v2272_v61  ;;  %v1247_v61 = vor.u32 1.1754944e-38, %v1246_v12 }
 0x3d6   :  { %v2274_v43 = vpop.eup %2273  ;;  %2277 = vrcp.f32 %v1253_v54  ;;  %v1265_v45 = vand.u32 2147483648, %v1253_v54  ;;  %vm1259_vm15 = vweird.f32 %v1253_v54 }
 0x3d7   :  { %v1236_v28 = vmul.f32 %v2274_v43, %v1234_v2  ;;  %2279 = vtanh.f32 %v1229_v57  ;;  %v2276_v9 = vpop.eup %2275  ;;  %vm1241_vm10 = vweird.f32 %v2274_v43  ;;  %v1263_v57 = vand.u32 2147483647, %v1253_v54 }
 0x3d8   :  { %v1275_v6 = vmul.f32 %v2276_v9, %v1273_v40  ;;  %vm1242_vm12 = vmor %vm1240_vm11, %vm1241_vm10  ;;  %v1266_v34 = vor.u32 1.1754944e-38, %v1265_v45  ;;  %vm1280_vm2 = vweird.f32 %v2276_v9  ;;  %v4735_v45 = vld [vmem:[#allocation6_spill] sm:$0xff] }
 0x3d9   :  { %v1237_v24 = vsub.f32 1.0, %v1236_v28  ;;  %vm1264_vm1 = vcmp.eq.f32.partialorder %v1263_v57, 8.507059e+37  ;;  %vm1281_vm4 = vmor %vm1279_vm3, %vm1280_vm2  ;;  %v4738_v57 = vld [vmem:[#allocation40_spill] sm:$0xff] }
 0x3db   :  { %v1238_v3 = vmul.f32 %v2274_v43, %v1237_v24  ;;  %v1276_v24 = vsub.f32 1.0, %v1275_v6  ;;  %v4733_v6 = vld [vmem:[#allocation4_spill] sm:$0xff] }
 0x3dc   :  { %v2278_v23 = vpop.eup %2277 }
 0x3dd   :  { %v1255_v42 = vmul.f32 %v2278_v23, %v1253_v54  ;;  %v1239_v11 = vadd.f32 %v2274_v43, %v1238_v3  ;;  %v2280_v37 = vpop.eup %2279  ;;  %vm1260_vm14 = vweird.f32 %v2278_v23  ;;  %v1277_v8 = vmul.f32 %v2276_v9, %v1276_v24  ;;  %v4739_v24 = vld [vmem:[#allocation41_spill] sm:$0xff] }
 0x3de   :  { %vm1261_vm0 = vmor %vm1259_vm15, %vm1260_vm14 }
 0x3df   :  { %v1256_v44 = vsub.f32 1.0, %v1255_v42  ;;  %v1243_v39 = vsel %vm1242_vm12, %v2274_v43, %v1239_v11  ;;  %v1278_v21 = vadd.f32 %v2276_v9, %v1277_v8  ;;  %v4727_v8 = vld [vmem:[#allocation9_spill] sm:$0xff] }
 0x3e0   :  { %v1248_v32 = vsel %vm1245_vm13, %v1247_v61, %v1243_v39  ;;  %v1285_v39 = vand.u32 2147483648, %v1273_v40  ;;  %v4732_v11 = vld [vmem:[#allocation13_spill] sm:$0xff] }
 0x3e1   :  { %v1257_v28 = vmul.f32 %v2278_v23, %v1256_v44  ;;  %v1290_v35 = vmul.f32 %v2280_v37, %v1248_v32  ;;  %v1283_v37 = vand.u32 2147483647, %v1273_v40  ;;  %v1282_v44 = vsel %vm1281_vm4, %v2276_v9, %v1278_v21  ;;  %v4730_v40 = vld [vmem:[#allocation11_spill] sm:$0xff]  ;;  %v4731_v9 = vld [vmem:[#allocation12_spill] sm:$0xff]  ;;  %v4734_v61 = vld [vmem:[#allocation5_spill] sm:$0xff] }
 0x3e2   :  { %v1286_v54 = vor.u32 1.1754944e-38, %v1285_v39  ;;  %v4736_v32 = vld [vmem:[#allocation7_spill] sm:$0xff]  ;;  %v4743_v21 = vld [vmem:[#allocation45_spill] sm:$0xff]  ;;  %v4744_v39 = vld [vmem:[#allocation46_spill] sm:$0xff] }
 0x3e3   :  { %v1258_v4 = vadd.f32 %v2278_v23, %v1257_v28  ;;  %vm1284_vm5 = vcmp.eq.f32.partialorder %v1283_v37, 8.507059e+37  ;;  %v4737_v28 = vld [vmem:[#allocation14_spill] sm:$0xff]  ;;  %v4745_v37 = vld [vmem:[#allocation47_spill] sm:$0xff] }
 0x3e5   :  { %v1262_v3 = vsel %vm1261_vm0, %v2278_v23, %v1258_v4  ;;  %v1287_v4 = vsel %vm1284_vm5, %v1286_v54, %v1282_v44  ;;  %v4746_v44 = vld [vmem:[#allocation48_spill] sm:$0xff]  ;;  %v4747_v54 = vld [vmem:[#allocation49_spill] sm:$0xff] }
 0x3e6   :  { %v1267_v2 = vsel %vm1264_vm1, %v1266_v34, %v1262_v3  ;;  %v4728_v34 = vld [vmem:[#allocation10_spill] sm:$0xff] }
 0x3e7   :  { %v1289_v12 = vmul.f32 %v1267_v2, %v3926_v26  ;;  %v4726_v26 = vld [vmem:[#allocation8_spill] sm:$0xff]  ;;  %v4740_v3 = vld [vmem:[#allocation42_spill] sm:$0xff]  ;;  %v4741_v2 = vld [vmem:[#allocation43_spill] sm:$0xff] }
 0x3e9   :  { %v4213_v43 = vadd.f32 %v1290_v35, %v1289_v12  ;;  %v4729_v35 = vld [vmem:[#allocation3_spill] sm:$0xff]  ;;  %v4742_v12 = vld [vmem:[#allocation44_spill] sm:$0xff] }
 0x3eb   :  { %2281 = vtanh.f32 %v4213_v43 }
 0x3f1   :  { %v2282_v42 = vpop.eup %2281 }
 0x3f2   :  { %v1293_v23 = vmul.f32 %v2282_v42, %v1287_v4  ;;  %v4748_v42 = vld [vmem:[#allocation50_spill] sm:$0xff]  ;;  %v4749_v4 = vld [vmem:[#allocation51_spill] sm:$0xff] }
 0x3f4   :  { %1314 = vmatmul.f32.vlgmr.msrb.gmra.mxu1 %v1293_v23  ;;  %1334 = vmatmul.f32.vlgmr.msrb.gmra.mxu2 %v1293_v23 }
 0x3f5   :  { %1354 = vmatmul.f32.vlgmr.msrb.gmra.mxu3 %v1293_v23  ;;  %1374 = vmatmul.f32.vlgmr.msrb.gmra.mxu0 %v1293_v23  ;;  %v4750_v23 = vld [vmem:[#allocation52_spill] sm:$0xff] }
 0x3f6   :  { %1600 = vmatpush.msrb.mxu1 %v3755_v51  ;;  %1620 = vmatpush.msrb.mxu2 %v3761_v36 }
 0x3f7   :  { %1640 = vmatpush.msrb.mxu3 %v3767_v18  ;;  %1660 = vmatpush.msrb.mxu0 %v3773_v52 }
 0x3f8   :  { %1601 = vmatpush.msrb.mxu1 %v3779_v38  ;;  %1621 = vmatpush.msrb.mxu2 %v3785_v59 }
 0x3f9   :  { %1641 = vmatpush.msrb.mxu3 %v3791_v10  ;;  %1661 = vmatpush.msrb.mxu0 %v3797_v50 }
 0x3fa   :  { %1602 = vmatpush.msrb.mxu1 %v3803_v55  ;;  %1622 = vmatpush.msrb.mxu2 %v3809_v60 }
 0x3fb   :  { %1642 = vmatpush.msrb.mxu3 %v3815_v48  ;;  %1662 = vmatpush.msrb.mxu0 %v3821_v62 }
 0x3fc   :  { %1603 = vmatpush.msrb.mxu1 %v3827_v47  ;;  %1623 = vmatpush.msrb.mxu2 %v3833_v22 }
 0x3fd   :  { %1643 = vmatpush.msrb.mxu3 %v3839_v19  ;;  %1663 = vmatpush.msrb.mxu0 %v3845_v30 }
 0x3fe   :  { %1604 = vmatpush.msrb.mxu1 %v3948_v41  ;;  %1624 = vmatpush.msrb.mxu2 %v3954_v14 }
 0x3ff   :  { %1644 = vmatpush.msrb.mxu3 %v3960_v58  ;;  %1664 = vmatpush.msrb.mxu0 %v3854_v16 }
 0x400   :  { %1605 = vmatpush.msrb.mxu1 %v3967_v20  ;;  %1625 = vmatpush.msrb.mxu2 %v3973_v46 }
 0x401   :  { %1645 = vmatpush.msrb.mxu3 %v3979_v0  ;;  %1665 = vmatpush.msrb.mxu0 %v3863_v13 }
 0x402   :  { %1606 = vmatpush.msrb.mxu1 %v3986_v1  ;;  %1626 = vmatpush.msrb.mxu2 %v3992_v49 }
 0x403   :  { %1646 = vmatpush.msrb.mxu3 %v3998_v15  ;;  %1666 = vmatpush.msrb.mxu0 %v3872_v27 }
 0x404   :  { %1607 = vmatpush.msrb.mxu1 %v4005_v7  ;;  %1627 = vmatpush.msrb.mxu2 %v4011_v63 }
 0x405   :  { %1647 = vmatpush.msrb.mxu3 %v4017_v53  ;;  %1667 = vmatpush.msrb.mxu0 %v3881_v29 }
 0x406   :  { %1608 = vmatpush.msrb.mxu1 %v4024_v31  ;;  %1628 = vmatpush.msrb.mxu2 %v4030_v17 }
 0x407   :  { %1648 = vmatpush.msrb.mxu3 %v4036_v56  ;;  %1668 = vmatpush.msrb.mxu0 %v3890_v33 }
 0x408   :  { %1609 = vmatpush.msrb.mxu1 %v4043_v25  ;;  %1629 = vmatpush.msrb.mxu2 %v4049_v5 }
 0x409   :  { %1649 = vmatpush.msrb.mxu3 %v4726_v26  ;;  %1669 = vmatpush.msrb.mxu0 %v4727_v8 }
 0x40a   :  { %1610 = vmatpush.msrb.mxu1 %v4728_v34  ;;  %1630 = vmatpush.msrb.mxu2 %v4729_v35 }
 0x40b   :  { %1650 = vmatpush.msrb.mxu3 %v4730_v40  ;;  %1670 = vmatpush.msrb.mxu0 %v4731_v9 }
 0x40c   :  { %1611 = vmatpush.msrb.mxu1 %v4732_v11  ;;  %1631 = vmatpush.msrb.mxu2 %v4733_v6 }
 0x40d   :  { %1651 = vmatpush.msrb.mxu3 %v4734_v61  ;;  %1671 = vmatpush.msrb.mxu0 %v4735_v45 }
 0x40e   :  { %1612 = vmatpush.msrb.mxu1 %v4736_v32  ;;  %1632 = vmatpush.msrb.mxu2 %v4737_v28 }
 0x40f   :  { %1652 = vmatpush.msrb.mxu3 %v4738_v57  ;;  %1672 = vmatpush.msrb.mxu0 %v4739_v24  ;;  %v4753_v57 = vld [vmem:[#allocation20_spill] sm:$0xff] }
 0x410   :  { %1613 = vmatpush.msrb.mxu1 %v4740_v3  ;;  %1633 = vmatpush.msrb.mxu2 %v4741_v2  ;;  %v4751_v3 = vld [vmem:[#allocation53_spill] sm:$0xff] }
 0x411   :  { %1653 = vmatpush.msrb.mxu3 %v4742_v12  ;;  %1673 = vmatpush.msrb.mxu0 %v4743_v21  ;;  %v4752_v12 = vld [vmem:[#allocation19_spill] sm:$0xff] }
 0x412   :  { %1614 = vmatpush.msrb.mxu1 %v4744_v39  ;;  %1634 = vmatpush.msrb.mxu2 %v4745_v37 }
 0x413   :  { %1654 = vmatpush.msrb.mxu3 %v4746_v44  ;;  %1674 = vmatpush.msrb.mxu0 %v4747_v54  ;;  %v4754_v54 = vld [vmem:[#allocation21_spill] sm:$0xff] }
 0x414   :  { %1615 = vmatpush.msrb.mxu1 %v4748_v42  ;;  %1635 = vmatpush.msrb.mxu2 %v4749_v4 }
 0x415   :  { %1655 = vmatpush.msrb.mxu3 %v4750_v23  ;;  %1675 = vmatpush.msrb.mxu0 %v4751_v3 }
 0x471   :  { %v1315_v2 = vpop.f32.mrf.mxu1 }
 0x472   :  { %v1378_v24 = vadd.f32 %v1315_v2, %v4752_v12  ;;  %v1375_v21 = vpop.f32.mrf.mxu0 }
 0x473   :  { %v1381_v39 = vadd.f32 %v1375_v21, %v4753_v57  ;;  %v4755_v57 = vld [vmem:[#allocation22_spill] sm:$0xff] }
 0x474   :  { %v2169_v28 = vmul.f32 -1.442695, %v1378_v24 }
 0x475   :  { %v2171_v37 = vmul.f32 -1.442695, %v1381_v39 }
 0x476   :  { %2283 = vpow2.f32 %v2169_v28 }
 0x477   :  { %2285 = vpow2.f32 %v2171_v37  ;;  %v1335_v44 = vpop.f32.mrf.mxu2 }
 0x478   :  { %v1379_v32 = vadd.f32 %v1335_v44, %v4754_v54  ;;  %v1355_v6 = vpop.f32.mrf.mxu3 }
 0x479   :  { %v1380_v24 = vadd.f32 %v1355_v6, %v4755_v57 }
 0x47a   :  { %v2170_v42 = vmul.f32 -1.442695, %v1379_v32 }
 0x47c   :  { %v2284_v45 = vpop.eup %2283  ;;  %2287 = vpow2.f32 %v2170_v42 }
 0x47d   :  { %v2286_v4 = vpop.eup %2285  ;;  %v1385_v23 = vadd.f32 1.0, %v2284_v45 }
 0x47e   :  { %v1424_v3 = vadd.f32 1.0, %v2286_v4 }
 0x47f   :  { %2289 = vrcp.f32 %v1385_v23  ;;  %v1397_v39 = vand.u32 2147483648, %v1385_v23  ;;  %v1395_v44 = vand.u32 2147483647, %v1385_v23  ;;  %vm1391_vm7 = vweird.f32 %v1385_v23 }
 0x480   :  { %2291 = vrcp.f32 %v1424_v3  ;;  %vm1430_vm15 = vweird.f32 %v1424_v3 }
 0x481   :  { %vm1396_vm9 = vcmp.eq.f32.partialorder %v1395_v44, 8.507059e+37 }
 0x482   :  { %v2288_v61 = vpop.eup %2287 }
 0x483   :  { %v1404_v2 = vadd.f32 1.0, %v2288_v61  ;;  %v1398_v61 = vor.u32 1.1754944e-38, %v1397_v39 }
 0x485   :  { %v2290_v12 = vpop.eup %2289  ;;  %2293 = vrcp.f32 %v1404_v2  ;;  %v1416_v6 = vand.u32 2147483648, %v1404_v2  ;;  %vm1410_vm11 = vweird.f32 %v1404_v2 }
 0x486   :  { %v1387_v28 = vmul.f32 %v2290_v12, %v1385_v23  ;;  %2295 = vtanh.f32 %v1380_v24  ;;  %v2292_v37 = vpop.eup %2291  ;;  %vm1392_vm6 = vweird.f32 %v2290_v12  ;;  %v1414_v24 = vand.u32 2147483647, %v1404_v2 }
 0x487   :  { %v1426_v4 = vmul.f32 %v2292_v37, %v1424_v3  ;;  %vm1393_vm8 = vmor %vm1391_vm7, %vm1392_vm6  ;;  %v1417_v8 = vor.u32 1.1754944e-38, %v1416_v6  ;;  %vm1431_vm14 = vweird.f32 %v2292_v37  ;;  %v4783_v6 = vld [vmem:[#allocation24_spill] sm:$0xff] }
 0x488   :  { %v1388_v21 = vsub.f32 1.0, %v1387_v28  ;;  %vm1415_vm13 = vcmp.eq.f32.partialorder %v1414_v24, 8.507059e+37  ;;  %vm1432_vm0 = vmor %vm1430_vm15, %vm1431_vm14 }
 0x48a   :  { %v1389_v32 = vmul.f32 %v2290_v12, %v1388_v21  ;;  %v1427_v21 = vsub.f32 1.0, %v1426_v4 }
 0x48b   :  { %v2294_v54 = vpop.eup %2293 }
 0x48c   :  { %v1406_v45 = vmul.f32 %v2294_v54, %v1404_v2  ;;  %v1390_v42 = vadd.f32 %v2290_v12, %v1389_v32  ;;  %v2296_v40 = vpop.eup %2295  ;;  %vm1411_vm10 = vweird.f32 %v2294_v54  ;;  %v1428_v26 = vmul.f32 %v2292_v37, %v1427_v21 }
 0x48d   :  { %vm1412_vm12 = vmor %vm1410_vm11, %vm1411_vm10 }
 0x48e   :  { %v1407_v11 = vsub.f32 1.0, %v1406_v45  ;;  %v1394_v9 = vsel %vm1393_vm8, %v2290_v12, %v1390_v42  ;;  %v1429_v44 = vadd.f32 %v2292_v37, %v1428_v26  ;;  %v4778_v26 = vld [vmem:[#allocation50_spill] sm:$0xff]  ;;  %v4782_v42 = vld [vmem:[#allocation23_spill] sm:$0xff] }
 0x48f   :  { %v1399_v57 = vsel %vm1396_vm9, %v1398_v61, %v1394_v9  ;;  %v1436_v9 = vand.u32 2147483648, %v1424_v3 }
 0x490   :  { %v1408_v28 = vmul.f32 %v2294_v54, %v1407_v11  ;;  %v1441_v35 = vmul.f32 %v2296_v40, %v1399_v57  ;;  %v1434_v40 = vand.u32 2147483647, %v1424_v3  ;;  %v1433_v11 = vsel %vm1432_vm0, %v2292_v37, %v1429_v44  ;;  %v4781_v3 = vld [vmem:[#allocation53_spill] sm:$0xff] }
 0x491   :  { %v1437_v2 = vor.u32 1.1754944e-38, %v1436_v9 }
 0x492   :  { %v1409_v34 = vadd.f32 %v2294_v54, %v1408_v28  ;;  %vm1435_vm1 = vcmp.eq.f32.partialorder %v1434_v40, 8.507059e+37 }
 0x494   :  { %v1413_v32 = vsel %vm1412_vm12, %v2294_v54, %v1409_v34  ;;  %v1438_v34 = vsel %vm1435_vm1, %v1437_v2, %v1433_v11 }
 0x495   :  { %v1418_v23 = vsel %vm1415_vm13, %v1417_v8, %v1413_v32  ;;  %v4779_v8 = vld [vmem:[#allocation51_spill] sm:$0xff]  ;;  %v4784_v32 = vld [vmem:[#allocation25_spill] sm:$0xff] }
 0x496   :  { %v1440_v39 = vmul.f32 %v1418_v23, %v4213_v43  ;;  %v4777_v43 = vld [vmem:[#allocation49_spill] sm:$0xff] }
 0x498   :  { %v4285_v12 = vadd.f32 %v1441_v35, %v1440_v39  ;;  %v4780_v35 = vld [vmem:[#allocation52_spill] sm:$0xff] }
 0x49a   :  { %2297 = vtanh.f32 %v4285_v12 }
 0x4a0   :  { %v2298_v45 = vpop.eup %2297 }
 0x4a1   :  { %v1444_v54 = vmul.f32 %v2298_v45, %v1438_v34 }
 0x4a3   :  { %1465 = vmatmul.f32.vlgmr.msra.gmra.mxu1 %v1444_v54  ;;  %1485 = vmatmul.f32.vlgmr.msra.gmra.mxu2 %v1444_v54 }
 0x4a4   :  { %1505 = vmatmul.f32.vlgmr.msra.gmra.mxu3 %v1444_v54  ;;  %1525 = vmatmul.f32.vlgmr.msra.gmra.mxu0 %v1444_v54 }
 0x4a5   :  { %1751 = vmatpush.msra.mxu1 %v3755_v51  ;;  %1771 = vmatpush.msra.mxu2 %v3761_v36  ;;  %v4756_v51 = vld [vmem:[#allocation8_spill] sm:$0xff]  ;;  %v4757_v36 = vld [vmem:[#allocation9_spill] sm:$0xff] }
 0x4a6   :  { %1791 = vmatpush.msra.mxu3 %v3767_v18  ;;  %1811 = vmatpush.msra.mxu0 %v3773_v52  ;;  %v4758_v18 = vld [vmem:[#allocation10_spill] sm:$0xff]  ;;  %v4759_v52 = vld [vmem:[#allocation3_spill] sm:$0xff] }
 0x4a7   :  { %1752 = vmatpush.msra.mxu1 %v3779_v38  ;;  %1772 = vmatpush.msra.mxu2 %v3785_v59  ;;  %v4760_v38 = vld [vmem:[#allocation11_spill] sm:$0xff]  ;;  %v4761_v59 = vld [vmem:[#allocation12_spill] sm:$0xff] }
 0x4a8   :  { %1792 = vmatpush.msra.mxu3 %v3791_v10  ;;  %1812 = vmatpush.msra.mxu0 %v3797_v50  ;;  %v4762_v10 = vld [vmem:[#allocation13_spill] sm:$0xff]  ;;  %v4763_v50 = vld [vmem:[#allocation4_spill] sm:$0xff] }
 0x4a9   :  { %1753 = vmatpush.msra.mxu1 %v3803_v55  ;;  %1773 = vmatpush.msra.mxu2 %v3809_v60  ;;  %v4764_v55 = vld [vmem:[#allocation5_spill] sm:$0xff]  ;;  %v4765_v60 = vld [vmem:[#allocation6_spill] sm:$0xff] }
 0x4aa   :  { %1793 = vmatpush.msra.mxu3 %v3815_v48  ;;  %1813 = vmatpush.msra.mxu0 %v3821_v62  ;;  %v4766_v48 = vld [vmem:[#allocation7_spill] sm:$0xff]  ;;  %v4767_v62 = vld [vmem:[#allocation14_spill] sm:$0xff] }
 0x4ab   :  { %1754 = vmatpush.msra.mxu1 %v3827_v47  ;;  %1774 = vmatpush.msra.mxu2 %v3833_v22  ;;  %v4768_v47 = vld [vmem:[#allocation40_spill] sm:$0xff]  ;;  %v4769_v22 = vld [vmem:[#allocation41_spill] sm:$0xff] }
 0x4ac   :  { %1794 = vmatpush.msra.mxu3 %v3839_v19  ;;  %1814 = vmatpush.msra.mxu0 %v3845_v30  ;;  %v4770_v19 = vld [vmem:[#allocation42_spill] sm:$0xff]  ;;  %v4771_v30 = vld [vmem:[#allocation43_spill] sm:$0xff] }
 0x4ad   :  { %1755 = vmatpush.msra.mxu1 %v3948_v41  ;;  %1775 = vmatpush.msra.mxu2 %v3954_v14 }
 0x4ae   :  { %1795 = vmatpush.msra.mxu3 %v3960_v58  ;;  %1815 = vmatpush.msra.mxu0 %v3854_v16  ;;  %v4772_v16 = vld [vmem:[#allocation44_spill] sm:$0xff] }
 0x4af   :  { %1756 = vmatpush.msra.mxu1 %v3967_v20  ;;  %1776 = vmatpush.msra.mxu2 %v3973_v46 }
 0x4b0   :  { %1796 = vmatpush.msra.mxu3 %v3979_v0  ;;  %1816 = vmatpush.msra.mxu0 %v3863_v13  ;;  %v4773_v13 = vld [vmem:[#allocation45_spill] sm:$0xff] }
 0x4b1   :  { %1757 = vmatpush.msra.mxu1 %v3986_v1  ;;  %1777 = vmatpush.msra.mxu2 %v3992_v49 }
 0x4b2   :  { %1797 = vmatpush.msra.mxu3 %v3998_v15  ;;  %1817 = vmatpush.msra.mxu0 %v3872_v27  ;;  %v4774_v27 = vld [vmem:[#allocation46_spill] sm:$0xff] }
 0x4b3   :  { %1758 = vmatpush.msra.mxu1 %v4005_v7  ;;  %1778 = vmatpush.msra.mxu2 %v4011_v63 }
 0x4b4   :  { %1798 = vmatpush.msra.mxu3 %v4017_v53  ;;  %1818 = vmatpush.msra.mxu0 %v3881_v29  ;;  %v4775_v29 = vld [vmem:[#allocation47_spill] sm:$0xff] }
 0x4b5   :  { %1759 = vmatpush.msra.mxu1 %v4024_v31  ;;  %1779 = vmatpush.msra.mxu2 %v4030_v17 }
 0x4b6   :  { %1799 = vmatpush.msra.mxu3 %v4036_v56  ;;  %1819 = vmatpush.msra.mxu0 %v3890_v33  ;;  %v4776_v33 = vld [vmem:[#allocation48_spill] sm:$0xff] }
 0x4b7   :  { %1760 = vmatpush.msra.mxu1 %v4043_v25  ;;  %1780 = vmatpush.msra.mxu2 %v4049_v5 }
 0x4b8   :  { %1800 = vmatpush.msra.mxu3 %v4756_v51  ;;  %1820 = vmatpush.msra.mxu0 %v4757_v36 }
 0x4b9   :  { %1761 = vmatpush.msra.mxu1 %v4758_v18  ;;  %1781 = vmatpush.msra.mxu2 %v4759_v52 }
 0x4ba   :  { %1801 = vmatpush.msra.mxu3 %v4760_v38  ;;  %1821 = vmatpush.msra.mxu0 %v4761_v59 }
 0x4bb   :  { %1762 = vmatpush.msra.mxu1 %v4762_v10  ;;  %1782 = vmatpush.msra.mxu2 %v4763_v50 }
 0x4bc   :  { %1802 = vmatpush.msra.mxu3 %v4764_v55  ;;  %1822 = vmatpush.msra.mxu0 %v4765_v60 }
 0x4bd   :  { %1763 = vmatpush.msra.mxu1 %v4766_v48  ;;  %1783 = vmatpush.msra.mxu2 %v4767_v62 }
 0x4be   :  { %1803 = vmatpush.msra.mxu3 %v4768_v47  ;;  %1823 = vmatpush.msra.mxu0 %v4769_v22 }
 0x4bf   :  { %1764 = vmatpush.msra.mxu1 %v4770_v19  ;;  %1784 = vmatpush.msra.mxu2 %v4771_v30 }
 0x4c0   :  { %1804 = vmatpush.msra.mxu3 %v4772_v16  ;;  %1824 = vmatpush.msra.mxu0 %v4773_v13 }
 0x4c1   :  { %1765 = vmatpush.msra.mxu1 %v4774_v27  ;;  %1785 = vmatpush.msra.mxu2 %v4775_v29 }
 0x4c2   :  { %1805 = vmatpush.msra.mxu3 %v4776_v33  ;;  %1825 = vmatpush.msra.mxu0 %v4777_v43 }
 0x4c3   :  { %1766 = vmatpush.msra.mxu1 %v4778_v26  ;;  %1786 = vmatpush.msra.mxu2 %v4779_v8 }
 0x4c4   :  { %1806 = vmatpush.msra.mxu3 %v4780_v35  ;;  %1826 = vmatpush.msra.mxu0 %v4781_v3 }
 0x520   :  { %v1466_v37 = vpop.f32.mrf.mxu1 }
 0x521   :  { %v1529_v4 = vadd.f32 %v1466_v37, %v4782_v42  ;;  %v1526_v61 = vpop.f32.mrf.mxu0  ;;  %v4785_v37 = vld [vmem:[#allocation26_spill] sm:$0xff] }
 0x522   :  { %v1532_v57 = vadd.f32 %v1526_v61, %v4783_v6 }
 0x523   :  { %v2172_v28 = vmul.f32 -1.442695, %v1529_v4 }
 0x524   :  { %v2174_v24 = vmul.f32 -1.442695, %v1532_v57 }
 0x525   :  { %2299 = vpow2.f32 %v2172_v28 }
 0x526   :  { %2301 = vpow2.f32 %v2174_v24  ;;  %v1486_v21 = vpop.f32.mrf.mxu2 }
 0x527   :  { %v1530_v23 = vadd.f32 %v1486_v21, %v4784_v32  ;;  %v1506_v45 = vpop.f32.mrf.mxu3 }
 0x528   :  { %v1531_v42 = vadd.f32 %v1506_v45, %v4785_v37 }
 0x529   :  { %v2173_v39 = vmul.f32 -1.442695, %v1530_v23 }
 0x52b   :  { %v2300_v44 = vpop.eup %2299  ;;  %2303 = vpow2.f32 %v2173_v39 }
 0x52c   :  { %v2302_v9 = vpop.eup %2301  ;;  %v1536_v40 = vadd.f32 1.0, %v2300_v44 }
 0x52d   :  { %v1575_v11 = vadd.f32 1.0, %v2302_v9 }
 0x52e   :  { %2305 = vrcp.f32 %v1536_v40  ;;  %v1548_v6 = vand.u32 2147483648, %v1536_v40  ;;  %v1546_v24 = vand.u32 2147483647, %v1536_v40  ;;  %vm1542_vm3 = vweird.f32 %v1536_v40 }
 0x52f   :  { %2307 = vrcp.f32 %v1575_v11  ;;  %vm1581_vm11 = vweird.f32 %v1575_v11 }
 0x530   :  { %v1549_v44 = vor.u32 1.1754944e-38, %v1548_v6  ;;  %vm1547_vm5 = vcmp.eq.f32.partialorder %v1546_v24, 8.507059e+37 }
 0x531   :  { %v2304_v2 = vpop.eup %2303 }
 0x532   :  { %v1555_v34 = vadd.f32 1.0, %v2304_v2 }
 0x534   :  { %v2306_v54 = vpop.eup %2305  ;;  %2309 = vrcp.f32 %v1555_v34  ;;  %v1567_v45 = vand.u32 2147483648, %v1555_v34  ;;  %vm1561_vm7 = vweird.f32 %v1555_v34 }
 0x535   :  { %v1538_v4 = vmul.f32 %v2306_v54, %v1536_v40  ;;  %2311 = vtanh.f32 %v1531_v42  ;;  %v2308_v57 = vpop.eup %2307  ;;  %vm1543_vm2 = vweird.f32 %v2306_v54  ;;  %v1565_v42 = vand.u32 2147483647, %v1555_v34 }
 0x536   :  { %v1577_v39 = vmul.f32 %v2308_v57, %v1575_v11  ;;  %vm1544_vm4 = vmor %vm1542_vm3, %vm1543_vm2  ;;  %v1568_v26 = vor.u32 1.1754944e-38, %v1567_v45  ;;  %vm1582_vm10 = vweird.f32 %v2308_v57  ;;  %v2438_v45 = vld [vmem:[%s4562_s7 + $0x1a8] sm:$0xff] }
 0x537   :  { %v1539_v61 = vsub.f32 1.0, %v1538_v4  ;;  %vm1566_vm9 = vcmp.eq.f32.partialorder %v1565_v42, 8.507059e+37  ;;  %vm1583_vm12 = vmor %vm1581_vm11, %vm1582_vm10  ;;  %v2441_v42 = vld [vmem:[%s4562_s7 + $0x180] sm:$0xff] }
 0x539   :  { %v1540_v28 = vmul.f32 %v2306_v54, %v1539_v61  ;;  %v1578_v61 = vsub.f32 1.0, %v1577_v39 }
 0x53a   :  { %v2310_v21 = vpop.eup %2309 }
 0x53b   :  { %v1557_v32 = vmul.f32 %v2310_v21, %v1555_v34  ;;  %v1541_v23 = vadd.f32 %v2306_v54, %v1540_v28  ;;  %v2312_v3 = vpop.eup %2311  ;;  %vm1562_vm6 = vweird.f32 %v2310_v21  ;;  %v1579_v43 = vmul.f32 %v2308_v57, %v1578_v61  ;;  %v2442_v61 = vld [vmem:[%s4562_s7 + $0x188] sm:$0xff] }
 0x53c   :  { %vm1563_vm8 = vmor %vm1561_vm7, %vm1562_vm6 }
 0x53d   :  { %v1558_v9 = vsub.f32 1.0, %v1557_v32  ;;  %v1545_v2 = vsel %vm1544_vm4, %v2306_v54, %v1541_v23  ;;  %v1580_v24 = vadd.f32 %v2308_v57, %v1579_v43  ;;  %v1587_v32 = vand.u32 2147483648, %v1575_v11  ;;  %v2430_v43 = vld [vmem:[%s4562_s7 + $0x1e8] sm:$0xff] }
 0x53e   :  { %v1550_v37 = vsel %vm1547_vm5, %v1549_v44, %v1545_v2  ;;  %v2435_v44 = vld [vmem:[%s4562_s7 + $0x1d0] sm:$0xff]  ;;  %v2437_v2 = vld [vmem:[%s4562_s7 + $0x1a0] sm:$0xff] }
 0x53f   :  { %v1559_v4 = vmul.f32 %v2310_v21, %v1558_v9  ;;  %v1592_v35 = vmul.f32 %v2312_v3, %v1550_v37  ;;  %v1585_v3 = vand.u32 2147483647, %v1575_v11  ;;  %v1584_v34 = vsel %vm1583_vm12, %v2308_v57, %v1580_v24  ;;  %v2433_v11 = vld [vmem:[%s4562_s7 + $0x1c0] sm:$0xff]  ;;  %v2434_v57 = vld [vmem:[%s4562_s7 + $0x1c8] sm:$0xff]  ;;  %v2436_v9 = vld [vmem:[%s4562_s7 + $0x1d8] sm:$0xff] }
 0x540   :  { %v1588_v23 = vor.u32 1.1754944e-38, %v1587_v32  ;;  %v2439_v37 = vld [vmem:[%s4562_s7 + $0x1b0] sm:$0xff]  ;;  %v2446_v24 = vld [vmem:[%s4562_s7 + $0x158] sm:$0xff] }
 0x541   :  { %v1560_v8 = vadd.f32 %v2310_v21, %v1559_v4  ;;  %vm1586_vm13 = vcmp.eq.f32.partialorder %v1585_v3, 8.507059e+37  ;;  %v2440_v4 = vld [vmem:[%s4562_s7 + $0x1b8] sm:$0xff] }
 0x543   :  { %v1564_v28 = vsel %vm1563_vm8, %v2310_v21, %v1560_v8  ;;  %v1589_v8 = vsel %vm1586_vm13, %v1588_v23, %v1584_v34 }
 0x544   :  { %v1569_v40 = vsel %vm1566_vm9, %v1568_v26, %v1564_v28  ;;  %v2431_v26 = vld [vmem:[%s4562_s7 + $0x1f0] sm:$0xff] }
 0x545   :  { %v1591_v6 = vmul.f32 %v1569_v40, %v4285_v12  ;;  %v2429_v12 = vld [vmem:[%s4562_s7 + $0x1e0] sm:$0xff]  ;;  %v2443_v28 = vld [vmem:[%s4562_s7 + $0x190] sm:$0xff]  ;;  %v2444_v40 = vld [vmem:[%s4562_s7 + $0x198] sm:$0xff] }
 0x547   :  { %v4357_v54 = vadd.f32 %v1592_v35, %v1591_v6  ;;  %v2432_v35 = vld [vmem:[%s4562_s7 + $0x1f8] sm:$0xff] }
 0x548   :  { %v2445_v6 = vld [vmem:[%s4562_s7 + $0x178] sm:$0xff] }
 0x549   :  { %2313 = vtanh.f32 %v4357_v54 }
 0x54f   :  { %v2314_v39 = vpop.eup %2313 }
 0x550   :  { %v1595_v21 = vmul.f32 %v2314_v39, %v1589_v8 }
 0x552   :  { %1616 = vmatmul.f32.vlgmr.msrb.gmra.mxu1 %v1595_v21  ;;  %1636 = vmatmul.f32.vlgmr.msrb.gmra.mxu2 %v1595_v21 }
 0x553   :  { %1656 = vmatmul.f32.vlgmr.msrb.gmra.mxu3 %v1595_v21  ;;  %1676 = vmatmul.f32.vlgmr.msrb.gmra.mxu0 %v1595_v21 }
 0x554   :  { %1902 = vmatpush.msrb.mxu1 %v2429_v12  ;;  %1922 = vmatpush.msrb.mxu2 %v2430_v43 }
 0x555   :  { %1942 = vmatpush.msrb.mxu3 %v2431_v26  ;;  %1962 = vmatpush.msrb.mxu0 %v2432_v35 }
 0x556   :  { %1903 = vmatpush.msrb.mxu1 %v2433_v11  ;;  %1923 = vmatpush.msrb.mxu2 %v2434_v57 }
 0x557   :  { %1943 = vmatpush.msrb.mxu3 %v2435_v44  ;;  %1963 = vmatpush.msrb.mxu0 %v2436_v9 }
 0x558   :  { %1904 = vmatpush.msrb.mxu1 %v2437_v2  ;;  %1924 = vmatpush.msrb.mxu2 %v2438_v45 }
 0x559   :  { %1944 = vmatpush.msrb.mxu3 %v2439_v37  ;;  %1964 = vmatpush.msrb.mxu0 %v2440_v4 }
 0x55a   :  { %1905 = vmatpush.msrb.mxu1 %v2441_v42  ;;  %1925 = vmatpush.msrb.mxu2 %v2442_v61 }
 0x55b   :  { %1945 = vmatpush.msrb.mxu3 %v2443_v28  ;;  %1965 = vmatpush.msrb.mxu0 %v2444_v40 }
 0x55c   :  { %1906 = vmatpush.msrb.mxu1 %v3948_v41  ;;  %1926 = vmatpush.msrb.mxu2 %v3954_v14  ;;  %v2447_v41 = vld [vmem:[%s4562_s7 + $0x138] sm:$0xff] }
 0x55d   :  { %1946 = vmatpush.msrb.mxu3 %v3960_v58  ;;  %1966 = vmatpush.msrb.mxu0 %v2445_v6  ;;  %v2448_v14 = vld [vmem:[%s4562_s7 + $0x118] sm:$0xff] }
 0x55e   :  { %1907 = vmatpush.msrb.mxu1 %v3967_v20  ;;  %1927 = vmatpush.msrb.mxu2 %v3973_v46  ;;  %v2449_v58 = vld [vmem:[%s4562_s7 + $0xf8] sm:$0xff]  ;;  %v4786_v20 = vld [vmem:[#allocation49_spill] sm:$0xff] }
 0x55f   :  { %1947 = vmatpush.msrb.mxu3 %v3979_v0  ;;  %1967 = vmatpush.msrb.mxu0 %v2446_v24  ;;  %v4787_v46 = vld [vmem:[#allocation50_spill] sm:$0xff]  ;;  %v4788_v0 = vld [vmem:[#allocation51_spill] sm:$0xff] }
 0x560   :  { %1908 = vmatpush.msrb.mxu1 %v3986_v1  ;;  %1928 = vmatpush.msrb.mxu2 %v3992_v49  ;;  %v4789_v1 = vld [vmem:[#allocation52_spill] sm:$0xff]  ;;  %v4790_v49 = vld [vmem:[#allocation53_spill] sm:$0xff] }
 0x561   :  { %1948 = vmatpush.msrb.mxu3 %v3998_v15  ;;  %1968 = vmatpush.msrb.mxu0 %v2447_v41 }
 0x562   :  { %1909 = vmatpush.msrb.mxu1 %v4005_v7  ;;  %1929 = vmatpush.msrb.mxu2 %v4011_v63  ;;  %v4791_v7 = vld [vmem:[#allocation27_spill] sm:$0xff] }
 0x563   :  { %1949 = vmatpush.msrb.mxu3 %v4017_v53  ;;  %1969 = vmatpush.msrb.mxu0 %v2448_v14 }
 0x564   :  { %1910 = vmatpush.msrb.mxu1 %v4024_v31  ;;  %1930 = vmatpush.msrb.mxu2 %v4030_v17  ;;  %v4792_v31 = vld [vmem:[#allocation28_spill] sm:$0xff] }
 0x565   :  { %1950 = vmatpush.msrb.mxu3 %v4036_v56  ;;  %1970 = vmatpush.msrb.mxu0 %v2449_v58  ;;  %v4795_v58 = vld [vmem:[#allocation31_spill] sm:$0xff] }
 0x566   :  { %1911 = vmatpush.msrb.mxu1 %v4043_v25  ;;  %1931 = vmatpush.msrb.mxu2 %v4049_v5 }
 0x567   :  { %1951 = vmatpush.msrb.mxu3 %v4756_v51  ;;  %1971 = vmatpush.msrb.mxu0 %v4757_v36  ;;  %v4793_v51 = vld [vmem:[#allocation29_spill] sm:$0xff] }
 0x568   :  { %1912 = vmatpush.msrb.mxu1 %v4758_v18  ;;  %1932 = vmatpush.msrb.mxu2 %v4759_v52 }
 0x569   :  { %1952 = vmatpush.msrb.mxu3 %v4760_v38  ;;  %1972 = vmatpush.msrb.mxu0 %v4761_v59 }
 0x56a   :  { %1913 = vmatpush.msrb.mxu1 %v4762_v10  ;;  %1933 = vmatpush.msrb.mxu2 %v4763_v50 }
 0x56b   :  { %1953 = vmatpush.msrb.mxu3 %v4764_v55  ;;  %1973 = vmatpush.msrb.mxu0 %v4765_v60 }
 0x56c   :  { %1914 = vmatpush.msrb.mxu1 %v4766_v48  ;;  %1934 = vmatpush.msrb.mxu2 %v4767_v62  ;;  %v4794_v62 = vld [vmem:[#allocation30_spill] sm:$0xff] }
 0x56d   :  { %1954 = vmatpush.msrb.mxu3 %v4768_v47  ;;  %1974 = vmatpush.msrb.mxu0 %v4769_v22 }
 0x56e   :  { %1915 = vmatpush.msrb.mxu1 %v4770_v19  ;;  %1935 = vmatpush.msrb.mxu2 %v4771_v30 }
 0x56f   :  { %1955 = vmatpush.msrb.mxu3 %v4772_v16  ;;  %1975 = vmatpush.msrb.mxu0 %v4773_v13 }
 0x570   :  { %1916 = vmatpush.msrb.mxu1 %v4774_v27  ;;  %1936 = vmatpush.msrb.mxu2 %v4775_v29 }
 0x571   :  { %1956 = vmatpush.msrb.mxu3 %v4776_v33  ;;  %1976 = vmatpush.msrb.mxu0 %v4786_v20 }
 0x572   :  { %1917 = vmatpush.msrb.mxu1 %v4787_v46  ;;  %1937 = vmatpush.msrb.mxu2 %v4788_v0  ;;  %v4796_v0 = vld [vmem:[#allocation32_spill] sm:$0xff] }
 0x573   :  { %1957 = vmatpush.msrb.mxu3 %v4789_v1  ;;  %1977 = vmatpush.msrb.mxu0 %v4790_v49 }
 0x5cf   :  { %v1617_v15 = vpop.f32.mrf.mxu1 }
 0x5d0   :  { %v1680_v63 = vadd.f32 %v1617_v15, %v4791_v7  ;;  %v1677_v53 = vpop.f32.mrf.mxu0 }
 0x5d1   :  { %v1683_v17 = vadd.f32 %v1677_v53, %v4792_v31 }
 0x5d2   :  { %v2175_v56 = vmul.f32 -1.442695, %v1680_v63  ;;  %v4797_v63 = vld [vmem:[#allocation33_spill] sm:$0xff] }
 0x5d3   :  { %v2177_v25 = vmul.f32 -1.442695, %v1683_v17 }
 0x5d4   :  { %2315 = vpow2.f32 %v2175_v56 }
 0x5d5   :  { %2317 = vpow2.f32 %v2177_v25  ;;  %v1637_v5 = vpop.f32.mrf.mxu2 }
 0x5d6   :  { %v1681_v36 = vadd.f32 %v1637_v5, %v4793_v51  ;;  %v1657_v55 = vpop.f32.mrf.mxu3 }
 0x5d7   :  { %v1682_v47 = vadd.f32 %v1657_v55, %v4794_v62 }
 0x5d8   :  { %v2176_v18 = vmul.f32 -1.442695, %v1681_v36 }
 0x5da   :  { %v2316_v52 = vpop.eup %2315  ;;  %2319 = vpow2.f32 %v2176_v18 }
 0x5db   :  { %v2318_v38 = vpop.eup %2317  ;;  %v1687_v59 = vadd.f32 1.0, %v2316_v52 }
 0x5dc   :  { %v1726_v10 = vadd.f32 1.0, %v2318_v38  ;;  %v4798_v38 = vld [vmem:[#allocation34_spill] sm:$0xff] }
 0x5dd   :  { %2321 = vrcp.f32 %v1687_v59  ;;  %v1699_v30 = vand.u32 2147483648, %v1687_v59  ;;  %v1697_v27 = vand.u32 2147483647, %v1687_v59  ;;  %vm1693_vm15 = vweird.f32 %v1687_v59 }
 0x5de   :  { %2323 = vrcp.f32 %v1726_v10  ;;  %v1738_v61 = vand.u32 2147483648, %v1726_v10  ;;  %vm1732_vm7 = vweird.f32 %v1726_v10  ;;  %v1736_v28 = vand.u32 2147483647, %v1726_v10 }
 0x5df   :  { %v1700_v34 = vor.u32 1.1754944e-38, %v1699_v30  ;;  %vm1698_vm1 = vcmp.eq.f32.partialorder %v1697_v27, 8.507059e+37 }
 0x5e0   :  { %v2320_v50 = vpop.eup %2319  ;;  %v1739_v6 = vor.u32 1.1754944e-38, %v1738_v61  ;;  %vm1737_vm9 = vcmp.eq.f32.partialorder %v1736_v28, 8.507059e+37  ;;  %v2067_v28 = vld [vmem:[%s4566_s11 + $0x70] sm:$0xff] }
 0x5e1   :  { %v1706_v60 = vadd.f32 1.0, %v2320_v50 }
 0x5e3   :  { %v2322_v48 = vpop.eup %2321  ;;  %2325 = vrcp.f32 %v1706_v60  ;;  %v1718_v21 = vand.u32 2147483648, %v1706_v60  ;;  %v1716_v26 = vand.u32 2147483647, %v1706_v60  ;;  %vm1712_vm3 = vweird.f32 %v1706_v60 }
 0x5e4   :  { %v1689_v22 = vmul.f32 %v2322_v48, %v1687_v59  ;;  %2327 = vtanh.f32 %v1682_v47  ;;  %v2324_v16 = vpop.eup %2323  ;;  %vm1694_vm14 = vweird.f32 %v2322_v48 }
 0x5e5   :  { %v1728_v3 = vmul.f32 %v2324_v16, %v1726_v10  ;;  %vm1695_vm0 = vmor %vm1693_vm15, %vm1694_vm14  ;;  %v1719_v44 = vor.u32 1.1754944e-38, %v1718_v21  ;;  %vm1717_vm5 = vcmp.eq.f32.partialorder %v1716_v26, 8.507059e+37  ;;  %vm1733_vm6 = vweird.f32 %v2324_v16 }
 0x5e6   :  { %v1690_v19 = vsub.f32 1.0, %v1689_v22  ;;  %vm1734_vm8 = vmor %vm1732_vm7, %vm1733_vm6 }
 0x5e7   :  { %v1729_v11 = vsub.f32 1.0, %v1728_v3 }
 0x5e8   :  { %v1691_v13 = vmul.f32 %v2322_v48, %v1690_v19 }
 0x5e9   :  { %v2326_v29 = vpop.eup %2325  ;;  %v1730_v45 = vmul.f32 %v2324_v16, %v1729_v11 }
 0x5ea   :  { %v1708_v33 = vmul.f32 %v2326_v29, %v1706_v60  ;;  %v1692_v32 = vadd.f32 %v2322_v48, %v1691_v13  ;;  %v2328_v8 = vpop.eup %2327  ;;  %vm1713_vm2 = vweird.f32 %v2326_v29 }
 0x5eb   :  { %vm1714_vm4 = vmor %vm1712_vm3, %vm1713_vm2  ;;  %v1731_v42 = vadd.f32 %v2324_v16, %v1730_v45 }
 0x5ec   :  { %v1709_v23 = vsub.f32 1.0, %v1708_v33  ;;  %v1696_v39 = vsel %vm1695_vm0, %v2322_v48, %v1692_v32 }
 0x5ed   :  { %v1701_v12 = vsel %vm1698_vm1, %v1700_v34, %v1696_v39  ;;  %v1735_v40 = vsel %vm1734_vm8, %v2324_v16, %v1731_v42 }
 0x5ee   :  { %v1710_v43 = vmul.f32 %v2326_v29, %v1709_v23  ;;  %v1743_v35 = vmul.f32 %v2328_v8, %v1701_v12  ;;  %v1740_v41 = vsel %vm1737_vm9, %v1739_v6, %v1735_v40  ;;  %v2066_v40 = vld [vmem:[%s4566_s11 + $0x68] sm:$0xff] }
 0x5f0   :  { %v1711_v57 = vadd.f32 %v2326_v29, %v1710_v43 }
 0x5f2   :  { %v1715_v9 = vsel %vm1714_vm4, %v2326_v29, %v1711_v57 }
 0x5f3   :  { %v1720_v2 = vsel %vm1717_vm5, %v1719_v44, %v1715_v9 }
 0x5f4   :  { %v1742_v37 = vmul.f32 %v1720_v2, %v4357_v54 }
 0x5f6   :  { %v4471_v4 = vadd.f32 %v1743_v35, %v1742_v37 }
 0x5f8   :  { %2329 = vtanh.f32 %v4471_v4 }
 0x5fe   :  { %v2330_v24 = vpop.eup %2329 }
 0x5ff   :  { %v1746_v14 = vmul.f32 %v2330_v24, %v1740_v41  ;;  %v4799_v24 = vld [vmem:[#allocation35_spill] sm:$0xff] }
 0x601   :  { %1767 = vmatmul.f32.vlgmr.msra.gmra.mxu1 %v1746_v14  ;;  %1787 = vmatmul.f32.vlgmr.msra.gmra.mxu2 %v1746_v14 }
 0x602   :  { %1807 = vmatmul.f32.vlgmr.msra.gmra.mxu3 %v1746_v14  ;;  %1827 = vmatmul.f32.vlgmr.msra.gmra.mxu0 %v1746_v14 }
 0x67e   :  { %v1768_v54 = vpop.f32.mrf.mxu1 }
 0x67f   :  { %v1831_v20 = vadd.f32 %v1768_v54, %v4795_v58  ;;  %v1828_v46 = vpop.f32.mrf.mxu0  ;;  %v2065_v54 = vld [vmem:[%s4566_s11 + $0x60] sm:$0xff]  ;;  %v4800_v58 = vld [vmem:[#allocation36_spill] sm:$0xff] }
 0x680   :  { %v1834_v1 = vadd.f32 %v1828_v46, %v4796_v0  ;;  %v2064_v0 = vld [vmem:[%s4566_s11 + $0x58] sm:$0xff] }
 0x681   :  { %v2178_v49 = vmul.f32 -1.442695, %v1831_v20 }
 0x682   :  { %v2180_v15 = vmul.f32 -1.442695, %v1834_v1 }
 0x683   :  { %2331 = vpow2.f32 %v2178_v49  ;;  %v2063_v49 = vld [vmem:[%s4566_s11 + $0x50] sm:$0xff] }
 0x684   :  { %2333 = vpow2.f32 %v2180_v15  ;;  %v1788_v7 = vpop.f32.mrf.mxu2 }
 0x685   :  { %v1832_v53 = vadd.f32 %v1788_v7, %v4797_v63  ;;  %v1808_v36 = vpop.f32.mrf.mxu3  ;;  %v4801_v7 = vld [vmem:[#allocation37_spill] sm:$0xff] }
 0x686   :  { %v1833_v59 = vadd.f32 %v1808_v36, %v4798_v38  ;;  %v2057_v38 = vld [vmem:[%s4566_s11 + $0x20] sm:$0xff] }
 0x687   :  { %v2179_v31 = vmul.f32 -1.442695, %v1832_v53  ;;  %v2062_v53 = vld [vmem:[%s4566_s11 + $0x48] sm:$0xff] }
 0x689   :  { %v2332_v17 = vpop.eup %2331  ;;  %2335 = vpow2.f32 %v2179_v31 }
 0x68a   :  { %v2334_v56 = vpop.eup %2333  ;;  %v1838_v25 = vadd.f32 1.0, %v2332_v17  ;;  %v2061_v17 = vld [vmem:[%s4566_s11 + $0x40] sm:$0xff] }
 0x68b   :  { %v1877_v5 = vadd.f32 1.0, %v2334_v56  ;;  %v2060_v56 = vld [vmem:[%s4566_s11 + $0x38] sm:$0xff] }
 0x68c   :  { %2337 = vrcp.f32 %v1838_v25  ;;  %v1850_v55 = vand.u32 2147483648, %v1838_v25  ;;  %v1848_v62 = vand.u32 2147483647, %v1838_v25  ;;  %vm1844_vm11 = vweird.f32 %v1838_v25 }
 0x68d   :  { %2339 = vrcp.f32 %v1877_v5  ;;  %v1889_v44 = vand.u32 2147483648, %v1877_v5  ;;  %vm1883_vm3 = vweird.f32 %v1877_v5  ;;  %v1887_v9 = vand.u32 2147483647, %v1877_v5 }
 0x68e   :  { %v1851_v16 = vor.u32 1.1754944e-38, %v1850_v55  ;;  %vm1849_vm13 = vcmp.eq.f32.partialorder %v1848_v62, 8.507059e+37  ;;  %v4802_v62 = vld [vmem:[#allocation38_spill] sm:$0xff] }
 0x68f   :  { %v2336_v51 = vpop.eup %2335  ;;  %v1890_v45 = vor.u32 1.1754944e-38, %v1889_v44  ;;  %vm1888_vm5 = vcmp.eq.f32.partialorder %v1887_v9, 8.507059e+37 }
 0x690   :  { %v1857_v18 = vadd.f32 1.0, %v2336_v51 }
 0x692   :  { %v2338_v52 = vpop.eup %2337  ;;  %2341 = vrcp.f32 %v1857_v18  ;;  %v1869_v33 = vand.u32 2147483648, %v1857_v18  ;;  %v1867_v34 = vand.u32 2147483647, %v1857_v18  ;;  %vm1863_vm15 = vweird.f32 %v1857_v18 }
 0x693   :  { %v1840_v10 = vmul.f32 %v2338_v52, %v1838_v25  ;;  %2343 = vtanh.f32 %v1833_v59  ;;  %v2340_v60 = vpop.eup %2339  ;;  %vm1845_vm10 = vweird.f32 %v2338_v52 }
 0x694   :  { %v1879_v30 = vmul.f32 %v2340_v60, %v1877_v5  ;;  %vm1846_vm12 = vmor %vm1844_vm11, %vm1845_vm10  ;;  %v1870_v21 = vor.u32 1.1754944e-38, %v1869_v33  ;;  %vm1868_vm1 = vcmp.eq.f32.partialorder %v1867_v34, 8.507059e+37  ;;  %vm1884_vm2 = vweird.f32 %v2340_v60  ;;  %v2059_v5 = vld [vmem:[%s4566_s11 + $0x30] sm:$0xff] }
 0x695   :  { %v1841_v50 = vsub.f32 1.0, %v1840_v10  ;;  %vm1885_vm4 = vmor %vm1883_vm3, %vm1884_vm2 }
 0x696   :  { %v1880_v39 = vsub.f32 1.0, %v1879_v30 }
 0x697   :  { %v1842_v48 = vmul.f32 %v2338_v52, %v1841_v50  ;;  %v2056_v50 = vld [vmem:[%s4566_s11 + $0x18] sm:$0xff] }
 0x698   :  { %v2342_v47 = vpop.eup %2341  ;;  %v1881_v26 = vmul.f32 %v2340_v60, %v1880_v39 }
 0x699   :  { %v1859_v22 = vmul.f32 %v2342_v47, %v1857_v18  ;;  %v1843_v19 = vadd.f32 %v2338_v52, %v1842_v48  ;;  %v2344_v29 = vpop.eup %2343  ;;  %vm1864_vm14 = vweird.f32 %v2342_v47  ;;  %v2058_v18 = vld [vmem:[%s4566_s11 + $0x28] sm:$0xff] }
 0x69a   :  { %vm1865_vm0 = vmor %vm1863_vm15, %vm1864_vm14  ;;  %v1882_v57 = vadd.f32 %v2340_v60, %v1881_v26 }
 0x69b   :  { %v1860_v13 = vsub.f32 1.0, %v1859_v22  ;;  %v1847_v27 = vsel %vm1846_vm12, %v2338_v52, %v1843_v19  ;;  %v2054_v19 = vld [vmem:[%s4566_s11 + $0x8] sm:$0xff] }
 0x69c   :  { %v1852_v32 = vsel %vm1849_vm13, %v1851_v16, %v1847_v27  ;;  %v1886_v2 = vsel %vm1885_vm4, %v2340_v60, %v1882_v57  ;;  %v2055_v60 = vld [vmem:[%s4566_s11 + $0x10] sm:$0xff]  ;;  %v2053_v16 = vld [vmem:[%s4566_s11] sm:$0xff] }
 0x69d   :  { %v1861_v3 = vmul.f32 %v2342_v47, %v1860_v13  ;;  %v1894_v23 = vmul.f32 %v2344_v29, %v1852_v32  ;;  %v1891_v42 = vsel %vm1888_vm5, %v1890_v45, %v1886_v2 }
 0x69f   :  { %v1862_v8 = vadd.f32 %v2342_v47, %v1861_v3 }
 0x6a1   :  { %v1866_v12 = vsel %vm1865_vm0, %v2342_v47, %v1862_v8 }
 0x6a2   :  { %v1871_v43 = vsel %vm1868_vm1, %v1870_v21, %v1866_v12 }
 0x6a3   :  { %v1893_v35 = vmul.f32 %v1871_v43, %v4471_v4  ;;  %v2068_v4 = vld [vmem:[%s4566_s11 + $0x78] sm:$0xff] }
 0x6a4   :  { %2073 = vmatpush.msra.mxu1 %v2068_v4 }
 0x6a5   :  { %v4479_v11 = vadd.f32 %v1894_v23, %v1893_v35 }
 0x6a6   :  { %2074 = vmatpush.msra.mxu1 %v2067_v28 }
 0x6a7   :  { %2345 = vtanh.f32 %v4479_v11 }
 0x6a8   :  { %2075 = vmatpush.msra.mxu1 %v2066_v40 }
 0x6aa   :  { %2076 = vmatpush.msra.mxu1 %v2065_v54 }
 0x6ac   :  { %2077 = vmatpush.msra.mxu1 %v2064_v0 }
 0x6ad   :  { %v2346_v37 = vpop.eup %2345 }
 0x6ae   :  { %v1897_v61 = vmul.f32 %v2346_v37, %v1891_v42  ;;  %2078 = vmatpush.msra.mxu1 %v2063_v49 }
 0x6b0   :  { %1918 = vmatmul.f32.vlgmr.msrb.gmra.mxu1 %v1897_v61  ;;  %1938 = vmatmul.f32.vlgmr.msrb.gmra.mxu2 %v1897_v61 }
 0x6b1   :  { %1958 = vmatmul.f32.vlgmr.msrb.gmra.mxu3 %v1897_v61  ;;  %1978 = vmatmul.f32.vlgmr.msrb.gmra.mxu0 %v1897_v61 }
 0x6b2   :  { %2079 = vmatpush.msra.mxu1 %v2062_v53 }
 0x6b4   :  { %2080 = vmatpush.msra.mxu1 %v2061_v17 }
 0x6b6   :  { %2081 = vmatpush.msra.mxu1 %v2060_v56 }
 0x6b8   :  { %2082 = vmatpush.msra.mxu1 %v2059_v5 }
 0x6ba   :  { %2083 = vmatpush.msra.mxu1 %v2058_v18 }
 0x6bc   :  { %2084 = vmatpush.msra.mxu1 %v2057_v38 }
 0x6be   :  { %2085 = vmatpush.msra.mxu1 %v2056_v50 }
 0x6c0   :  { %2086 = vmatpush.msra.mxu1 %v2055_v60 }
 0x6c2   :  { %2087 = vmatpush.msra.mxu1 %v2054_v19 }
 0x6c4   :  { %2088 = vmatpush.msra.mxu1 %v2053_v16 }
 0x72d   :  { %v1919_v6 = vpop.f32.mrf.mxu1 }
 0x72e   :  { %v1982_v41 = vadd.f32 %v1919_v6, %v4799_v24  ;;  %v1979_v14 = vpop.f32.mrf.mxu0 }
 0x72f   :  { %v1985_v20 = vadd.f32 %v1979_v14, %v4800_v58 }
 0x730   :  { %v2181_v46 = vmul.f32 -1.442695, %v1982_v41 }
 0x731   :  { %v2183_v1 = vmul.f32 -1.442695, %v1985_v20 }
 0x732   :  { %2347 = vpow2.f32 %v2181_v46  ;;  %v4803_v46 = vld [vmem:[#allocation39_spill] sm:$0xff] }
 0x733   :  { %2349 = vpow2.f32 %v2183_v1  ;;  %v1939_v15 = vpop.f32.mrf.mxu2 }
 0x734   :  { %v1983_v63 = vadd.f32 %v1939_v15, %v4801_v7  ;;  %v1959_v10 = vpop.f32.mrf.mxu3  ;;  %v2189_v15 = vld [vmem:[%s4565_s12] ss:$0 sm:$0xff] }
 0x735   :  { %v1984_v47 = vadd.f32 %v1959_v10, %v4802_v62 }
 0x736   :  { %v2182_v31 = vmul.f32 -1.442695, %v1983_v63 }
 0x738   :  { %v2348_v25 = vpop.eup %2347  ;;  %2351 = vpow2.f32 %v2182_v31 }
 0x739   :  { %v2350_v51 = vpop.eup %2349  ;;  %v1989_v36 = vadd.f32 1.0, %v2348_v25 }
 0x73a   :  { %v4518_v52 = vadd.f32 1.0, %v2350_v51 }
 0x73b   :  { %2353 = vrcp.f32 %v1989_v36  ;;  %v2001_v13 = vand.u32 2147483648, %v1989_v36  ;;  %v1999_v33 = vand.u32 2147483647, %v1989_v36  ;;  %vm1995_vm7 = vweird.f32 %v1989_v36 }
 0x73c   :  { %2355 = vrcp.f32 %v4518_v52  ;;  %v2040_v6 = vand.u32 2147483648, %v4518_v52  ;;  %vm2034_vm15 = vweird.f32 %v4518_v52  ;;  %v2038_v24 = vand.u32 2147483647, %v4518_v52 }
 0x73d   :  { %v2002_v39 = vor.u32 1.1754944e-38, %v2001_v13  ;;  %vm2000_vm9 = vcmp.eq.f32.partialorder %v1999_v33, 8.507059e+37 }
 0x73e   :  { %v2352_v59 = vpop.eup %2351  ;;  %v2041_v14 = vor.u32 1.1754944e-38, %v2040_v6  ;;  %vm2039_vm1 = vcmp.eq.f32.partialorder %v2038_v24, 8.507059e+37 }
 0x73f   :  { %v2008_v55 = vadd.f32 1.0, %v2352_v59 }
 0x741   :  { %v2354_v48 = vpop.eup %2353  ;;  %2357 = vrcp.f32 %v2008_v55  ;;  %v2020_v43 = vand.u32 2147483648, %v2008_v55  ;;  %v2018_v57 = vand.u32 2147483647, %v2008_v55  ;;  %vm2014_vm11 = vweird.f32 %v2008_v55 }
 0x742   :  { %v1991_v22 = vmul.f32 %v2354_v48, %v1989_v36  ;;  %2359 = vtanh.f32 %v1984_v47  ;;  %v2356_v27 = vpop.eup %2355  ;;  %vm1996_vm6 = vweird.f32 %v2354_v48 }
 0x743   :  { %v2030_v23 = vmul.f32 %v2356_v27, %v4518_v52  ;;  %vm1997_vm8 = vmor %vm1995_vm7, %vm1996_vm6  ;;  %v2021_v45 = vor.u32 1.1754944e-38, %v2020_v43  ;;  %vm2019_vm13 = vcmp.eq.f32.partialorder %v2018_v57, 8.507059e+37  ;;  %vm2035_vm14 = vweird.f32 %v2356_v27  ;;  %v2190_v57 = vld [vmem:[%s4568_s13] ss:$0 sm:$0xff] }
 0x744   :  { %v1992_v30 = vsub.f32 1.0, %v1991_v22  ;;  %vm2036_vm0 = vmor %vm2034_vm15, %vm2035_vm14 }
 0x745   :  { %v2031_v9 = vsub.f32 1.0, %v2030_v23 }
 0x746   :  { %v1993_v29 = vmul.f32 %v2354_v48, %v1992_v30 }
 0x747   :  { %v2358_v32 = vpop.eup %2357  ;;  %v2032_v42 = vmul.f32 %v2356_v27, %v2031_v9 }
 0x748   :  { %v2010_v3 = vmul.f32 %v2358_v32, %v2008_v55  ;;  %v1994_v34 = vadd.f32 %v2354_v48, %v1993_v29  ;;  %v2360_v12 = vpop.eup %2359  ;;  %vm2015_vm10 = vweird.f32 %v2358_v32 }
 0x749   :  { %vm2016_vm12 = vmor %vm2014_vm11, %vm2015_vm10  ;;  %v2033_v40 = vadd.f32 %v2356_v27, %v2032_v42 }
 0x74a   :  { %v2011_v8 = vsub.f32 1.0, %v2010_v3  ;;  %v1998_v21 = vsel %vm1997_vm8, %v2354_v48, %v1994_v34 }
 0x74b   :  { %v2003_v26 = vsel %vm2000_vm9, %v2002_v39, %v1998_v21  ;;  %v2037_v41 = vsel %vm2036_vm0, %v2356_v27, %v2033_v40 }
 0x74c   :  { %v2012_v35 = vmul.f32 %v2358_v32, %v2011_v8  ;;  %v2045_v44 = vmul.f32 %v2360_v12, %v2003_v26  ;;  %v2042_v58 = vsel %vm2039_vm1, %v2041_v14, %v2037_v41 }
 0x74e   :  { %v2013_v2 = vadd.f32 %v2358_v32, %v2012_v35 }
 0x750   :  { %v2017_v37 = vsel %vm2016_vm12, %v2358_v32, %v2013_v2 }
 0x751   :  { %v2022_v61 = vsel %vm2019_vm13, %v2021_v45, %v2017_v37 }
 0x752   :  { %v2044_v4 = vmul.f32 %v2022_v61, %v4479_v11  ;;  %v2051_v11 = vld [vmem:[%s4567_s1] sm:$0xff] }
 0x754   :  { %v2046_v28 = vadd.f32 %v2045_v44, %v2044_v4 }
 0x756   :  { %2361 = vtanh.f32 %v2046_v28 }
 0x75c   :  { %v2362_v54 = vpop.eup %2361 }
 0x75d   :  { %v2048_v20 = vmul.f32 %v2362_v54, %v2042_v58 }
 0x75f   :  { %v2049_v0 = vadd.f32 %v2048_v20, %v4803_v46 }
 0x761   :  { %v2050_v1 = vmul.f32 0.5, %v2049_v0 }
 0x763   :  { %v2052_v49 = vadd.f32 %v2051_v11, %v2050_v1 }
 0x765   :  { %2089 = vmatmul.f32.vlgmr.msra.gmra.mxu1 %v2052_v49 }
 0x7e2   :  { %v2090_v7 = vpop.f32.mrf.mxu1 }
 0x7e3   :  { %v2091_v63 = vadd.f32 %v2189_v15, %v2090_v7 }
 0x7e5   :  { %v2094_v53 = vmul.f32 0.70710677, %v2091_v63  ;;  %v2093_v26 = vmul.f32 0.5, %v2091_v63 }
 0x7e7   :  { %v2095_v31 = vmul.f32 %v2094_v53, %v2094_v53 }
 0x7e9   :  { %v2096_v17 = vmin.f32 %v2095_v31, 16.0 }
 0x7eb   :  { %v2097_v56 = vmul.f32 2.1237322e-06, %v2096_v17  ;;  %v2108_v25 = vmul.f32 3.8918573e-05, %v2096_v17 }
 0x7ed   :  { %v2098_v5 = vadd.f32 0.00028619796, %v2097_v56  ;;  %v2109_v51 = vadd.f32 0.001143296, %v2108_v25 }
 0x7ef   :  { %v2099_v36 = vmul.f32 %v2098_v5, %v2096_v17  ;;  %v2110_v18 = vmul.f32 %v2109_v51, %v2096_v17 }
 0x7f1   :  { %v2111_v52 = vadd.f32 0.014752088, %v2110_v18  ;;  %v2100_v38 = vadd.f32 0.0036580483, %v2099_v36 }
 0x7f3   :  { %v2112_v59 = vmul.f32 %v2111_v52, %v2096_v17  ;;  %v2101_v50 = vmul.f32 %v2100_v38, %v2096_v17 }
 0x7f5   :  { %v2113_v10 = vadd.f32 0.112945676, %v2112_v59  ;;  %v2102_v48 = vadd.f32 0.05243302, %v2101_v50 }
 0x7f7   :  { %v2114_v55 = vmul.f32 %v2113_v10, %v2096_v17  ;;  %v2103_v22 = vmul.f32 %v2102_v48, %v2096_v17 }
 0x7f9   :  { %v2115_v60 = vadd.f32 0.4994258, %v2114_v55  ;;  %v2104_v19 = vadd.f32 0.18741608, %v2103_v22 }
 0x7fb   :  { %v2116_v62 = vmul.f32 %v2115_v60, %v2096_v17  ;;  %v2105_v16 = vmul.f32 %v2104_v19, %v2096_v17 }
 0x7fd   :  { %v2117_v47 = vadd.f32 1.0, %v2116_v62  ;;  %v2106_v33 = vadd.f32 1.1283791, %v2105_v16 }
 0x7ff   :  { %2363 = vrcp.f32 %v2117_v47  ;;  %v2129_v29 = vand.u32 2147483648, %v2117_v47  ;;  %v2127_v3 = vand.u32 2147483647, %v2117_v47  ;;  %vm2123_vm3 = vweird.f32 %v2117_v47 }
 0x800   :  { %v2107_v39 = vmul.f32 %v2106_v33, %v2094_v53 }
 0x801   :  { %v2130_v23 = vor.u32 1.1754944e-38, %v2129_v29  ;;  %vm2128_vm5 = vcmp.eq.f32.partialorder %v2127_v3, 8.507059e+37 }
 0x805   :  { %v2364_v30 = vpop.eup %2363 }
 0x806   :  { %v2119_v13 = vmul.f32 %v2364_v30, %v2117_v47  ;;  %vm2124_vm2 = vweird.f32 %v2364_v30 }
 0x807   :  { %vm2125_vm4 = vmor %vm2123_vm3, %vm2124_vm2 }
 0x808   :  { %v2120_v27 = vsub.f32 1.0, %v2119_v13 }
 0x80a   :  { %v2121_v32 = vmul.f32 %v2364_v30, %v2120_v27 }
 0x80c   :  { %v2122_v34 = vadd.f32 %v2364_v30, %v2121_v32 }
 0x80e   :  { %v2126_v8 = vsel %vm2125_vm4, %v2364_v30, %v2122_v34 }
 0x80f   :  { %v2131_v21 = vsel %vm2128_vm5, %v2130_v23, %v2126_v8 }
 0x810   :  { %v2132_v12 = vmul.f32 %v2131_v21, %v2107_v39 }
 0x812   :  { %v2184_v43 = vclamps-f32 %v2132_v12, 1.0 }
 0x814   :  { %v2135_v35 = vadd.f32 1.0, %v2184_v43 }
 0x816   :  { %v2136_v44 = vmul.f32 %v2135_v35, %v2093_v26 }
 0x818   :  { %v2141_v9 = vmul.f32 %v2190_v57, %v2136_v44 }
 0x81a   :  { %2142 = vadd.xlane.f32.xlu1 %v2141_v9 }
 0x88d   :  { %v2143_v2 = vpop.xlane.xlu1 %2142 }
 0x88e   :  { %2144 = vst [vmem:[%s4569_s14] sm:$0xff] %v2143_v2 }

</bundles_post_ra>
